<compile_context>
chip_gen: v6e
topology: v6e:2x2x1
jax: 0.10.0
libtpu: 0.0.40
codegen_flags: <defaults>
</compile_context>

<pallas_src>
import functools

import jax
import jax.numpy as jnp
from jax.experimental import pallas as pl
from jax.experimental.pallas import tpu as pltpu

EPS = 1e-5     # nn.BatchNorm2d default
LANES = 128


def _round_up(x, m):
    return (x + m - 1) // m * m


# ------------------------- Pallas kernels -------------------------

def _make_conv_kernel(metas, w_out):
    """Kernel computing sum over branches of a 3x3 replicate-padded conv (+bias).

    Per branch the refs are [x_row_k0, x_row_k1, x_row_k2, w(9,Cin,Cpad), b(1,Cpad)];
    the single output block is (1, 1, w_out, Cpad).
    """

    def kernel(*refs):
        o_ref = refs[-1]
        acc = None
        pos = 0
        for meta in metas:
            x_refs = refs[pos:pos + 3]
            w_ref = refs[pos + 3]
            b_ref = refs[pos + 4]
            pos += 5
            s = meta["stride"]
            c_in = meta["c_in"]
            # (Wg, s*c_in) rows for kernel-row offsets ki = 0, 1, 2
            rows = [r[...][0, 0] for r in x_refs]
            for ki in range(3):
                for kj in range(3):
                    g0 = kj // s                     # column-group offset
                    c0 = (kj % s) * c_in             # phase-within-group channel offset
                    patch = rows[ki][g0:g0 + w_out, c0:c0 + c_in]
                    t = jnp.dot(patch, w_ref[ki * 3 + kj],
                                preferred_element_type=jnp.float32)
                    acc = t if acc is None else acc + t
            acc = acc + b_ref[...]                   # (w_out, Cpad) + (1, Cpad)
        o_ref[...] = acc[None, None].astype(o_ref.dtype)

    return kernel


def _bn_stats_kernel(y_ref, g_ref, b_ref, stats_ref, *, inv_count):
    # Pass 1: per-channel sum / sumsq accumulated over M-tiles; finalize to
    # scale = gamma * rsqrt(var + eps), shift = beta - mean * scale.
    i = pl.program_id(0)

    @pl.when(i == 0)
    def _():
        stats_ref[...] = jnp.zeros_like(stats_ref)

    y = y_ref[...]
    stats_ref[0:1, :] += jnp.sum(y, axis=0, keepdims=True)
    stats_ref[1:2, :] += jnp.sum(y * y, axis=0, keepdims=True)

    @pl.when(i == pl.num_programs(0) - 1)
    def _():
        mean = stats_ref[0:1, :] * inv_count
        var = stats_ref[1:2, :] * inv_count - mean * mean     # biased var (torch train mode)
        scale = g_ref[...] * jax.lax.rsqrt(var + EPS)
        stats_ref[0:1, :] = scale
        stats_ref[1:2, :] = b_ref[...] - mean * scale


def _bn_apply_kernel(y_ref, stats_ref, alpha_ref, o_ref):
    # Pass 2: fused per-channel affine (scale/shift) + PReLU, tiled over M.
    z = y_ref[...] * stats_ref[0:1, :] + stats_ref[1:2, :]
    a = alpha_ref[0, 0]
    o_ref[...] = jnp.where(z >= 0, z, a * z)


# ------------------------- wrappers -------------------------

def _prep_input(x_nhwc, stride):
    """Replicate-pad spatially and fold the stride-s column phase into the lane axis.

    (N, H, W, C) -> (N, H+2, Wg, stride*C) where [n, i, g, q*C + c] = padded[n, i, g*stride+q, c].
    The reshape is free in XLA (no data duplication); all column shifts inside the kernel
    then become static slices.
    """
    n, h, w, c = x_nhwc.shape
    xp = jnp.pad(x_nhwc, ((0, 0), (1, 1), (1, 1), (0, 0)), mode="edge")
    wp = w + 2
    wp_pad = _round_up(wp, stride)
    if wp_pad > wp:
        xp = jnp.pad(xp, ((0, 0), (0, 0), (0, wp_pad - wp), (0, 0)), mode="edge")
    return xp.reshape(n, h + 2, wp_pad // stride, stride * c)


def _prep_weight(w, c_in_slab, c_pad_out, dtype):
    """(C_out, C_in, 3, 3) -> (9, c_in_slab, c_pad_out), zero-padded, tap index = ki*3+kj."""
    c_out, c_in, kh, kw = w.shape
    wt = jnp.transpose(w, (2, 3, 1, 0)).reshape(kh * kw, c_in, c_out)
    wt = jnp.pad(wt, ((0, 0), (0, c_in_slab - c_in), (0, c_pad_out - c_out)))
    return wt.astype(dtype)


def conv3x3(branches, c_pad_out, compute_dtype=jnp.float32):
    """Fused replicate-padded 3x3 conv(s): out = sum_b [conv(x_b, w_b, stride_b) + bias_b].

    branches: list of (x_nhwc, w, b, stride).  All branches must map to the same output
    spatial shape.  Returns (N, H_out, W_out, c_pad_out) float32 with zeros in padded lanes.
    """
    metas, inputs, in_specs = [], [], []
    h_out = w_out = None
    n_batch = branches[0][0].shape[0]
    flops = 0
    bytes_acc = 0

    for (x_nhwc, w, b, stride) in branches:
        n, h, w_sp, c_slab = x_nhwc.shape
        assert n == n_batch
        ho = (h - 1) // stride + 1
        wo = (w_sp - 1) // stride + 1
        if h_out is None:
            h_out, w_out = ho, wo
        assert (ho, wo) == (h_out, w_out), "all branches must share the output shape"

        xg = _prep_input(x_nhwc.astype(compute_dtype), stride)
        wt = _prep_weight(w, c_slab, c_pad_out, compute_dtype)
        bt = jnp.pad(b.astype(jnp.float32), (0, c_pad_out - b.shape[0])).reshape(1, c_pad_out)
        wg = xg.shape[2]

        metas.append(dict(stride=stride, c_in=c_slab))
        inputs += [xg, xg, xg, wt, bt]
        # three row-shifted windows of the same padded input (ki = 0, 1, 2)
        for ki in range(3):
            in_specs.append(pl.BlockSpec(
                (1, 1, wg, stride * c_slab),
                lambda nn, hh, s=stride, k=ki: (nn, s * hh + k, 0, 0)))
        in_specs.append(pl.BlockSpec((9, c_slab, c_pad_out), lambda nn, hh: (0, 0, 0)))
        in_specs.append(pl.BlockSpec((1, c_pad_out), lambda nn, hh: (0, 0)))

        flops += 2 * n_batch * h_out * w_out * 9 * c_slab * c_pad_out
        bytes_acc += (3 * xg.size * xg.dtype.itemsize
                      + wt.size * wt.dtype.itemsize
                      + bt.size * bt.dtype.itemsize)
    bytes_acc += n_batch * h_out * w_out * c_pad_out * 4

    kernel = _make_conv_kernel(metas, w_out)
    return pl.pallas_call(
        kernel,
        out_shape=jax.ShapeDtypeStruct((n_batch, h_out, w_out, c_pad_out), jnp.float32),
        grid=(n_batch, h_out),
        in_specs=in_specs,
        out_specs=pl.BlockSpec((1, 1, w_out, c_pad_out), lambda nn, hh: (nn, hh, 0, 0)),
        compiler_params=pltpu.CompilerParams(
            dimension_semantics=("parallel", "parallel"),
            vmem_limit_bytes=32 * 1024 * 1024),
        cost_estimate=pl.CostEstimate(flops=flops, transcendentals=0,
                                      bytes_accessed=bytes_acc),
    )(*inputs)


def bn_prelu(y_slab, gamma, beta, alpha, c_pad, tm=512):
    """Training-mode BatchNorm + PReLU over a lane-dense [M, c_pad] slab (two tiled passes)."""
    m = y_slab.shape[0]
    tm = min(tm, _round_up(m, 8))
    m_pad = _round_up(m, tm)
    if m_pad > m:
        # zero rows do not perturb sum / sumsq; we divide by the true M below.
        y_slab = jnp.pad(y_slab, ((0, m_pad - m), (0, 0)))

    g = jnp.pad(gamma.astype(jnp.float32), (0, c_pad - gamma.shape[0])).reshape(1, c_pad)
    b = jnp.pad(beta.astype(jnp.float32), (0, c_pad - beta.shape[0])).reshape(1, c_pad)

    stats = pl.pallas_call(
        functools.partial(_bn_stats_kernel, inv_count=1.0 / m),
        out_shape=jax.ShapeDtypeStruct((2, c_pad), jnp.float32),
        grid=(m_pad // tm,),
        in_specs=[pl.BlockSpec((tm, c_pad), lambda i: (i, 0)),
                  pl.BlockSpec((1, c_pad), lambda i: (0, 0)),
                  pl.BlockSpec((1, c_pad), lambda i: (0, 0))],
        out_specs=pl.BlockSpec((2, c_pad), lambda i: (0, 0)),
        compiler_params=pltpu.CompilerParams(dimension_semantics=("arbitrary",)),
    )(y_slab, g, b)

    alpha_arr = jnp.reshape(jnp.asarray(alpha, jnp.float32), (1, 1))
    out = pl.pallas_call(
        _bn_apply_kernel,
        out_shape=jax.ShapeDtypeStruct((m_pad, c_pad), jnp.float32),
        grid=(m_pad // tm,),
        in_specs=[pl.BlockSpec((tm, c_pad), lambda i: (i, 0)),
                  pl.BlockSpec((2, c_pad), lambda i: (0, 0)),
                  pl.BlockSpec(memory_space=pltpu.MemorySpace.SMEM)],
        out_specs=pl.BlockSpec((tm, c_pad), lambda i: (i, 0)),
        compiler_params=pltpu.CompilerParams(dimension_semantics=("parallel",)),
    )(y_slab, stats, alpha_arr)
    return out[:m]


def res_block_forward(x_nchw, p, downsample=False, compute_dtype=jnp.float32):
    """Pallas implementation of ResBlock.forward.  x: (N, C_in, H, W) float32, NCHW."""
    s = 2 if downsample else 1
    c_out = p["w1"].shape[0]
    c_pad = _round_up(c_out, LANES)

    x = jnp.transpose(x_nchw, (0, 2, 3, 1)).astype(jnp.float32)   # NHWC once, at entry
    n = x.shape[0]

    # res = relu1(bn1(conv1(x)))
    y1 = conv3x3([(x, p["w1"], p["b1"], s)], c_pad, compute_dtype)
    _, ho, wo, _ = y1.shape
    m = n * ho * wo
    a1 = bn_prelu(y1.reshape(m, c_pad), p["g1"], p["be1"], p["a1"], c_pad)
    a1 = a1.reshape(n, ho, wo, c_pad)

    # res = conv2(res); res += conv3(x)   -> single fused dual-branch kernel
    y2 = conv3x3([(a1, p["w2"], p["b2"], 1),
                  (x, p["w3"], p["b3"], s)], c_pad, compute_dtype)

    # res = relu2(bn2(res))
    out = bn_prelu(y2.reshape(m, c_pad), p["g2"], p["be2"], p["a2"], c_pad)
    out = out.reshape(n, ho, wo, c_pad)[..., :c_out]
    return jnp.transpose(out, (0, 3, 1, 2))                        # back to NCHW


# ------------------------- pure-JAX reference -------------------------

def ref_forward(x, p, downsample=False):
    s = 2 if downsample else 1

    def conv(x_, w, b, st):
        xp = jnp.pad(x_, ((0, 0), (0, 0), (1, 1), (1, 1)), mode="edge")
        y = jax.lax.conv_general_dilated(
            xp, w, (st, st), "VALID", dimension_numbers=("NCHW", "OIHW", "NCHW"))
        return y + b[None, :, None, None]

    def bn(y, g, be):
        mu = jnp.mean(y, axis=(0, 2, 3), keepdims=True)
        v = jnp.mean((y - mu) ** 2, axis=(0, 2, 3), keepdims=True)
        return (y - mu) * jax.lax.rsqrt(v + EPS) * g[None, :, None, None] \
            + be[None, :, None, None]

    def prelu(y, a):
        return jnp.where(y >= 0, y, a * y)

    r = prelu(bn(conv(x, p["w1"], p["b1"], s), p["g1"], p["be1"]), p["a1"])
    r = conv(r, p["w2"], p["b2"], 1) + conv(x, p["w3"], p["b3"], s)
    return prelu(bn(r, p["g2"], p["be2"]), p["a2"])


# ------------------------- main -------------------------

if __name__ == "__main__":
    N, C_in, H, W = 2, 4, 16, 16
    C_out = 8

    key = jax.random.PRNGKey(0)
    ks = jax.random.split(key, 9)
    params = {
        # conv1: in -> out (stride = init_layer_stride)
        "w1": 0.1 * jax.random.normal(ks[0], (C_out, C_in, 3, 3), jnp.float32),
        "b1": 0.1 * jax.random.normal(ks[1], (C_out,), jnp.float32),
        # conv2: out -> out (stride 1)
        "w2": 0.1 * jax.random.normal(ks[2], (C_out, C_out, 3, 3), jnp.float32),
        "b2": 0.1 * jax.random.normal(ks[3], (C_out,), jnp.float32),
        # conv3 (skip): in -> out (stride = init_layer_stride)
        "w3": 0.1 * jax.random.normal(ks[4], (C_out, C_in, 3, 3), jnp.float32),
        "b3": 0.1 * jax.random.normal(ks[5], (C_out,), jnp.float32),
        # bn1 / bn2 affine params
        "g1": 1.0 + 0.1 * jax.random.normal(ks[6], (C_out,), jnp.float32),
        "be1": 0.1 * jax.random.normal(ks[7], (C_out,), jnp.float32),
        "g2": 1.0 + 0.05 * jax.random.normal(ks[8], (C_out,), jnp.float32),
        "be2": jnp.zeros((C_out,), jnp.float32),
        # PReLU single-parameter (torch default init 0.25)
        "a1": jnp.float32(0.25),
        "a2": jnp.float32(0.25),
    }

    x = jax.random.normal(jax.random.PRNGKey(42), (N, C_in, H, W), jnp.float32)

    # 1) f32 MXU path, stride-1 block
    fwd = jax.jit(functools.partial(res_block_forward, downsample=False))
    out = jax.block_until_ready(fwd(x, params))
    ref = ref_forward(x, params, downsample=False)
    assert out.shape == ref.shape, (out.shape, ref.shape)
    err = float(jnp.max(jnp.abs(out - ref)))
    assert err < 2e-3, err

    # 2) stride-2 (downsample) path, f32
    fwd_ds = jax.jit(functools.partial(res_block_forward, downsample=True))
    out_ds = jax.block_until_ready(fwd_ds(x, params))
    ref_ds = ref_forward(x, params, downsample=True)
    assert out_ds.shape == ref_ds.shape, (out_ds.shape, ref_ds.shape)
    err_ds = float(jnp.max(jnp.abs(out_ds - ref_ds)))
    assert err_ds < 2e-3, err_ds

    # 3) bf16 MXU inputs (v6e/v7x fast path): f32 accumulation + f32 BN statistics.
    #    Loose bound vs. the f32 reference purely due to bf16 input rounding.
    fwd_bf = jax.jit(functools.partial(res_block_forward, downsample=False,
                                       compute_dtype=jnp.bfloat16))
    out_bf = jax.block_until_ready(fwd_bf(x, params))
    err_bf = float(jnp.max(jnp.abs(out_bf - ref)))
    assert err_bf < 1e-1, err_bf

    print("KERNEL_OK")
</pallas_src>

<mosaic_0001>
module attributes {stable_mosaic.version = 11 : i64} {
  func.func @_bn_apply_kernel(%arg0: i32, %arg1: memref<512x128xf32, #tpu.memory_space<vmem>>, %arg2: memref<2x128xf32, #tpu.memory_space<vmem>>, %arg3: memref<1x1xf32, #tpu.memory_space<smem>>, %arg4: memref<512x128xf32, #tpu.memory_space<vmem>>) attributes {dimension_semantics = [#tpu.dimension_semantics<parallel>], iteration_bounds = array<i64: 1>, scalar_prefetch = 0 : i64, scratch_operands = 0 : i64, tpu.core_type = #tpu.core_type<tc>, window_params = [{transform_indices = @transform_0, window_bounds = array<i64: 512, 128>}, {pipeline_mode = #tpu.pipeline_mode<synchronous>, transform_indices = @transform_1, window_bounds = array<i64: 2, 128>}, {transform_indices = @transform_2, window_bounds = array<i64: 1, 1>}, {transform_indices = @transform_3, window_bounds = array<i64: 512, 128>}]} {
    %c0 = arith.constant 0 : index
    %c0_0 = arith.constant 0 : index
    %0 = vector.load %arg1[%c0, %c0_0] : memref<512x128xf32, #tpu.memory_space<vmem>>, vector<512x128xf32>
    %c0_1 = arith.constant 0 : index
    %c0_2 = arith.constant 0 : index
    %1 = vector.load %arg2[%c0_1, %c0_2] : memref<2x128xf32, #tpu.memory_space<vmem>>, vector<1x128xf32>
    %2 = vector.broadcast %1 : vector<1x128xf32> to vector<512x128xf32>
    %3 = arith.mulf %0, %2 : vector<512x128xf32>
    %c1 = arith.constant 1 : index
    %c0_3 = arith.constant 0 : index
    %4 = vector.load %arg2[%c1, %c0_3] : memref<2x128xf32, #tpu.memory_space<vmem>>, vector<1x128xf32>
    %5 = vector.broadcast %4 : vector<1x128xf32> to vector<512x128xf32>
    %6 = arith.addf %3, %5 : vector<512x128xf32>
    %c0_4 = arith.constant 0 : index
    %c0_5 = arith.constant 0 : index
    %7 = memref.load %arg3[%c0_4, %c0_5] : memref<1x1xf32, #tpu.memory_space<smem>>
    %cst = arith.constant 0.000000e+00 : f32
    %8 = vector.broadcast %cst : f32 to vector<512x128xf32>
    %9 = arith.cmpf oge, %6, %8 : vector<512x128xf32>
    %10 = vector.broadcast %7 : f32 to vector<512x128xf32>
    %11 = arith.mulf %10, %6 : vector<512x128xf32>
    %12 = arith.select %9, %6, %11 : vector<512x128xi1>, vector<512x128xf32>
    %c0_6 = arith.constant 0 : index
    %c0_7 = arith.constant 0 : index
    %13 = vector.load %arg4[%c0_6, %c0_7] : memref<512x128xf32, #tpu.memory_space<vmem>>, vector<512x128xf32>
    tpu.vector_store %arg4[%c0_6, %c0_7], %12 {strides = array<i32>} : memref<512x128xf32, #tpu.memory_space<vmem>>, vector<512x128xf32>,
    return
  }
  func.func @transform_0(%arg0: i32) -> (i32, i32) {
    %c0_i32 = arith.constant 0 : i32
    %c0_i32_0 = arith.constant 0 : i32
    return %arg0, %c0_i32 : i32, i32
  }
  func.func @transform_1(%arg0: i32) -> (i32, i32) {
    %c0_i32 = arith.constant 0 : i32
    %c0_i32_0 = arith.constant 0 : i32
    %c0_i32_1 = arith.constant 0 : i32
    return %c0_i32, %c0_i32_0 : i32, i32
  }
  func.func @transform_2(%arg0: i32) -> (i32, i32) {
    %c0_i32 = arith.constant 0 : i32
    %c0_i32_0 = arith.constant 0 : i32
    %c0_i32_1 = arith.constant 0 : i32
    return %c0_i32, %c0_i32_0 : i32, i32
  }
  func.func @transform_3(%arg0: i32) -> (i32, i32) {
    %c0_i32 = arith.constant 0 : i32
    %c0_i32_0 = arith.constant 0 : i32
    return %arg0, %c0_i32 : i32, i32
  }
}

module attributes {stable_mosaic.version = 11 : i64} {
  func.func @kernel(%arg0: i32, %arg1: i32, %arg2: memref<1x1x18x4xf32, #tpu.memory_space<vmem>>, %arg3: memref<1x1x18x4xf32, #tpu.memory_space<vmem>>, %arg4: memref<1x1x18x4xf32, #tpu.memory_space<vmem>>, %arg5: memref<9x4x128xf32, #tpu.memory_space<vmem>>, %arg6: memref<1x128xf32, #tpu.memory_space<vmem>>, %arg7: memref<1x1x16x128xf32, #tpu.memory_space<vmem>>) attributes {dimension_semantics = [#tpu.dimension_semantics<parallel>, #tpu.dimension_semantics<parallel>], iteration_bounds = array<i64: 2, 16>, scalar_prefetch = 0 : i64, scratch_operands = 0 : i64, tpu.core_type = #tpu.core_type<tc>, window_params = [{transform_indices = @transform_0, window_bounds = array<i64: 1, 1, 18, 4>}, {transform_indices = @transform_1, window_bounds = array<i64: 1, 1, 18, 4>}, {transform_indices = @transform_2, window_bounds = array<i64: 1, 1, 18, 4>}, {pipeline_mode = #tpu.pipeline_mode<synchronous>, transform_indices = @transform_3, window_bounds = array<i64: 9, 4, 128>}, {pipeline_mode = #tpu.pipeline_mode<synchronous>, transform_indices = @transform_4, window_bounds = array<i64: 1, 128>}, {transform_indices = @transform_5, window_bounds = array<i64: 1, 1, 16, 128>}]} {
    %c0 = arith.constant 0 : index
    %c0_0 = arith.constant 0 : index
    %c0_1 = arith.constant 0 : index
    %c0_2 = arith.constant 0 : index
    %0 = vector.load %arg2[%c0, %c0_0, %c0_1, %c0_2] : memref<1x1x18x4xf32, #tpu.memory_space<vmem>>, vector<1x1x18x4xf32>
    %1 = vector.shape_cast %0 : vector<1x1x18x4xf32> to vector<18x4xf32>
    %c0_3 = arith.constant 0 : index
    %c0_4 = arith.constant 0 : index
    %c0_5 = arith.constant 0 : index
    %c0_6 = arith.constant 0 : index
    %2 = vector.load %arg3[%c0_3, %c0_4, %c0_5, %c0_6] : memref<1x1x18x4xf32, #tpu.memory_space<vmem>>, vector<1x1x18x4xf32>
    %3 = vector.shape_cast %2 : vector<1x1x18x4xf32> to vector<18x4xf32>
    %c0_7 = arith.constant 0 : index
    %c0_8 = arith.constant 0 : index
    %c0_9 = arith.constant 0 : index
    %c0_10 = arith.constant 0 : index
    %4 = vector.load %arg4[%c0_7, %c0_8, %c0_9, %c0_10] : memref<1x1x18x4xf32, #tpu.memory_space<vmem>>, vector<1x1x18x4xf32>
    %5 = vector.shape_cast %4 : vector<1x1x18x4xf32> to vector<18x4xf32>
    %6 = vector.extract_strided_slice %1 {offsets = [0, 0], sizes = [16, 4], strides = [1, 1]} : vector<18x4xf32> to vector<16x4xf32>
    %c0_11 = arith.constant 0 : index
    %c0_12 = arith.constant 0 : index
    %c0_13 = arith.constant 0 : index
    %7 = vector.load %arg5[%c0_11, %c0_12, %c0_13] : memref<9x4x128xf32, #tpu.memory_space<vmem>>, vector<1x4x128xf32>
    %8 = vector.shape_cast %7 : vector<1x4x128xf32> to vector<4x128xf32>
    %cst = arith.constant dense<0.000000e+00> : vector<16x128xf32>
    %9 = tpu.matmul %6, %8, %cst {dimension_numbers = #tpu.dot_dimension_numbers<[1], [0], [0], [1], [0, 0, 1, 1], [], []>} : vector<16x4xf32>, vector<4x128xf32>, vector<16x128xf32> -> vector<16x128xf32>
    %10 = vector.extract_strided_slice %1 {offsets = [1, 0], sizes = [16, 4], strides = [1, 1]} : vector<18x4xf32> to vector<16x4xf32>
    %c1 = arith.constant 1 : index
    %c0_14 = arith.constant 0 : index
    %c0_15 = arith.constant 0 : index
    %11 = vector.load %arg5[%c1, %c0_14, %c0_15] : memref<9x4x128xf32, #tpu.memory_space<vmem>>, vector<1x4x128xf32>
    %12 = vector.shape_cast %11 : vector<1x4x128xf32> to vector<4x128xf32>
    %cst_16 = arith.constant dense<0.000000e+00> : vector<16x128xf32>
    %13 = tpu.matmul %10, %12, %cst_16 {dimension_numbers = #tpu.dot_dimension_numbers<[1], [0], [0], [1], [0, 0, 1, 1], [], []>} : vector<16x4xf32>, vector<4x128xf32>, vector<16x128xf32> -> vector<16x128xf32>
    %14 = arith.addf %9, %13 : vector<16x128xf32>
    %15 = vector.extract_strided_slice %1 {offsets = [2, 0], sizes = [16, 4], strides = [1, 1]} : vector<18x4xf32> to vector<16x4xf32>
    %c2 = arith.constant 2 : index
    %c0_17 = arith.constant 0 : index
    %c0_18 = arith.constant 0 : index
    %16 = vector.load %arg5[%c2, %c0_17, %c0_18] : memref<9x4x128xf32, #tpu.memory_space<vmem>>, vector<1x4x128xf32>
    %17 = vector.shape_cast %16 : vector<1x4x128xf32> to vector<4x128xf32>
    %cst_19 = arith.constant dense<0.000000e+00> : vector<16x128xf32>
    %18 = tpu.matmul %15, %17, %cst_19 {dimension_numbers = #tpu.dot_dimension_numbers<[1], [0], [0], [1], [0, 0, 1, 1], [], []>} : vector<16x4xf32>, vector<4x128xf32>, vector<16x128xf32> -> vector<16x128xf32>
    %19 = arith.addf %14, %18 : vector<16x128xf32>
    %20 = vector.extract_strided_slice %3 {offsets = [0, 0], sizes = [16, 4], strides = [1, 1]} : vector<18x4xf32> to vector<16x4xf32>
    %c3 = arith.constant 3 : index
    %c0_20 = arith.constant 0 : index
    %c0_21 = arith.constant 0 : index
    %21 = vector.load %arg5[%c3, %c0_20, %c0_21] : memref<9x4x128xf32, #tpu.memory_space<vmem>>, vector<1x4x128xf32>
    %22 = vector.shape_cast %21 : vector<1x4x128xf32> to vector<4x128xf32>
    %cst_22 = arith.constant dense<0.000000e+00> : vector<16x128xf32>
    %23 = tpu.matmul %20, %22, %cst_22 {dimension_numbers = #tpu.dot_dimension_numbers<[1], [0], [0], [1], [0, 0, 1, 1], [], []>} : vector<16x4xf32>, vector<4x128xf32>, vector<16x128xf32> -> vector<16x128xf32>
    %24 = arith.addf %19, %23 : vector<16x128xf32>
    %25 = vector.extract_strided_slice %3 {offsets = [1, 0], sizes = [16, 4], strides = [1, 1]} : vector<18x4xf32> to vector<16x4xf32>
    %c4 = arith.constant 4 : index
    %c0_23 = arith.constant 0 : index
    %c0_24 = arith.constant 0 : index
    %26 = vector.load %arg5[%c4, %c0_23, %c0_24] : memref<9x4x128xf32, #tpu.memory_space<vmem>>, vector<1x4x128xf32>
    %27 = vector.shape_cast %26 : vector<1x4x128xf32> to vector<4x128xf32>
    %cst_25 = arith.constant dense<0.000000e+00> : vector<16x128xf32>
    %28 = tpu.matmul %25, %27, %cst_25 {dimension_numbers = #tpu.dot_dimension_numbers<[1], [0], [0], [1], [0, 0, 1, 1], [], []>} : vector<16x4xf32>, vector<4x128xf32>, vector<16x128xf32> -> vector<16x128xf32>
    %29 = arith.addf %24, %28 : vector<16x128xf32>
    %30 = vector.extract_strided_slice %3 {offsets = [2, 0], sizes = [16, 4], strides = [1, 1]} : vector<18x4xf32> to vector<16x4xf32>
    %c5 = arith.constant 5 : index
    %c0_26 = arith.constant 0 : index
    %c0_27 = arith.constant 0 : index
    %31 = vector.load %arg5[%c5, %c0_26, %c0_27] : memref<9x4x128xf32, #tpu.memory_space<vmem>>, vector<1x4x128xf32>
    %32 = vector.shape_cast %31 : vector<1x4x128xf32> to vector<4x128xf32>
    %cst_28 = arith.constant dense<0.000000e+00> : vector<16x128xf32>
    %33 = tpu.matmul %30, %32, %cst_28 {dimension_numbers = #tpu.dot_dimension_numbers<[1], [0], [0], [1], [0, 0, 1, 1], [], []>} : vector<16x4xf32>, vector<4x128xf32>, vector<16x128xf32> -> vector<16x128xf32>
    %34 = arith.addf %29, %33 : vector<16x128xf32>
    %35 = vector.extract_strided_slice %5 {offsets = [0, 0], sizes = [16, 4], strides = [1, 1]} : vector<18x4xf32> to vector<16x4xf32>
    %c6 = arith.constant 6 : index
    %c0_29 = arith.constant 0 : index
    %c0_30 = arith.constant 0 : index
    %36 = vector.load %arg5[%c6, %c0_29, %c0_30] : memref<9x4x128xf32, #tpu.memory_space<vmem>>, vector<1x4x128xf32>
    %37 = vector.shape_cast %36 : vector<1x4x128xf32> to vector<4x128xf32>
    %cst_31 = arith.constant dense<0.000000e+00> : vector<16x128xf32>
    %38 = tpu.matmul %35, %37, %cst_31 {dimension_numbers = #tpu.dot_dimension_numbers<[1], [0], [0], [1], [0, 0, 1, 1], [], []>} : vector<16x4xf32>, vector<4x128xf32>, vector<16x128xf32> -> vector<16x128xf32>
    %39 = arith.addf %34, %38 : vector<16x128xf32>
    %40 = vector.extract_strided_slice %5 {offsets = [1, 0], sizes = [16, 4], strides = [1, 1]} : vector<18x4xf32> to vector<16x4xf32>
    %c7 = arith.constant 7 : index
    %c0_32 = arith.constant 0 : index
    %c0_33 = arith.constant 0 : index
    %41 = vector.load %arg5[%c7, %c0_32, %c0_33] : memref<9x4x128xf32, #tpu.memory_space<vmem>>, vector<1x4x128xf32>
    %42 = vector.shape_cast %41 : vector<1x4x128xf32> to vector<4x128xf32>
    %cst_34 = arith.constant dense<0.000000e+00> : vector<16x128xf32>
    %43 = tpu.matmul %40, %42, %cst_34 {dimension_numbers = #tpu.dot_dimension_numbers<[1], [0], [0], [1], [0, 0, 1, 1], [], []>} : vector<16x4xf32>, vector<4x128xf32>, vector<16x128xf32> -> vector<16x128xf32>
    %44 = arith.addf %39, %43 : vector<16x128xf32>
    %45 = vector.extract_strided_slice %5 {offsets = [2, 0], sizes = [16, 4], strides = [1, 1]} : vector<18x4xf32> to vector<16x4xf32>
    %c8 = arith.constant 8 : index
    %c0_35 = arith.constant 0 : index
    %c0_36 = arith.constant 0 : index
    %46 = vector.load %arg5[%c8, %c0_35, %c0_36] : memref<9x4x128xf32, #tpu.memory_space<vmem>>, vector<1x4x128xf32>
    %47 = vector.shape_cast %46 : vector<1x4x128xf32> to vector<4x128xf32>
    %cst_37 = arith.constant dense<0.000000e+00> : vector<16x128xf32>
    %48 = tpu.matmul %45, %47, %cst_37 {dimension_numbers = #tpu.dot_dimension_numbers<[1], [0], [0], [1], [0, 0, 1, 1], [], []>} : vector<16x4xf32>, vector<4x128xf32>, vector<16x128xf32> -> vector<16x128xf32>
    %49 = arith.addf %44, %48 : vector<16x128xf32>
    %c0_38 = arith.constant 0 : index
    %c0_39 = arith.constant 0 : index
    %50 = vector.load %arg6[%c0_38, %c0_39] : memref<1x128xf32, #tpu.memory_space<vmem>>, vector<1x128xf32>
    %51 = vector.broadcast %50 : vector<1x128xf32> to vector<16x128xf32>
    %52 = arith.addf %49, %51 : vector<16x128xf32>
    %53 = vector.shape_cast %52 : vector<16x128xf32> to vector<1x1x16x128xf32>
    %c0_40 = arith.constant 0 : index
    %c0_41 = arith.constant 0 : index
    %c0_42 = arith.constant 0 : index
    %c0_43 = arith.constant 0 : index
    %54 = vector.load %arg7[%c0_40, %c0_41, %c0_42, %c0_43] : memref<1x1x16x128xf32, #tpu.memory_space<vmem>>, vector<1x1x16x128xf32>
    tpu.vector_store %arg7[%c0_40, %c0_41, %c0_42, %c0_43], %53 {strides = array<i32>} : memref<1x1x16x128xf32, #tpu.memory_space<vmem>>, vector<1x1x16x128xf32>,
    return
  }
  func.func @transform_0(%arg0: i32, %arg1: i32) -> (i32, i32, i32, i32) {
    %c1_i32 = arith.constant 1 : i32
    %0 = arith.muli %c1_i32, %arg1 : i32
    %c0_i32 = arith.constant 0 : i32
    %1 = arith.addi %0, %c0_i32 : i32
    %c0_i32_0 = arith.constant 0 : i32
    %c0_i32_1 = arith.constant 0 : i32
    %c0_i32_2 = arith.constant 0 : i32
    return %arg0, %1, %c0_i32_0, %c0_i32_1 : i32, i32, i32, i32
  }
  func.func @transform_1(%arg0: i32, %arg1: i32) -> (i32, i32, i32, i32) {
    %c1_i32 = arith.constant 1 : i32
    %0 = arith.muli %c1_i32, %arg1 : i32
    %c1_i32_0 = arith.constant 1 : i32
    %1 = arith.addi %0, %c1_i32_0 : i32
    %c0_i32 = arith.constant 0 : i32
    %c0_i32_1 = arith.constant 0 : i32
    %c0_i32_2 = arith.constant 0 : i32
    return %arg0, %1, %c0_i32, %c0_i32_1 : i32, i32, i32, i32
  }
  func.func @transform_2(%arg0: i32, %arg1: i32) -> (i32, i32, i32, i32) {
    %c1_i32 = arith.constant 1 : i32
    %0 = arith.muli %c1_i32, %arg1 : i32
    %c2_i32 = arith.constant 2 : i32
    %1 = arith.addi %0, %c2_i32 : i32
    %c0_i32 = arith.constant 0 : i32
    %c0_i32_0 = arith.constant 0 : i32
    %c0_i32_1 = arith.constant 0 : i32
    return %arg0, %1, %c0_i32, %c0_i32_0 : i32, i32, i32, i32
  }
  func.func @transform_3(%arg0: i32, %arg1: i32) -> (i32, i32, i32) {
    %c0_i32 = arith.constant 0 : i32
    %c0_i32_0 = arith.constant 0 : i32
    %c0_i32_1 = arith.constant 0 : i32
    %c0_i32_2 = arith.constant 0 : i32
    return %c0_i32, %c0_i32_0, %c0_i32_1 : i32, i32, i32
  }
  func.func @transform_4(%arg0: i32, %arg1: i32) -> (i32, i32) {
    %c0_i32 = arith.constant 0 : i32
    %c0_i32_0 = arith.constant 0 : i32
    %c0_i32_1 = arith.constant 0 : i32
    return %c0_i32, %c0_i32_0 : i32, i32
  }
  func.func @transform_5(%arg0: i32, %arg1: i32) -> (i32, i32, i32, i32) {
    %c0_i32 = arith.constant 0 : i32
    %c0_i32_0 = arith.constant 0 : i32
    %c0_i32_1 = arith.constant 0 : i32
    return %arg0, %arg1, %c0_i32, %c0_i32_0 : i32, i32, i32, i32
  }
}

module attributes {stable_mosaic.version = 11 : i64} {
  func.func @_bn_stats_kernel(%arg0: i32, %arg1: memref<512x128xf32, #tpu.memory_space<vmem>>, %arg2: memref<1x128xf32, #tpu.memory_space<vmem>>, %arg3: memref<1x128xf32, #tpu.memory_space<vmem>>, %arg4: memref<2x128xf32, #tpu.memory_space<vmem>>) attributes {dimension_semantics = [#tpu.dimension_semantics<arbitrary>], iteration_bounds = array<i64: 1>, scalar_prefetch = 0 : i64, scratch_operands = 0 : i64, tpu.core_type = #tpu.core_type<tc>, window_params = [{transform_indices = @transform_0, window_bounds = array<i64: 512, 128>}, {pipeline_mode = #tpu.pipeline_mode<synchronous>, transform_indices = @transform_1, window_bounds = array<i64: 1, 128>}, {pipeline_mode = #tpu.pipeline_mode<synchronous>, transform_indices = @transform_2, window_bounds = array<i64: 1, 128>}, {pipeline_mode = #tpu.pipeline_mode<synchronous>, transform_indices = @transform_3, window_bounds = array<i64: 2, 128>}]} {
    %c0_i32 = arith.constant 0 : i32
    %0 = arith.cmpi eq, %arg0, %c0_i32 : i32
    %1 = arith.extui %0 : i1 to i32
    %c0_i32_0 = arith.constant 0 : i32
    %2 = arith.cmpi ne, %1, %c0_i32_0 : i32
    scf.if %2 {
      %cst_12 = arith.constant 0.000000e+00 : f32
      %18 = vector.broadcast %cst_12 : f32 to vector<2x128xf32>
      %c0_13 = arith.constant 0 : index
      %c0_14 = arith.constant 0 : index
      %19 = vector.load %arg4[%c0_13, %c0_14] : memref<2x128xf32, #tpu.memory_space<vmem>>, vector<2x128xf32>
      tpu.vector_store %arg4[%c0_13, %c0_14], %18 {strides = array<i32>} : memref<2x128xf32, #tpu.memory_space<vmem>>, vector<2x128xf32>,
    } else {
    }
    %c0 = arith.constant 0 : index
    %c0_1 = arith.constant 0 : index
    %3 = vector.load %arg1[%c0, %c0_1] : memref<512x128xf32, #tpu.memory_space<vmem>>, vector<512x128xf32>
    %c0_2 = arith.constant 0 : index
    %c0_3 = arith.constant 0 : index
    %4 = vector.load %arg4[%c0_2, %c0_3] : memref<2x128xf32, #tpu.memory_space<vmem>>, vector<1x128xf32>
    %cst = arith.constant dense<0.000000e+00> : vector<128xf32>
    %5 = vector.multi_reduction <add>, %3, %cst [0] : vector<512x128xf32> to vector<128xf32>
    %6 = vector.shape_cast %5 : vector<128xf32> to vector<1x128xf32>
    %7 = arith.addf %4, %6 : vector<1x128xf32>
    %c0_4 = arith.constant 0 : index
    %c0_5 = arith.constant 0 : index
    %8 = vector.load %arg4[%c0_4, %c0_5] : memref<2x128xf32, #tpu.memory_space<vmem>>, vector<1x128xf32>
    tpu.vector_store %arg4[%c0_4, %c0_5], %7 {strides = array<i32>} : memref<2x128xf32, #tpu.memory_space<vmem>>, vector<1x128xf32>,
    %c1 = arith.constant 1 : index
    %c0_6 = arith.constant 0 : index
    %9 = vector.load %arg4[%c1, %c0_6] : memref<2x128xf32, #tpu.memory_space<vmem>>, vector<1x128xf32>
    %10 = arith.mulf %3, %3 : vector<512x128xf32>
    %cst_7 = arith.constant dense<0.000000e+00> : vector<128xf32>
    %11 = vector.multi_reduction <add>, %10, %cst_7 [0] : vector<512x128xf32> to vector<128xf32>
    %12 = vector.shape_cast %11 : vector<128xf32> to vector<1x128xf32>
    %13 = arith.addf %9, %12 : vector<1x128xf32>
    %c1_8 = arith.constant 1 : index
    %c0_9 = arith.constant 0 : index
    %14 = vector.load %arg4[%c1_8, %c0_9] : memref<2x128xf32, #tpu.memory_space<vmem>>, vector<1x128xf32>
    tpu.vector_store %arg4[%c1_8, %c0_9], %13 {strides = array<i32>} : memref<2x128xf32, #tpu.memory_space<vmem>>, vector<1x128xf32>,
    %c0_i32_10 = arith.constant 0 : i32
    %15 = arith.cmpi eq, %arg0, %c0_i32_10 : i32
    %16 = arith.extui %15 : i1 to i32
    %c0_i32_11 = arith.constant 0 : i32
    %17 = arith.cmpi ne, %16, %c0_i32_11 : i32
    scf.if %17 {
      %c0_12 = arith.constant 0 : index
      %c0_13 = arith.constant 0 : index
      %18 = vector.load %arg4[%c0_12, %c0_13] : memref<2x128xf32, #tpu.memory_space<vmem>>, vector<1x128xf32>
      %cst_14 = arith.constant 0.001953125 : f32
      %19 = vector.broadcast %cst_14 : f32 to vector<1x128xf32>
      %20 = arith.mulf %18, %19 : vector<1x128xf32>
      %c1_15 = arith.constant 1 : index
      %c0_16 = arith.constant 0 : index
      %21 = vector.load %arg4[%c1_15, %c0_16] : memref<2x128xf32, #tpu.memory_space<vmem>>, vector<1x128xf32>
      %cst_17 = arith.constant 0.001953125 : f32
      %22 = vector.broadcast %cst_17 : f32 to vector<1x128xf32>
      %23 = arith.mulf %21, %22 : vector<1x128xf32>
      %24 = arith.mulf %20, %20 : vector<1x128xf32>
      %25 = arith.subf %23, %24 : vector<1x128xf32>
      %c0_18 = arith.constant 0 : index
      %c0_19 = arith.constant 0 : index
      %26 = vector.load %arg2[%c0_18, %c0_19] : memref<1x128xf32, #tpu.memory_space<vmem>>, vector<1x128xf32>
      %cst_20 = arith.constant 9.99999974E-6 : f32
      %27 = vector.broadcast %cst_20 : f32 to vector<1x128xf32>
      %28 = arith.addf %25, %27 : vector<1x128xf32>
      %29 = math.rsqrt %28 : vector<1x128xf32>
      %30 = arith.mulf %26, %29 : vector<1x128xf32>
      %c0_21 = arith.constant 0 : index
      %c0_22 = arith.constant 0 : index
      %31 = vector.load %arg4[%c0_21, %c0_22] : memref<2x128xf32, #tpu.memory_space<vmem>>, vector<1x128xf32>
      tpu.vector_store %arg4[%c0_21, %c0_22], %30 {strides = array<i32>} : memref<2x128xf32, #tpu.memory_space<vmem>>, vector<1x128xf32>,
      %c0_23 = arith.constant 0 : index
      %c0_24 = arith.constant 0 : index
      %32 = vector.load %arg3[%c0_23, %c0_24] : memref<1x128xf32, #tpu.memory_space<vmem>>, vector<1x128xf32>
      %33 = arith.mulf %20, %30 : vector<1x128xf32>
      %34 = arith.subf %32, %33 : vector<1x128xf32>
      %c1_25 = arith.constant 1 : index
      %c0_26 = arith.constant 0 : index
      %35 = vector.load %arg4[%c1_25, %c0_26] : memref<2x128xf32, #tpu.memory_space<vmem>>, vector<1x128xf32>
      tpu.vector_store %arg4[%c1_25, %c0_26], %34 {strides = array<i32>} : memref<2x128xf32, #tpu.memory_space<vmem>>, vector<1x128xf32>,
    } else {
    }
    return
  }
  func.func @transform_0(%arg0: i32) -> (i32, i32) {
    %c0_i32 = arith.constant 0 : i32
    %c0_i32_0 = arith.constant 0 : i32
    return %arg0, %c0_i32 : i32, i32
  }
  func.func @transform_1(%arg0: i32) -> (i32, i32) {
    %c0_i32 = arith.constant 0 : i32
    %c0_i32_0 = arith.constant 0 : i32
    %c0_i32_1 = arith.constant 0 : i32
    return %c0_i32, %c0_i32_0 : i32, i32
  }
  func.func @transform_2(%arg0: i32) -> (i32, i32) {
    %c0_i32 = arith.constant 0 : i32
    %c0_i32_0 = arith.constant 0 : i32
    %c0_i32_1 = arith.constant 0 : i32
    return %c0_i32, %c0_i32_0 : i32, i32
  }
  func.func @transform_3(%arg0: i32) -> (i32, i32) {
    %c0_i32 = arith.constant 0 : i32
    %c0_i32_0 = arith.constant 0 : i32
    %c0_i32_1 = arith.constant 0 : i32
    return %c0_i32, %c0_i32_0 : i32, i32
  }
}

module attributes {stable_mosaic.version = 11 : i64} {
  func.func @kernel(%arg0: i32, %arg1: i32, %arg2: memref<1x1x18x128xf32, #tpu.memory_space<vmem>>, %arg3: memref<1x1x18x128xf32, #tpu.memory_space<vmem>>, %arg4: memref<1x1x18x128xf32, #tpu.memory_space<vmem>>, %arg5: memref<9x128x128xf32, #tpu.memory_space<vmem>>, %arg6: memref<1x128xf32, #tpu.memory_space<vmem>>, %arg7: memref<1x1x18x4xf32, #tpu.memory_space<vmem>>, %arg8: memref<1x1x18x4xf32, #tpu.memory_space<vmem>>, %arg9: memref<1x1x18x4xf32, #tpu.memory_space<vmem>>, %arg10: memref<9x4x128xf32, #tpu.memory_space<vmem>>, %arg11: memref<1x128xf32, #tpu.memory_space<vmem>>, %arg12: memref<1x1x16x128xf32, #tpu.memory_space<vmem>>) attributes {dimension_semantics = [#tpu.dimension_semantics<parallel>, #tpu.dimension_semantics<parallel>], iteration_bounds = array<i64: 2, 16>, scalar_prefetch = 0 : i64, scratch_operands = 0 : i64, tpu.core_type = #tpu.core_type<tc>, window_params = [{transform_indices = @transform_0, window_bounds = array<i64: 1, 1, 18, 128>}, {transform_indices = @transform_1, window_bounds = array<i64: 1, 1, 18, 128>}, {transform_indices = @transform_2, window_bounds = array<i64: 1, 1, 18, 128>}, {pipeline_mode = #tpu.pipeline_mode<synchronous>, transform_indices = @transform_3, window_bounds = array<i64: 9, 128, 128>}, {pipeline_mode = #tpu.pipeline_mode<synchronous>, transform_indices = @transform_4, window_bounds = array<i64: 1, 128>}, {transform_indices = @transform_5, window_bounds = array<i64: 1, 1, 18, 4>}, {transform_indices = @transform_6, window_bounds = array<i64: 1, 1, 18, 4>}, {transform_indices = @transform_7, window_bounds = array<i64: 1, 1, 18, 4>}, {pipeline_mode = #tpu.pipeline_mode<synchronous>, transform_indices = @transform_8, window_bounds = array<i64: 9, 4, 128>}, {pipeline_mode = #tpu.pipeline_mode<synchronous>, transform_indices = @transform_9, window_bounds = array<i64: 1, 128>}, {transform_indices = @transform_10, window_bounds = array<i64: 1, 1, 16, 128>}]} {
    %c0 = arith.constant 0 : index
    %c0_0 = arith.constant 0 : index
    %c0_1 = arith.constant 0 : index
    %c0_2 = arith.constant 0 : index
    %0 = vector.load %arg2[%c0, %c0_0, %c0_1, %c0_2] : memref<1x1x18x128xf32, #tpu.memory_space<vmem>>, vector<1x1x18x128xf32>
    %1 = vector.shape_cast %0 : vector<1x1x18x128xf32> to vector<18x128xf32>
    %c0_3 = arith.constant 0 : index
    %c0_4 = arith.constant 0 : index
    %c0_5 = arith.constant 0 : index
    %c0_6 = arith.constant 0 : index
    %2 = vector.load %arg3[%c0_3, %c0_4, %c0_5, %c0_6] : memref<1x1x18x128xf32, #tpu.memory_space<vmem>>, vector<1x1x18x128xf32>
    %3 = vector.shape_cast %2 : vector<1x1x18x128xf32> to vector<18x128xf32>
    %c0_7 = arith.constant 0 : index
    %c0_8 = arith.constant 0 : index
    %c0_9 = arith.constant 0 : index
    %c0_10 = arith.constant 0 : index
    %4 = vector.load %arg4[%c0_7, %c0_8, %c0_9, %c0_10] : memref<1x1x18x128xf32, #tpu.memory_space<vmem>>, vector<1x1x18x128xf32>
    %5 = vector.shape_cast %4 : vector<1x1x18x128xf32> to vector<18x128xf32>
    %6 = vector.extract_strided_slice %1 {offsets = [0, 0], sizes = [16, 128], strides = [1, 1]} : vector<18x128xf32> to vector<16x128xf32>
    %c0_11 = arith.constant 0 : index
    %c0_12 = arith.constant 0 : index
    %c0_13 = arith.constant 0 : index
    %7 = vector.load %arg5[%c0_11, %c0_12, %c0_13] : memref<9x128x128xf32, #tpu.memory_space<vmem>>, vector<1x128x128xf32>
    %8 = vector.shape_cast %7 : vector<1x128x128xf32> to vector<128x128xf32>
    %cst = arith.constant dense<0.000000e+00> : vector<16x128xf32>
    %9 = tpu.matmul %6, %8, %cst {dimension_numbers = #tpu.dot_dimension_numbers<[1], [0], [0], [1], [0, 0, 1, 1], [], []>} : vector<16x128xf32>, vector<128x128xf32>, vector<16x128xf32> -> vector<16x128xf32>
    %10 = vector.extract_strided_slice %1 {offsets = [1, 0], sizes = [16, 128], strides = [1, 1]} : vector<18x128xf32> to vector<16x128xf32>
    %c1 = arith.constant 1 : index
    %c0_14 = arith.constant 0 : index
    %c0_15 = arith.constant 0 : index
    %11 = vector.load %arg5[%c1, %c0_14, %c0_15] : memref<9x128x128xf32, #tpu.memory_space<vmem>>, vector<1x128x128xf32>
    %12 = vector.shape_cast %11 : vector<1x128x128xf32> to vector<128x128xf32>
    %cst_16 = arith.constant dense<0.000000e+00> : vector<16x128xf32>
    %13 = tpu.matmul %10, %12, %cst_16 {dimension_numbers = #tpu.dot_dimension_numbers<[1], [0], [0], [1], [0, 0, 1, 1], [], []>} : vector<16x128xf32>, vector<128x128xf32>, vector<16x128xf32> -> vector<16x128xf32>
    %14 = arith.addf %9, %13 : vector<16x128xf32>
    %15 = vector.extract_strided_slice %1 {offsets = [2, 0], sizes = [16, 128], strides = [1, 1]} : vector<18x128xf32> to vector<16x128xf32>
    %c2 = arith.constant 2 : index
    %c0_17 = arith.constant 0 : index
    %c0_18 = arith.constant 0 : index
    %16 = vector.load %arg5[%c2, %c0_17, %c0_18] : memref<9x128x128xf32, #tpu.memory_space<vmem>>, vector<1x128x128xf32>
    %17 = vector.shape_cast %16 : vector<1x128x128xf32> to vector<128x128xf32>
    %cst_19 = arith.constant dense<0.000000e+00> : vector<16x128xf32>
    %18 = tpu.matmul %15, %17, %cst_19 {dimension_numbers = #tpu.dot_dimension_numbers<[1], [0], [0], [1], [0, 0, 1, 1], [], []>} : vector<16x128xf32>, vector<128x128xf32>, vector<16x128xf32> -> vector<16x128xf32>
    %19 = arith.addf %14, %18 : vector<16x128xf32>
    %20 = vector.extract_strided_slice %3 {offsets = [0, 0], sizes = [16, 128], strides = [1, 1]} : vector<18x128xf32> to vector<16x128xf32>
    %c3 = arith.constant 3 : index
    %c0_20 = arith.constant 0 : index
    %c0_21 = arith.constant 0 : index
    %21 = vector.load %arg5[%c3, %c0_20, %c0_21] : memref<9x128x128xf32, #tpu.memory_space<vmem>>, vector<1x128x128xf32>
    %22 = vector.shape_cast %21 : vector<1x128x128xf32> to vector<128x128xf32>
    %cst_22 = arith.constant dense<0.000000e+00> : vector<16x128xf32>
    %23 = tpu.matmul %20, %22, %cst_22 {dimension_numbers = #tpu.dot_dimension_numbers<[1], [0], [0], [1], [0, 0, 1, 1], [], []>} : vector<16x128xf32>, vector<128x128xf32>, vector<16x128xf32> -> vector<16x128xf32>
    %24 = arith.addf %19, %23 : vector<16x128xf32>
    %25 = vector.extract_strided_slice %3 {offsets = [1, 0], sizes = [16, 128], strides = [1, 1]} : vector<18x128xf32> to vector<16x128xf32>
    %c4 = arith.constant 4 : index
    %c0_23 = arith.constant 0 : index
    %c0_24 = arith.constant 0 : index
    %26 = vector.load %arg5[%c4, %c0_23, %c0_24] : memref<9x128x128xf32, #tpu.memory_space<vmem>>, vector<1x128x128xf32>
    %27 = vector.shape_cast %26 : vector<1x128x128xf32> to vector<128x128xf32>
    %cst_25 = arith.constant dense<0.000000e+00> : vector<16x128xf32>
    %28 = tpu.matmul %25, %27, %cst_25 {dimension_numbers = #tpu.dot_dimension_numbers<[1], [0], [0], [1], [0, 0, 1, 1], [], []>} : vector<16x128xf32>, vector<128x128xf32>, vector<16x128xf32> -> vector<16x128xf32>
    %29 = arith.addf %24, %28 : vector<16x128xf32>
    %30 = vector.extract_strided_slice %3 {offsets = [2, 0], sizes = [16, 128], strides = [1, 1]} : vector<18x128xf32> to vector<16x128xf32>
    %c5 = arith.constant 5 : index
    %c0_26 = arith.constant 0 : index
    %c0_27 = arith.constant 0 : index
    %31 = vector.load %arg5[%c5, %c0_26, %c0_27] : memref<9x128x128xf32, #tpu.memory_space<vmem>>, vector<1x128x128xf32>
    %32 = vector.shape_cast %31 : vector<1x128x128xf32> to vector<128x128xf32>
    %cst_28 = arith.constant dense<0.000000e+00> : vector<16x128xf32>
    %33 = tpu.matmul %30, %32, %cst_28 {dimension_numbers = #tpu.dot_dimension_numbers<[1], [0], [0], [1], [0, 0, 1, 1], [], []>} : vector<16x128xf32>, vector<128x128xf32>, vector<16x128xf32> -> vector<16x128xf32>
    %34 = arith.addf %29, %33 : vector<16x128xf32>
    %35 = vector.extract_strided_slice %5 {offsets = [0, 0], sizes = [16, 128], strides = [1, 1]} : vector<18x128xf32> to vector<16x128xf32>
    %c6 = arith.constant 6 : index
    %c0_29 = arith.constant 0 : index
    %c0_30 = arith.constant 0 : index
    %36 = vector.load %arg5[%c6, %c0_29, %c0_30] : memref<9x128x128xf32, #tpu.memory_space<vmem>>, vector<1x128x128xf32>
    %37 = vector.shape_cast %36 : vector<1x128x128xf32> to vector<128x128xf32>
    %cst_31 = arith.constant dense<0.000000e+00> : vector<16x128xf32>
    %38 = tpu.matmul %35, %37, %cst_31 {dimension_numbers = #tpu.dot_dimension_numbers<[1], [0], [0], [1], [0, 0, 1, 1], [], []>} : vector<16x128xf32>, vector<128x128xf32>, vector<16x128xf32> -> vector<16x128xf32>
    %39 = arith.addf %34, %38 : vector<16x128xf32>
    %40 = vector.extract_strided_slice %5 {offsets = [1, 0], sizes = [16, 128], strides = [1, 1]} : vector<18x128xf32> to vector<16x128xf32>
    %c7 = arith.constant 7 : index
    %c0_32 = arith.constant 0 : index
    %c0_33 = arith.constant 0 : index
    %41 = vector.load %arg5[%c7, %c0_32, %c0_33] : memref<9x128x128xf32, #tpu.memory_space<vmem>>, vector<1x128x128xf32>
    %42 = vector.shape_cast %41 : vector<1x128x128xf32> to vector<128x128xf32>
    %cst_34 = arith.constant dense<0.000000e+00> : vector<16x128xf32>
    %43 = tpu.matmul %40, %42, %cst_34 {dimension_numbers = #tpu.dot_dimension_numbers<[1], [0], [0], [1], [0, 0, 1, 1], [], []>} : vector<16x128xf32>, vector<128x128xf32>, vector<16x128xf32> -> vector<16x128xf32>
    %44 = arith.addf %39, %43 : vector<16x128xf32>
    %45 = vector.extract_strided_slice %5 {offsets = [2, 0], sizes = [16, 128], strides = [1, 1]} : vector<18x128xf32> to vector<16x128xf32>
    %c8 = arith.constant 8 : index
    %c0_35 = arith.constant 0 : index
    %c0_36 = arith.constant 0 : index
    %46 = vector.load %arg5[%c8, %c0_35, %c0_36] : memref<9x128x128xf32, #tpu.memory_space<vmem>>, vector<1x128x128xf32>
    %47 = vector.shape_cast %46 : vector<1x128x128xf32> to vector<128x128xf32>
    %cst_37 = arith.constant dense<0.000000e+00> : vector<16x128xf32>
    %48 = tpu.matmul %45, %47, %cst_37 {dimension_numbers = #tpu.dot_dimension_numbers<[1], [0], [0], [1], [0, 0, 1, 1], [], []>} : vector<16x128xf32>, vector<128x128xf32>, vector<16x128xf32> -> vector<16x128xf32>
    %49 = arith.addf %44, %48 : vector<16x128xf32>
    %c0_38 = arith.constant 0 : index
    %c0_39 = arith.constant 0 : index
    %50 = vector.load %arg6[%c0_38, %c0_39] : memref<1x128xf32, #tpu.memory_space<vmem>>, vector<1x128xf32>
    %51 = vector.broadcast %50 : vector<1x128xf32> to vector<16x128xf32>
    %52 = arith.addf %49, %51 : vector<16x128xf32>
    %c0_40 = arith.constant 0 : index
    %c0_41 = arith.constant 0 : index
    %c0_42 = arith.constant 0 : index
    %c0_43 = arith.constant 0 : index
    %53 = vector.load %arg7[%c0_40, %c0_41, %c0_42, %c0_43] : memref<1x1x18x4xf32, #tpu.memory_space<vmem>>, vector<1x1x18x4xf32>
    %54 = vector.shape_cast %53 : vector<1x1x18x4xf32> to vector<18x4xf32>
    %c0_44 = arith.constant 0 : index
    %c0_45 = arith.constant 0 : index
    %c0_46 = arith.constant 0 : index
    %c0_47 = arith.constant 0 : index
    %55 = vector.load %arg8[%c0_44, %c0_45, %c0_46, %c0_47] : memref<1x1x18x4xf32, #tpu.memory_space<vmem>>, vector<1x1x18x4xf32>
    %56 = vector.shape_cast %55 : vector<1x1x18x4xf32> to vector<18x4xf32>
    %c0_48 = arith.constant 0 : index
    %c0_49 = arith.constant 0 : index
    %c0_50 = arith.constant 0 : index
    %c0_51 = arith.constant 0 : index
    %57 = vector.load %arg9[%c0_48, %c0_49, %c0_50, %c0_51] : memref<1x1x18x4xf32, #tpu.memory_space<vmem>>, vector<1x1x18x4xf32>
    %58 = vector.shape_cast %57 : vector<1x1x18x4xf32> to vector<18x4xf32>
    %59 = vector.extract_strided_slice %54 {offsets = [0, 0], sizes = [16, 4], strides = [1, 1]} : vector<18x4xf32> to vector<16x4xf32>
    %c0_52 = arith.constant 0 : index
    %c0_53 = arith.constant 0 : index
    %c0_54 = arith.constant 0 : index
    %60 = vector.load %arg10[%c0_52, %c0_53, %c0_54] : memref<9x4x128xf32, #tpu.memory_space<vmem>>, vector<1x4x128xf32>
    %61 = vector.shape_cast %60 : vector<1x4x128xf32> to vector<4x128xf32>
    %cst_55 = arith.constant dense<0.000000e+00> : vector<16x128xf32>
    %62 = tpu.matmul %59, %61, %cst_55 {dimension_numbers = #tpu.dot_dimension_numbers<[1], [0], [0], [1], [0, 0, 1, 1], [], []>} : vector<16x4xf32>, vector<4x128xf32>, vector<16x128xf32> -> vector<16x128xf32>
    %63 = arith.addf %52, %62 : vector<16x128xf32>
    %64 = vector.extract_strided_slice %54 {offsets = [1, 0], sizes = [16, 4], strides = [1, 1]} : vector<18x4xf32> to vector<16x4xf32>
    %c1_56 = arith.constant 1 : index
    %c0_57 = arith.constant 0 : index
    %c0_58 = arith.constant 0 : index
    %65 = vector.load %arg10[%c1_56, %c0_57, %c0_58] : memref<9x4x128xf32, #tpu.memory_space<vmem>>, vector<1x4x128xf32>
    %66 = vector.shape_cast %65 : vector<1x4x128xf32> to vector<4x128xf32>
    %cst_59 = arith.constant dense<0.000000e+00> : vector<16x128xf32>
    %67 = tpu.matmul %64, %66, %cst_59 {dimension_numbers = #tpu.dot_dimension_numbers<[1], [0], [0], [1], [0, 0, 1, 1], [], []>} : vector<16x4xf32>, vector<4x128xf32>, vector<16x128xf32> -> vector<16x128xf32>
    %68 = arith.addf %63, %67 : vector<16x128xf32>
    %69 = vector.extract_strided_slice %54 {offsets = [2, 0], sizes = [16, 4], strides = [1, 1]} : vector<18x4xf32> to vector<16x4xf32>
    %c2_60 = arith.constant 2 : index
    %c0_61 = arith.constant 0 : index
    %c0_62 = arith.constant 0 : index
    %70 = vector.load %arg10[%c2_60, %c0_61, %c0_62] : memref<9x4x128xf32, #tpu.memory_space<vmem>>, vector<1x4x128xf32>
    %71 = vector.shape_cast %70 : vector<1x4x128xf32> to vector<4x128xf32>
    %cst_63 = arith.constant dense<0.000000e+00> : vector<16x128xf32>
    %72 = tpu.matmul %69, %71, %cst_63 {dimension_numbers = #tpu.dot_dimension_numbers<[1], [0], [0], [1], [0, 0, 1, 1], [], []>} : vector<16x4xf32>, vector<4x128xf32>, vector<16x128xf32> -> vector<16x128xf32>
    %73 = arith.addf %68, %72 : vector<16x128xf32>
    %74 = vector.extract_strided_slice %56 {offsets = [0, 0], sizes = [16, 4], strides = [1, 1]} : vector<18x4xf32> to vector<16x4xf32>
    %c3_64 = arith.constant 3 : index
    %c0_65 = arith.constant 0 : index
    %c0_66 = arith.constant 0 : index
    %75 = vector.load %arg10[%c3_64, %c0_65, %c0_66] : memref<9x4x128xf32, #tpu.memory_space<vmem>>, vector<1x4x128xf32>
    %76 = vector.shape_cast %75 : vector<1x4x128xf32> to vector<4x128xf32>
    %cst_67 = arith.constant dense<0.000000e+00> : vector<16x128xf32>
    %77 = tpu.matmul %74, %76, %cst_67 {dimension_numbers = #tpu.dot_dimension_numbers<[1], [0], [0], [1], [0, 0, 1, 1], [], []>} : vector<16x4xf32>, vector<4x128xf32>, vector<16x128xf32> -> vector<16x128xf32>
    %78 = arith.addf %73, %77 : vector<16x128xf32>
    %79 = vector.extract_strided_slice %56 {offsets = [1, 0], sizes = [16, 4], strides = [1, 1]} : vector<18x4xf32> to vector<16x4xf32>
    %c4_68 = arith.constant 4 : index
    %c0_69 = arith.constant 0 : index
    %c0_70 = arith.constant 0 : index
    %80 = vector.load %arg10[%c4_68, %c0_69, %c0_70] : memref<9x4x128xf32, #tpu.memory_space<vmem>>, vector<1x4x128xf32>
    %81 = vector.shape_cast %80 : vector<1x4x128xf32> to vector<4x128xf32>
    %cst_71 = arith.constant dense<0.000000e+00> : vector<16x128xf32>
    %82 = tpu.matmul %79, %81, %cst_71 {dimension_numbers = #tpu.dot_dimension_numbers<[1], [0], [0], [1], [0, 0, 1, 1], [], []>} : vector<16x4xf32>, vector<4x128xf32>, vector<16x128xf32> -> vector<16x128xf32>
    %83 = arith.addf %78, %82 : vector<16x128xf32>
    %84 = vector.extract_strided_slice %56 {offsets = [2, 0], sizes = [16, 4], strides = [1, 1]} : vector<18x4xf32> to vector<16x4xf32>
    %c5_72 = arith.constant 5 : index
    %c0_73 = arith.constant 0 : index
    %c0_74 = arith.constant 0 : index
    %85 = vector.load %arg10[%c5_72, %c0_73, %c0_74] : memref<9x4x128xf32, #tpu.memory_space<vmem>>, vector<1x4x128xf32>
    %86 = vector.shape_cast %85 : vector<1x4x128xf32> to vector<4x128xf32>
    %cst_75 = arith.constant dense<0.000000e+00> : vector<16x128xf32>
    %87 = tpu.matmul %84, %86, %cst_75 {dimension_numbers = #tpu.dot_dimension_numbers<[1], [0], [0], [1], [0, 0, 1, 1], [], []>} : vector<16x4xf32>, vector<4x128xf32>, vector<16x128xf32> -> vector<16x128xf32>
    %88 = arith.addf %83, %87 : vector<16x128xf32>
    %89 = vector.extract_strided_slice %58 {offsets = [0, 0], sizes = [16, 4], strides = [1, 1]} : vector<18x4xf32> to vector<16x4xf32>
    %c6_76 = arith.constant 6 : index
    %c0_77 = arith.constant 0 : index
    %c0_78 = arith.constant 0 : index
    %90 = vector.load %arg10[%c6_76, %c0_77, %c0_78] : memref<9x4x128xf32, #tpu.memory_space<vmem>>, vector<1x4x128xf32>
    %91 = vector.shape_cast %90 : vector<1x4x128xf32> to vector<4x128xf32>
    %cst_79 = arith.constant dense<0.000000e+00> : vector<16x128xf32>
    %92 = tpu.matmul %89, %91, %cst_79 {dimension_numbers = #tpu.dot_dimension_numbers<[1], [0], [0], [1], [0, 0, 1, 1], [], []>} : vector<16x4xf32>, vector<4x128xf32>, vector<16x128xf32> -> vector<16x128xf32>
    %93 = arith.addf %88, %92 : vector<16x128xf32>
    %94 = vector.extract_strided_slice %58 {offsets = [1, 0], sizes = [16, 4], strides = [1, 1]} : vector<18x4xf32> to vector<16x4xf32>
    %c7_80 = arith.constant 7 : index
    %c0_81 = arith.constant 0 : index
    %c0_82 = arith.constant 0 : index
    %95 = vector.load %arg10[%c7_80, %c0_81, %c0_82] : memref<9x4x128xf32, #tpu.memory_space<vmem>>, vector<1x4x128xf32>
    %96 = vector.shape_cast %95 : vector<1x4x128xf32> to vector<4x128xf32>
    %cst_83 = arith.constant dense<0.000000e+00> : vector<16x128xf32>
    %97 = tpu.matmul %94, %96, %cst_83 {dimension_numbers = #tpu.dot_dimension_numbers<[1], [0], [0], [1], [0, 0, 1, 1], [], []>} : vector<16x4xf32>, vector<4x128xf32>, vector<16x128xf32> -> vector<16x128xf32>
    %98 = arith.addf %93, %97 : vector<16x128xf32>
    %99 = vector.extract_strided_slice %58 {offsets = [2, 0], sizes = [16, 4], strides = [1, 1]} : vector<18x4xf32> to vector<16x4xf32>
    %c8_84 = arith.constant 8 : index
    %c0_85 = arith.constant 0 : index
    %c0_86 = arith.constant 0 : index
    %100 = vector.load %arg10[%c8_84, %c0_85, %c0_86] : memref<9x4x128xf32, #tpu.memory_space<vmem>>, vector<1x4x128xf32>
    %101 = vector.shape_cast %100 : vector<1x4x128xf32> to vector<4x128xf32>
    %cst_87 = arith.constant dense<0.000000e+00> : vector<16x128xf32>
    %102 = tpu.matmul %99, %101, %cst_87 {dimension_numbers = #tpu.dot_dimension_numbers<[1], [0], [0], [1], [0, 0, 1, 1], [], []>} : vector<16x4xf32>, vector<4x128xf32>, vector<16x128xf32> -> vector<16x128xf32>
    %103 = arith.addf %98, %102 : vector<16x128xf32>
    %c0_88 = arith.constant 0 : index
    %c0_89 = arith.constant 0 : index
    %104 = vector.load %arg11[%c0_88, %c0_89] : memref<1x128xf32, #tpu.memory_space<vmem>>, vector<1x128xf32>
    %105 = vector.broadcast %104 : vector<1x128xf32> to vector<16x128xf32>
    %106 = arith.addf %103, %105 : vector<16x128xf32>
    %107 = vector.shape_cast %106 : vector<16x128xf32> to vector<1x1x16x128xf32>
    %c0_90 = arith.constant 0 : index
    %c0_91 = arith.constant 0 : index
    %c0_92 = arith.constant 0 : index
    %c0_93 = arith.constant 0 : index
    %108 = vector.load %arg12[%c0_90, %c0_91, %c0_92, %c0_93] : memref<1x1x16x128xf32, #tpu.memory_space<vmem>>, vector<1x1x16x128xf32>
    tpu.vector_store %arg12[%c0_90, %c0_91, %c0_92, %c0_93], %107 {strides = array<i32>} : memref<1x1x16x128xf32, #tpu.memory_space<vmem>>, vector<1x1x16x128xf32>,
    return
  }
  func.func @transform_0(%arg0: i32, %arg1: i32) -> (i32, i32, i32, i32) {
    %c1_i32 = arith.constant 1 : i32
    %0 = arith.muli %c1_i32, %arg1 : i32
    %c0_i32 = arith.constant 0 : i32
    %1 = arith.addi %0, %c0_i32 : i32
    %c0_i32_0 = arith.constant 0 : i32
    %c0_i32_1 = arith.constant 0 : i32
    %c0_i32_2 = arith.constant 0 : i32
    return %arg0, %1, %c0_i32_0, %c0_i32_1 : i32, i32, i32, i32
  }
  func.func @transform_1(%arg0: i32, %arg1: i32) -> (i32, i32, i32, i32) {
    %c1_i32 = arith.constant 1 : i32
    %0 = arith.muli %c1_i32, %arg1 : i32
    %c1_i32_0 = arith.constant 1 : i32
    %1 = arith.addi %0, %c1_i32_0 : i32
    %c0_i32 = arith.constant 0 : i32
    %c0_i32_1 = arith.constant 0 : i32
    %c0_i32_2 = arith.constant 0 : i32
    return %arg0, %1, %c0_i32, %c0_i32_1 : i32, i32, i32, i32
  }
  func.func @transform_2(%arg0: i32, %arg1: i32) -> (i32, i32, i32, i32) {
    %c1_i32 = arith.constant 1 : i32
    %0 = arith.muli %c1_i32, %arg1 : i32
    %c2_i32 = arith.constant 2 : i32
    %1 = arith.addi %0, %c2_i32 : i32
    %c0_i32 = arith.constant 0 : i32
    %c0_i32_0 = arith.constant 0 : i32
    %c0_i32_1 = arith.constant 0 : i32
    return %arg0, %1, %c0_i32, %c0_i32_0 : i32, i32, i32, i32
  }
  func.func @transform_3(%arg0: i32, %arg1: i32) -> (i32, i32, i32) {
    %c0_i32 = arith.constant 0 : i32
    %c0_i32_0 = arith.constant 0 : i32
    %c0_i32_1 = arith.constant 0 : i32
    %c0_i32_2 = arith.constant 0 : i32
    return %c0_i32, %c0_i32_0, %c0_i32_1 : i32, i32, i32
  }
  func.func @transform_4(%arg0: i32, %arg1: i32) -> (i32, i32) {
    %c0_i32 = arith.constant 0 : i32
    %c0_i32_0 = arith.constant 0 : i32
    %c0_i32_1 = arith.constant 0 : i32
    return %c0_i32, %c0_i32_0 : i32, i32
  }
  func.func @transform_5(%arg0: i32, %arg1: i32) -> (i32, i32, i32, i32) {
    %c1_i32 = arith.constant 1 : i32
    %0 = arith.muli %c1_i32, %arg1 : i32
    %c0_i32 = arith.constant 0 : i32
    %1 = arith.addi %0, %c0_i32 : i32
    %c0_i32_0 = arith.constant 0 : i32
    %c0_i32_1 = arith.constant 0 : i32
    %c0_i32_2 = arith.constant 0 : i32
    return %arg0, %1, %c0_i32_0, %c0_i32_1 : i32, i32, i32, i32
  }
  func.func @transform_6(%arg0: i32, %arg1: i32) -> (i32, i32, i32, i32) {
    %c1_i32 = arith.constant 1 : i32
    %0 = arith.muli %c1_i32, %arg1 : i32
    %c1_i32_0 = arith.constant 1 : i32
    %1 = arith.addi %0, %c1_i32_0 : i32
    %c0_i32 = arith.constant 0 : i32
    %c0_i32_1 = arith.constant 0 : i32
    %c0_i32_2 = arith.constant 0 : i32
    return %arg0, %1, %c0_i32, %c0_i32_1 : i32, i32, i32, i32
  }
  func.func @transform_7(%arg0: i32, %arg1: i32) -> (i32, i32, i32, i32) {
    %c1_i32 = arith.constant 1 : i32
    %0 = arith.muli %c1_i32, %arg1 : i32
    %c2_i32 = arith.constant 2 : i32
    %1 = arith.addi %0, %c2_i32 : i32
    %c0_i32 = arith.constant 0 : i32
    %c0_i32_0 = arith.constant 0 : i32
    %c0_i32_1 = arith.constant 0 : i32
    return %arg0, %1, %c0_i32, %c0_i32_0 : i32, i32, i32, i32
  }
  func.func @transform_8(%arg0: i32, %arg1: i32) -> (i32, i32, i32) {
    %c0_i32 = arith.constant 0 : i32
    %c0_i32_0 = arith.constant 0 : i32
    %c0_i32_1 = arith.constant 0 : i32
    %c0_i32_2 = arith.constant 0 : i32
    return %c0_i32, %c0_i32_0, %c0_i32_1 : i32, i32, i32
  }
  func.func @transform_9(%arg0: i32, %arg1: i32) -> (i32, i32) {
    %c0_i32 = arith.constant 0 : i32
    %c0_i32_0 = arith.constant 0 : i32
    %c0_i32_1 = arith.constant 0 : i32
    return %c0_i32, %c0_i32_0 : i32, i32
  }
  func.func @transform_10(%arg0: i32, %arg1: i32) -> (i32, i32, i32, i32) {
    %c0_i32 = arith.constant 0 : i32
    %c0_i32_0 = arith.constant 0 : i32
    %c0_i32_1 = arith.constant 0 : i32
    return %arg0, %arg1, %c0_i32, %c0_i32_0 : i32, i32, i32, i32
  }
}

</mosaic_0001>

<bundles_post_ra>
// kernel: res_block_forward.7
= control target key start
LH: loop header
LB: loop body
LE: loop exit
PB: predicated region body
PF: predicated region fallthrough
CT: control target
= control target key end

     0   :  { %v316_v0 = vmov 0.0   ;;  %s562_s3 = inlined_call_operand.vmem [shape: f32[2,128], index: 3, kind: output, shape index: {}]   ;;  %s563_s0 = inlined_call_operand.vmem [shape: f32[512,128], index: 0, kind: input, shape index: {}]   ;;  %s564_s1 = inlined_call_operand.vmem [shape: f32[1,128], index: 1, kind: input, shape index: {}]   ;;  %s565_s2 = inlined_call_operand.vmem [shape: f32[1,128], index: 2, kind: input, shape index: {}]  }
   0x1   :  { %18 = vst [vmem:[%s562_s3] sm:$0x3] %v316_v0  ;;  %v19_v1 = vld [vmem:[%s563_s0] sm:$0xff]  ;;  %v20_v2 = vld [vmem:[%s563_s0 + $0x8] sm:$0xff]  ;;  %v21_v3 = vld [vmem:[%s563_s0 + $0x10] sm:$0xff] }
   0x2   :  { %v22_v4 = vld [vmem:[%s563_s0 + $0x18] sm:$0xff]  ;;  %v84_v5 = vadd.f32 %v20_v2, %v19_v1  ;;  %v156_v6 = vmul.f32 %v19_v1, %v19_v1  ;;  %v157_v7 = vmul.f32 %v20_v2, %v20_v2  ;;  %v158_v8 = vmul.f32 %v21_v3, %v21_v3  ;;  %v23_v9 = vld [vmem:[%s563_s0 + $0x20] sm:$0xff]  ;;  %v24_v13 = vld [vmem:[%s563_s0 + $0x28] sm:$0xff] }
   0x3   :  { %v159_v11 = vmul.f32 %v22_v4, %v22_v4  ;;  %v160_v15 = vmul.f32 %v23_v9, %v23_v9  ;;  %v25_v17 = vld [vmem:[%s563_s0 + $0x30] sm:$0xff]  ;;  %v161_v19 = vmul.f32 %v24_v13, %v24_v13  ;;  %v26_v21 = vld [vmem:[%s563_s0 + $0x38] sm:$0xff]  ;;  %v27_v25 = vld [vmem:[%s563_s0 + $0x40] sm:$0xff] }
   0x4   :  { %v85_v10 = vadd.f32 %v84_v5, %v21_v3  ;;  %v220_v12 = vadd.f32 %v157_v7, %v156_v6  ;;  %v162_v23 = vmul.f32 %v25_v17, %v25_v17  ;;  %v163_v27 = vmul.f32 %v26_v21, %v26_v21  ;;  %v28_v29 = vld [vmem:[%s563_s0 + $0x48] sm:$0xff]  ;;  %v29_v33 = vld [vmem:[%s563_s0 + $0x50] sm:$0xff]  ;;  %v30_v37 = vld [vmem:[%s563_s0 + $0x58] sm:$0xff] }
   0x5   :  { %v164_v31 = vmul.f32 %v27_v25, %v27_v25  ;;  %v165_v35 = vmul.f32 %v28_v29, %v28_v29  ;;  %v166_v39 = vmul.f32 %v29_v33, %v29_v33  ;;  %v31_v41 = vld [vmem:[%s563_s0 + $0x60] sm:$0xff]  ;;  %v167_v43 = vmul.f32 %v30_v37, %v30_v37  ;;  %v32_v45 = vld [vmem:[%s563_s0 + $0x68] sm:$0xff]  ;;  %v33_v49 = vld [vmem:[%s563_s0 + $0x70] sm:$0xff] }
   0x6   :  { %v86_v14 = vadd.f32 %v85_v10, %v22_v4  ;;  %v221_v16 = vadd.f32 %v220_v12, %v158_v8  ;;  %v168_v47 = vmul.f32 %v31_v41, %v31_v41  ;;  %v169_v51 = vmul.f32 %v32_v45, %v32_v45  ;;  %v34_v53 = vld [vmem:[%s563_s0 + $0x78] sm:$0xff]  ;;  %v35_v57 = vld [vmem:[%s563_s0 + $0x80] sm:$0xff]  ;;  %v36_v61 = vld [vmem:[%s563_s0 + $0x88] sm:$0xff] }
   0x7   :  { %v170_v55 = vmul.f32 %v33_v49, %v33_v49  ;;  %v171_v59 = vmul.f32 %v34_v53, %v34_v53  ;;  %v172_v63 = vmul.f32 %v35_v57, %v35_v57  ;;  %v37_v1 = vld [vmem:[%s563_s0 + $0x90] sm:$0xff]  ;;  %v173_v3 = vmul.f32 %v36_v61, %v36_v61  ;;  %v38_v5 = vld [vmem:[%s563_s0 + $0x98] sm:$0xff] }
   0x8   :  { %v87_v18 = vadd.f32 %v86_v14, %v23_v9  ;;  %v222_v20 = vadd.f32 %v221_v16, %v159_v11  ;;  %v174_v7 = vmul.f32 %v37_v1, %v37_v1  ;;  %v39_v9 = vld [vmem:[%s563_s0 + $0xa0] sm:$0xff]  ;;  %v175_v11 = vmul.f32 %v38_v5, %v38_v5 }
   0xa   :  { %v88_v22 = vadd.f32 %v87_v18, %v24_v13  ;;  %v223_v24 = vadd.f32 %v222_v20, %v160_v15  ;;  %v40_v13 = vld [vmem:[%s563_s0 + $0xa8] sm:$0xff]  ;;  %v176_v15 = vmul.f32 %v39_v9, %v39_v9 }
   0xc   :  { %v89_v26 = vadd.f32 %v88_v22, %v25_v17  ;;  %v224_v28 = vadd.f32 %v223_v24, %v161_v19  ;;  %v41_v17 = vld [vmem:[%s563_s0 + $0xb0] sm:$0xff]  ;;  %v177_v19 = vmul.f32 %v40_v13, %v40_v13 }
   0xe   :  { %v90_v30 = vadd.f32 %v89_v26, %v26_v21  ;;  %v225_v32 = vadd.f32 %v224_v28, %v162_v23  ;;  %v42_v21 = vld [vmem:[%s563_s0 + $0xb8] sm:$0xff]  ;;  %v178_v23 = vmul.f32 %v41_v17, %v41_v17 }
  0x10   :  { %v91_v34 = vadd.f32 %v90_v30, %v27_v25  ;;  %v226_v36 = vadd.f32 %v225_v32, %v163_v27  ;;  %v43_v25 = vld [vmem:[%s563_s0 + $0xc0] sm:$0xff]  ;;  %v179_v27 = vmul.f32 %v42_v21, %v42_v21 }
  0x12   :  { %v92_v38 = vadd.f32 %v91_v34, %v28_v29  ;;  %v227_v40 = vadd.f32 %v226_v36, %v164_v31  ;;  %v44_v29 = vld [vmem:[%s563_s0 + $0xc8] sm:$0xff]  ;;  %v180_v31 = vmul.f32 %v43_v25, %v43_v25 }
  0x14   :  { %v93_v42 = vadd.f32 %v92_v38, %v29_v33  ;;  %v228_v44 = vadd.f32 %v227_v40, %v165_v35  ;;  %v45_v33 = vld [vmem:[%s563_s0 + $0xd0] sm:$0xff]  ;;  %v181_v35 = vmul.f32 %v44_v29, %v44_v29 }
  0x16   :  { %v94_v46 = vadd.f32 %v93_v42, %v30_v37  ;;  %v229_v48 = vadd.f32 %v228_v44, %v166_v39  ;;  %v46_v37 = vld [vmem:[%s563_s0 + $0xd8] sm:$0xff]  ;;  %v182_v39 = vmul.f32 %v45_v33, %v45_v33 }
  0x18   :  { %v95_v50 = vadd.f32 %v94_v46, %v31_v41  ;;  %v230_v52 = vadd.f32 %v229_v48, %v167_v43  ;;  %v47_v41 = vld [vmem:[%s563_s0 + $0xe0] sm:$0xff]  ;;  %v183_v43 = vmul.f32 %v46_v37, %v46_v37 }
  0x1a   :  { %v96_v54 = vadd.f32 %v95_v50, %v32_v45  ;;  %v231_v56 = vadd.f32 %v230_v52, %v168_v47  ;;  %v48_v45 = vld [vmem:[%s563_s0 + $0xe8] sm:$0xff]  ;;  %v184_v47 = vmul.f32 %v47_v41, %v47_v41 }
  0x1c   :  { %v97_v58 = vadd.f32 %v96_v54, %v33_v49  ;;  %v232_v60 = vadd.f32 %v231_v56, %v169_v51  ;;  %v49_v49 = vld [vmem:[%s563_s0 + $0xf0] sm:$0xff]  ;;  %v185_v51 = vmul.f32 %v48_v45, %v48_v45 }
  0x1e   :  { %v98_v62 = vadd.f32 %v97_v58, %v34_v53  ;;  %v233_v0 = vadd.f32 %v232_v60, %v170_v55  ;;  %v50_v53 = vld [vmem:[%s563_s0 + $0xf8] sm:$0xff]  ;;  %v186_v55 = vmul.f32 %v49_v49, %v49_v49 }
  0x20   :  { %v99_v2 = vadd.f32 %v98_v62, %v35_v57  ;;  %v234_v4 = vadd.f32 %v233_v0, %v171_v59  ;;  %v51_v57 = vld [vmem:[%s563_s0 + $0x100] sm:$0xff]  ;;  %v187_v59 = vmul.f32 %v50_v53, %v50_v53 }
  0x22   :  { %v100_v6 = vadd.f32 %v99_v2, %v36_v61  ;;  %v235_v8 = vadd.f32 %v234_v4, %v172_v63  ;;  %v52_v61 = vld [vmem:[%s563_s0 + $0x108] sm:$0xff]  ;;  %v188_v63 = vmul.f32 %v51_v57, %v51_v57 }
  0x24   :  { %v101_v10 = vadd.f32 %v100_v6, %v37_v1  ;;  %v236_v12 = vadd.f32 %v235_v8, %v173_v3  ;;  %v53_v1 = vld [vmem:[%s563_s0 + $0x110] sm:$0xff]  ;;  %v189_v3 = vmul.f32 %v52_v61, %v52_v61 }
  0x26   :  { %v102_v14 = vadd.f32 %v101_v10, %v38_v5  ;;  %v237_v16 = vadd.f32 %v236_v12, %v174_v7  ;;  %v54_v5 = vld [vmem:[%s563_s0 + $0x118] sm:$0xff]  ;;  %v190_v7 = vmul.f32 %v53_v1, %v53_v1 }
  0x28   :  { %v103_v18 = vadd.f32 %v102_v14, %v39_v9  ;;  %v238_v20 = vadd.f32 %v237_v16, %v175_v11  ;;  %v55_v9 = vld [vmem:[%s563_s0 + $0x120] sm:$0xff]  ;;  %v191_v11 = vmul.f32 %v54_v5, %v54_v5 }
  0x2a   :  { %v104_v22 = vadd.f32 %v103_v18, %v40_v13  ;;  %v239_v24 = vadd.f32 %v238_v20, %v176_v15  ;;  %v56_v13 = vld [vmem:[%s563_s0 + $0x128] sm:$0xff]  ;;  %v192_v15 = vmul.f32 %v55_v9, %v55_v9 }
  0x2c   :  { %v105_v26 = vadd.f32 %v104_v22, %v41_v17  ;;  %v240_v28 = vadd.f32 %v239_v24, %v177_v19  ;;  %v57_v17 = vld [vmem:[%s563_s0 + $0x130] sm:$0xff]  ;;  %v193_v19 = vmul.f32 %v56_v13, %v56_v13 }
  0x2e   :  { %v106_v30 = vadd.f32 %v105_v26, %v42_v21  ;;  %v241_v32 = vadd.f32 %v240_v28, %v178_v23  ;;  %v58_v21 = vld [vmem:[%s563_s0 + $0x138] sm:$0xff]  ;;  %v194_v23 = vmul.f32 %v57_v17, %v57_v17 }
  0x30   :  { %v107_v34 = vadd.f32 %v106_v30, %v43_v25  ;;  %v242_v36 = vadd.f32 %v241_v32, %v179_v27  ;;  %v59_v25 = vld [vmem:[%s563_s0 + $0x140] sm:$0xff]  ;;  %v195_v27 = vmul.f32 %v58_v21, %v58_v21 }
  0x32   :  { %v108_v38 = vadd.f32 %v107_v34, %v44_v29  ;;  %v243_v40 = vadd.f32 %v242_v36, %v180_v31  ;;  %v60_v29 = vld [vmem:[%s563_s0 + $0x148] sm:$0xff]  ;;  %v196_v31 = vmul.f32 %v59_v25, %v59_v25 }
  0x34   :  { %v109_v42 = vadd.f32 %v108_v38, %v45_v33  ;;  %v244_v44 = vadd.f32 %v243_v40, %v181_v35  ;;  %v61_v33 = vld [vmem:[%s563_s0 + $0x150] sm:$0xff]  ;;  %v197_v35 = vmul.f32 %v60_v29, %v60_v29 }
  0x36   :  { %v110_v46 = vadd.f32 %v109_v42, %v46_v37  ;;  %v245_v48 = vadd.f32 %v244_v44, %v182_v39  ;;  %v62_v37 = vld [vmem:[%s563_s0 + $0x158] sm:$0xff]  ;;  %v198_v39 = vmul.f32 %v61_v33, %v61_v33 }
  0x38   :  { %v111_v50 = vadd.f32 %v110_v46, %v47_v41  ;;  %v246_v52 = vadd.f32 %v245_v48, %v183_v43  ;;  %v63_v41 = vld [vmem:[%s563_s0 + $0x160] sm:$0xff]  ;;  %v199_v43 = vmul.f32 %v62_v37, %v62_v37 }
  0x3a   :  { %v112_v54 = vadd.f32 %v111_v50, %v48_v45  ;;  %v247_v56 = vadd.f32 %v246_v52, %v184_v47  ;;  %v64_v45 = vld [vmem:[%s563_s0 + $0x168] sm:$0xff]  ;;  %v200_v47 = vmul.f32 %v63_v41, %v63_v41 }
  0x3c   :  { %v113_v58 = vadd.f32 %v112_v54, %v49_v49  ;;  %v248_v60 = vadd.f32 %v247_v56, %v185_v51  ;;  %v65_v49 = vld [vmem:[%s563_s0 + $0x170] sm:$0xff]  ;;  %v201_v51 = vmul.f32 %v64_v45, %v64_v45 }
  0x3e   :  { %v114_v62 = vadd.f32 %v113_v58, %v50_v53  ;;  %v249_v0 = vadd.f32 %v248_v60, %v186_v55  ;;  %v66_v53 = vld [vmem:[%s563_s0 + $0x178] sm:$0xff]  ;;  %v202_v55 = vmul.f32 %v65_v49, %v65_v49 }
  0x40   :  { %v115_v2 = vadd.f32 %v114_v62, %v51_v57  ;;  %v250_v4 = vadd.f32 %v249_v0, %v187_v59  ;;  %v67_v57 = vld [vmem:[%s563_s0 + $0x180] sm:$0xff]  ;;  %v203_v59 = vmul.f32 %v66_v53, %v66_v53 }
  0x42   :  { %v116_v6 = vadd.f32 %v115_v2, %v52_v61  ;;  %v251_v8 = vadd.f32 %v250_v4, %v188_v63  ;;  %v68_v61 = vld [vmem:[%s563_s0 + $0x188] sm:$0xff]  ;;  %v204_v63 = vmul.f32 %v67_v57, %v67_v57 }
  0x44   :  { %v117_v10 = vadd.f32 %v116_v6, %v53_v1  ;;  %v252_v12 = vadd.f32 %v251_v8, %v189_v3  ;;  %v69_v1 = vld [vmem:[%s563_s0 + $0x190] sm:$0xff]  ;;  %v205_v3 = vmul.f32 %v68_v61, %v68_v61 }
  0x46   :  { %v118_v14 = vadd.f32 %v117_v10, %v54_v5  ;;  %v253_v16 = vadd.f32 %v252_v12, %v190_v7  ;;  %v70_v5 = vld [vmem:[%s563_s0 + $0x198] sm:$0xff]  ;;  %v206_v7 = vmul.f32 %v69_v1, %v69_v1 }
  0x48   :  { %v119_v18 = vadd.f32 %v118_v14, %v55_v9  ;;  %v254_v20 = vadd.f32 %v253_v16, %v191_v11  ;;  %v71_v9 = vld [vmem:[%s563_s0 + $0x1a0] sm:$0xff]  ;;  %v207_v11 = vmul.f32 %v70_v5, %v70_v5 }
  0x4a   :  { %v120_v22 = vadd.f32 %v119_v18, %v56_v13  ;;  %v255_v24 = vadd.f32 %v254_v20, %v192_v15  ;;  %v72_v13 = vld [vmem:[%s563_s0 + $0x1a8] sm:$0xff]  ;;  %v208_v15 = vmul.f32 %v71_v9, %v71_v9 }
  0x4c   :  { %v121_v26 = vadd.f32 %v120_v22, %v57_v17  ;;  %v256_v28 = vadd.f32 %v255_v24, %v193_v19  ;;  %v73_v17 = vld [vmem:[%s563_s0 + $0x1b0] sm:$0xff]  ;;  %v209_v19 = vmul.f32 %v72_v13, %v72_v13 }
  0x4e   :  { %v122_v30 = vadd.f32 %v121_v26, %v58_v21  ;;  %v257_v32 = vadd.f32 %v256_v28, %v194_v23  ;;  %v74_v21 = vld [vmem:[%s563_s0 + $0x1b8] sm:$0xff]  ;;  %v210_v23 = vmul.f32 %v73_v17, %v73_v17 }
  0x50   :  { %v123_v34 = vadd.f32 %v122_v30, %v59_v25  ;;  %v258_v36 = vadd.f32 %v257_v32, %v195_v27  ;;  %v75_v25 = vld [vmem:[%s563_s0 + $0x1c0] sm:$0xff]  ;;  %v211_v27 = vmul.f32 %v74_v21, %v74_v21 }
  0x52   :  { %v124_v38 = vadd.f32 %v123_v34, %v60_v29  ;;  %v259_v40 = vadd.f32 %v258_v36, %v196_v31  ;;  %v76_v29 = vld [vmem:[%s563_s0 + $0x1c8] sm:$0xff]  ;;  %v212_v31 = vmul.f32 %v75_v25, %v75_v25 }
  0x54   :  { %v125_v42 = vadd.f32 %v124_v38, %v61_v33  ;;  %v260_v44 = vadd.f32 %v259_v40, %v197_v35  ;;  %v77_v33 = vld [vmem:[%s563_s0 + $0x1d0] sm:$0xff]  ;;  %v213_v35 = vmul.f32 %v76_v29, %v76_v29 }
  0x56   :  { %v126_v46 = vadd.f32 %v125_v42, %v62_v37  ;;  %v261_v48 = vadd.f32 %v260_v44, %v198_v39  ;;  %v78_v37 = vld [vmem:[%s563_s0 + $0x1d8] sm:$0xff]  ;;  %v214_v39 = vmul.f32 %v77_v33, %v77_v33 }
  0x58   :  { %v127_v50 = vadd.f32 %v126_v46, %v63_v41  ;;  %v262_v52 = vadd.f32 %v261_v48, %v199_v43  ;;  %v79_v41 = vld [vmem:[%s563_s0 + $0x1e0] sm:$0xff]  ;;  %v215_v43 = vmul.f32 %v78_v37, %v78_v37 }
  0x5a   :  { %v128_v54 = vadd.f32 %v127_v50, %v64_v45  ;;  %v263_v56 = vadd.f32 %v262_v52, %v200_v47  ;;  %v80_v45 = vld [vmem:[%s563_s0 + $0x1e8] sm:$0xff]  ;;  %v216_v47 = vmul.f32 %v79_v41, %v79_v41 }
  0x5c   :  { %v129_v58 = vadd.f32 %v128_v54, %v65_v49  ;;  %v264_v60 = vadd.f32 %v263_v56, %v201_v51  ;;  %v81_v49 = vld [vmem:[%s563_s0 + $0x1f0] sm:$0xff]  ;;  %v217_v51 = vmul.f32 %v80_v45, %v80_v45 }
  0x5e   :  { %v130_v62 = vadd.f32 %v129_v58, %v66_v53  ;;  %v265_v0 = vadd.f32 %v264_v60, %v202_v55  ;;  %v82_v53 = vld [vmem:[%s563_s0 + $0x1f8] sm:$0xff]  ;;  %v218_v55 = vmul.f32 %v81_v49, %v81_v49 }
  0x5f   :  { %v219_v58 = vmul.f32 %v82_v53, %v82_v53 }
  0x60   :  { %v131_v2 = vadd.f32 %v130_v62, %v67_v57  ;;  %v266_v4 = vadd.f32 %v265_v0, %v203_v59 }
  0x62   :  { %v132_v6 = vadd.f32 %v131_v2, %v68_v61  ;;  %v267_v8 = vadd.f32 %v266_v4, %v204_v63 }
  0x64   :  { %v133_v10 = vadd.f32 %v132_v6, %v69_v1  ;;  %v268_v12 = vadd.f32 %v267_v8, %v205_v3 }
  0x66   :  { %v134_v14 = vadd.f32 %v133_v10, %v70_v5  ;;  %v269_v16 = vadd.f32 %v268_v12, %v206_v7  ;;  %v83_v7 = vld [vmem:[%s562_s3] sm:$0x1] }
  0x68   :  { %v135_v18 = vadd.f32 %v134_v14, %v71_v9  ;;  %v270_v20 = vadd.f32 %v269_v16, %v207_v11 }
  0x6a   :  { %v136_v22 = vadd.f32 %v135_v18, %v72_v13  ;;  %v271_v24 = vadd.f32 %v270_v20, %v208_v15  ;;  %v155_v13 = vld [vmem:[%s562_s3 + $0x1] sm:$0x1] }
  0x6c   :  { %v137_v26 = vadd.f32 %v136_v22, %v73_v17  ;;  %v272_v28 = vadd.f32 %v271_v24, %v209_v19  ;;  %v300_v22 = vld [vmem:[%s564_s1] sm:$0x1] }
  0x6e   :  { %v138_v30 = vadd.f32 %v137_v26, %v74_v21  ;;  %v273_v32 = vadd.f32 %v272_v28, %v210_v23 }
  0x70   :  { %v139_v34 = vadd.f32 %v138_v30, %v75_v25  ;;  %v274_v36 = vadd.f32 %v273_v32, %v211_v27  ;;  %v305_v25 = vld [vmem:[%s565_s2] sm:$0x1] }
  0x72   :  { %v140_v38 = vadd.f32 %v139_v34, %v76_v29  ;;  %v275_v40 = vadd.f32 %v274_v36, %v212_v31 }
  0x74   :  { %v141_v42 = vadd.f32 %v140_v38, %v77_v33  ;;  %v276_v44 = vadd.f32 %v275_v40, %v213_v35 }
  0x76   :  { %v142_v46 = vadd.f32 %v141_v42, %v78_v37  ;;  %v277_v48 = vadd.f32 %v276_v44, %v214_v39 }
  0x78   :  { %v143_v50 = vadd.f32 %v142_v46, %v79_v41  ;;  %v278_v52 = vadd.f32 %v277_v48, %v215_v43 }
  0x7a   :  { %v144_v54 = vadd.f32 %v143_v50, %v80_v45  ;;  %v279_v56 = vadd.f32 %v278_v52, %v216_v47 }
  0x7c   :  { %v145_v57 = vadd.f32 %v144_v54, %v81_v49  ;;  %v280_v59 = vadd.f32 %v279_v56, %v217_v51 }
  0x7e   :  { %v146_v60 = vadd.f32 %v145_v57, %v82_v53  ;;  %v281_v61 = vadd.f32 %v280_v59, %v218_v55 }
  0x80   :  { %v147_v62 = vrot.slane %v146_v60, 4  ;;  %v282_v63 = vadd.f32 %v281_v61, %v219_v58 }
  0x82   :  { %v148_v0 = vadd.f32 %v147_v62, %v146_v60  ;;  %v283_v1 = vrot.slane %v282_v63, 4 }
  0x84   :  { %v149_v2 = vrot.slane %v148_v0, 2  ;;  %v284_v3 = vadd.f32 %v283_v1, %v282_v63 }
  0x86   :  { %v150_v4 = vadd.f32 %v149_v2, %v148_v0  ;;  %v285_v5 = vrot.slane %v284_v3, 2 }
  0x88   :  { %v151_v6 = vrot.slane %v150_v4, 1  ;;  %v286_v8 = vadd.f32 %v285_v5, %v284_v3 }
  0x8a   :  { %v152_v9 = vadd.f32 %v151_v6, %v150_v4  ;;  %v287_v10 = vrot.slane %v286_v8, 1 }
  0x8c   :  { %v153_v11 = vadd.f32 %v152_v9, %v83_v7  ;;  %v288_v12 = vadd.f32 %v287_v10, %v286_v8 }
  0x8e   :  { %154 = vst [vmem:[%s562_s3] sm:$0x1] %v153_v11  ;;  %v289_v14 = vadd.f32 %v288_v12, %v155_v13 }
  0x90   :  { %290 = vst [vmem:[%s562_s3 + $0x1] sm:$0x1] %v289_v14 }
  0x95   :  { %v294_v15 = vld [vmem:[%s562_s3] sm:$0x1] }
  0x96   :  { %v295_v16 = vmul.f32 0.001953125, %v294_v15 }
  0x97   :  { %v296_v17 = vld [vmem:[%s562_s3 + $0x1] sm:$0x1] }
  0x98   :  { %v298_v18 = vmul.f32 %v295_v16, %v295_v16  ;;  %v297_v19 = vmul.f32 0.001953125, %v296_v17 }
  0x9a   :  { %v299_v20 = vsub.f32 %v297_v19, %v298_v18 }
  0x9c   :  { %v301_v21 = vadd.f32 1e-05, %v299_v20 }
  0x9e   :  { %314 = vrsqrt.f32 %v301_v21 }
  0xab   :  { %v315_v23 = vpop.eup %314 }
  0xac   :  { %v303_v24 = vmul.f32 %v315_v23, %v300_v22 }
  0xae   :  { %304 = vst [vmem:[%s562_s3] sm:$0x1] %v303_v24  ;;  %v306_v26 = vmul.f32 %v303_v24, %v295_v16 }
  0xb0   :  { %v307_v27 = vsub.f32 %v305_v25, %v306_v26 }
  0xb2   :  { %308 = vst [vmem:[%s562_s3 + $0x1] sm:$0x1] %v307_v27 }

// kernel: res_block_forward.8
= control target key start
LH: loop header
LB: loop body
LE: loop exit
PB: predicated region body
PF: predicated region fallthrough
CT: control target
= control target key end

     0   :  { %s1099_s0 = inlined_call_operand.vmem [shape: f32[512,128], index: 0, kind: input, shape index: {}]   ;;  %s1100_s1 = inlined_call_operand.vmem [shape: f32[2,128], index: 1, kind: input, shape index: {}]   ;;  %s1101_s2 = inlined_call_operand.<no memory space> [shape: f32[1,1], index: 2, kind: input, shape index: {}]   ;;  %s1102_s3 = inlined_call_operand.vmem [shape: f32[512,128], index: 3, kind: output, shape index: {}]  }
   0x1   :  { %v15_v0 = vld [vmem:[%s1099_s0] sm:$0xff]  ;;  %v16_v4 = vld [vmem:[%s1099_s0 + $0x8] sm:$0xff]  ;;  %v17_v5 = vld [vmem:[%s1099_s0 + $0x10] sm:$0xff]  ;;  %v527_v7 = vstv %s1101_s2 }
   0x2   :  { %v507_v1 = vld [vmem:[%s1100_s1] ss:$0 sm:$0xff]  ;;  %v512_v2 = vld [vmem:[%s1100_s1 + $0x1] ss:$0 sm:$0xff]  ;;  %v18_v6 = vld [vmem:[%s1099_s0 + $0x18] sm:$0xff] }
   0x3   :  { %v84_v3 = vmul.f32 %v507_v1, %v15_v0  ;;  %v85_v8 = vmul.f32 %v507_v1, %v16_v4  ;;  %v86_v9 = vmul.f32 %v507_v1, %v17_v5  ;;  %v87_v10 = vmul.f32 %v507_v1, %v18_v6  ;;  %v19_v11 = vld [vmem:[%s1099_s0 + $0x20] sm:$0xff]  ;;  %v20_v12 = vld [vmem:[%s1099_s0 + $0x28] sm:$0xff]  ;;  %v21_v13 = vld [vmem:[%s1099_s0 + $0x30] sm:$0xff] }
   0x4   :  { %v88_v15 = vmul.f32 %v507_v1, %v19_v11  ;;  %v89_v16 = vmul.f32 %v507_v1, %v20_v12  ;;  %v90_v17 = vmul.f32 %v507_v1, %v21_v13  ;;  %v22_v18 = vld [vmem:[%s1099_s0 + $0x38] sm:$0xff]  ;;  %v23_v30 = vld [vmem:[%s1099_s0 + $0x40] sm:$0xff]  ;;  %v24_v31 = vld [vmem:[%s1099_s0 + $0x48] sm:$0xff] }
   0x5   :  { %v153_v14 = vadd.f32 %v512_v2, %v84_v3  ;;  %v154_v19 = vadd.f32 %v512_v2, %v85_v8  ;;  %v155_v20 = vadd.f32 %v512_v2, %v86_v9  ;;  %v156_v21 = vadd.f32 %v512_v2, %v87_v10  ;;  %v25_v32 = vld [vmem:[%s1099_s0 + $0x50] sm:$0xff]  ;;  %v26_v44 = vld [vmem:[%s1099_s0 + $0x58] sm:$0xff]  ;;  %v27_v45 = vld [vmem:[%s1099_s0 + $0x60] sm:$0xff] }
   0x6   :  { %v91_v22 = vmul.f32 %v507_v1, %v22_v18  ;;  %v157_v24 = vadd.f32 %v512_v2, %v88_v15  ;;  %v158_v25 = vadd.f32 %v512_v2, %v89_v16  ;;  %v159_v38 = vadd.f32 %v512_v2, %v90_v17  ;;  %v28_v46 = vld [vmem:[%s1099_s0 + $0x68] sm:$0xff]  ;;  %v29_v57 = vld [vmem:[%s1099_s0 + $0x70] sm:$0xff]  ;;  %v30_v5 = vld [vmem:[%s1099_s0 + $0x78] sm:$0xff] }
   0x7   :  { %vm218_vm0 = vcmp.ge.f32.partialorder %v153_v14, 0.0  ;;  %v283_v23 = vmul.f32 %v527_v7, %v153_v14  ;;  %vm219_vm1 = vcmp.ge.f32.partialorder %v154_v19, 0.0  ;;  %v284_v26 = vmul.f32 %v527_v7, %v154_v19  ;;  %v31_v6 = vld [vmem:[%s1099_s0 + $0x80] sm:$0xff]  ;;  %v32_v11 = vld [vmem:[%s1099_s0 + $0x88] sm:$0xff]  ;;  %v33_v12 = vld [vmem:[%s1099_s0 + $0x90] sm:$0xff] }
   0x8   :  { %vm220_vm2 = vcmp.ge.f32.partialorder %v155_v20, 0.0  ;;  %v285_v27 = vmul.f32 %v527_v7, %v155_v20  ;;  %vm221_vm3 = vcmp.ge.f32.partialorder %v156_v21, 0.0  ;;  %v286_v29 = vmul.f32 %v527_v7, %v156_v21 }
   0x9   :  { %v347_v28 = vsel %vm218_vm0, %v153_v14, %v283_v23  ;;  %vm222_vm4 = vcmp.ge.f32.partialorder %v157_v24, 0.0  ;;  %v348_v33 = vsel %vm219_vm1, %v154_v19, %v284_v26  ;;  %v287_v35 = vmul.f32 %v527_v7, %v157_v24  ;;  %v34_v19 = vld [vmem:[%s1099_s0 + $0x98] sm:$0xff] }
   0xa   :  { %411 = vst [vmem:[%s1102_s3] sm:$0xff] %v347_v28  ;;  %v349_v34 = vsel %vm220_vm2, %v155_v20, %v285_v27  ;;  %vm223_vm5 = vcmp.ge.f32.partialorder %v158_v25, 0.0  ;;  %412 = vst [vmem:[%s1102_s3 + $0x8] sm:$0xff] %v348_v33  ;;  %v350_v36 = vsel %vm221_vm3, %v156_v21, %v286_v29  ;;  %v288_v37 = vmul.f32 %v527_v7, %v158_v25  ;;  %v35_v20 = vld [vmem:[%s1099_s0 + $0xa0] sm:$0xff] }
   0xb   :  { %413 = vst [vmem:[%s1102_s3 + $0x10] sm:$0xff] %v349_v34  ;;  %v160_v39 = vadd.f32 %v512_v2, %v91_v22  ;;  %414 = vst [vmem:[%s1102_s3 + $0x18] sm:$0xff] %v350_v36  ;;  %v351_v40 = vsel %vm222_vm4, %v157_v24, %v287_v35  ;;  %v92_v41 = vmul.f32 %v507_v1, %v23_v30  ;;  %vm224_vm6 = vcmp.ge.f32.partialorder %v159_v38, 0.0  ;;  %v36_v34 = vld [vmem:[%s1099_s0 + $0xa8] sm:$0xff]  ;;  %v37_v35 = vld [vmem:[%s1099_s0 + $0xb0] sm:$0xff] }
   0xc   :  { %v93_v42 = vmul.f32 %v507_v1, %v24_v31  ;;  %v94_v43 = vmul.f32 %v507_v1, %v25_v32  ;;  %415 = vst [vmem:[%s1102_s3 + $0x20] sm:$0xff] %v351_v40  ;;  %v352_v47 = vsel %vm223_vm5, %v158_v25, %v288_v37  ;;  %v289_v48 = vmul.f32 %v527_v7, %v159_v38 }
   0xd   :  { %vm225_vm7 = vcmp.ge.f32.partialorder %v160_v39, 0.0  ;;  %416 = vst [vmem:[%s1102_s3 + $0x28] sm:$0xff] %v352_v47  ;;  %v290_v49 = vmul.f32 %v527_v7, %v160_v39  ;;  %v161_v50 = vadd.f32 %v512_v2, %v92_v41  ;;  %v95_v54 = vmul.f32 %v507_v1, %v26_v44  ;;  %v39_v47 = vld [vmem:[%s1099_s0 + $0xc0] sm:$0xff] }
   0xe   :  { %v162_v51 = vadd.f32 %v512_v2, %v93_v42  ;;  %v163_v52 = vadd.f32 %v512_v2, %v94_v43  ;;  %v353_v53 = vsel %vm224_vm6, %v159_v38, %v289_v48  ;;  %v96_v55 = vmul.f32 %v507_v1, %v27_v45  ;;  %v38_v42 = vld [vmem:[%s1099_s0 + $0xb8] sm:$0xff]  ;;  %v40_v48 = vld [vmem:[%s1099_s0 + $0xc8] sm:$0xff] }
   0xf   :  { %v97_v56 = vmul.f32 %v507_v1, %v28_v46  ;;  %417 = vst [vmem:[%s1102_s3 + $0x30] sm:$0xff] %v353_v53  ;;  %v354_v58 = vsel %vm225_vm7, %v160_v39, %v290_v49  ;;  %vm226_vm8 = vcmp.ge.f32.partialorder %v161_v50, 0.0  ;;  %v291_v59 = vmul.f32 %v527_v7, %v161_v50  ;;  %v41_v49 = vld [vmem:[%s1099_s0 + $0xd0] sm:$0xff] }
  0x10   :  { %vm227_vm9 = vcmp.ge.f32.partialorder %v162_v51, 0.0  ;;  %418 = vst [vmem:[%s1102_s3 + $0x38] sm:$0xff] %v354_v58  ;;  %v292_v60 = vmul.f32 %v527_v7, %v162_v51  ;;  %vm228_vm10 = vcmp.ge.f32.partialorder %v163_v52, 0.0  ;;  %v293_v61 = vmul.f32 %v527_v7, %v163_v52 }
  0x11   :  { %v164_v62 = vadd.f32 %v512_v2, %v95_v54  ;;  %v355_v63 = vsel %vm226_vm8, %v161_v50, %v291_v59  ;;  %v165_v0 = vadd.f32 %v512_v2, %v96_v55  ;;  %v166_v3 = vadd.f32 %v512_v2, %v97_v56 }
  0x12   :  { %v98_v4 = vmul.f32 %v507_v1, %v29_v57  ;;  %419 = vst [vmem:[%s1102_s3 + $0x40] sm:$0xff] %v355_v63  ;;  %v356_v8 = vsel %vm227_vm9, %v162_v51, %v292_v60  ;;  %v357_v9 = vsel %vm228_vm10, %v163_v52, %v293_v61  ;;  %v99_v17 = vmul.f32 %v507_v1, %v30_v5  ;;  %v42_v60 = vld [vmem:[%s1099_s0 + $0xd8] sm:$0xff]  ;;  %v43_v61 = vld [vmem:[%s1099_s0 + $0xe0] sm:$0xff] }
  0x13   :  { %vm229_vm11 = vcmp.ge.f32.partialorder %v164_v62, 0.0  ;;  %v294_v10 = vmul.f32 %v527_v7, %v164_v62  ;;  %420 = vst [vmem:[%s1102_s3 + $0x48] sm:$0xff] %v356_v8  ;;  %421 = vst [vmem:[%s1102_s3 + $0x50] sm:$0xff] %v357_v9  ;;  %vm230_vm12 = vcmp.ge.f32.partialorder %v165_v0, 0.0  ;;  %v295_v13 = vmul.f32 %v527_v7, %v165_v0 }
  0x14   :  { %vm231_vm13 = vcmp.ge.f32.partialorder %v166_v3, 0.0  ;;  %v296_v14 = vmul.f32 %v527_v7, %v166_v3  ;;  %v167_v16 = vadd.f32 %v512_v2, %v98_v4  ;;  %v100_v18 = vmul.f32 %v507_v1, %v31_v6 }
  0x15   :  { %v358_v15 = vsel %vm229_vm11, %v164_v62, %v294_v10  ;;  %v359_v21 = vsel %vm230_vm12, %v165_v0, %v295_v13  ;;  %v101_v23 = vmul.f32 %v507_v1, %v32_v11  ;;  %v102_v24 = vmul.f32 %v507_v1, %v33_v12  ;;  %v44_v13 = vld [vmem:[%s1099_s0 + $0xe8] sm:$0xff] }
  0x16   :  { %422 = vst [vmem:[%s1102_s3 + $0x58] sm:$0xff] %v358_v15  ;;  %v360_v22 = vsel %vm231_vm13, %v166_v3, %v296_v14  ;;  %423 = vst [vmem:[%s1102_s3 + $0x60] sm:$0xff] %v359_v21  ;;  %vm232_vm14 = vcmp.ge.f32.partialorder %v167_v16, 0.0  ;;  %v297_v25 = vmul.f32 %v527_v7, %v167_v16  ;;  %v168_v26 = vadd.f32 %v512_v2, %v99_v17  ;;  %v45_v14 = vld [vmem:[%s1099_s0 + $0xf0] sm:$0xff]  ;;  %v46_v21 = vld [vmem:[%s1099_s0 + $0xf8] sm:$0xff] }
  0x17   :  { %424 = vst [vmem:[%s1102_s3 + $0x68] sm:$0xff] %v360_v22  ;;  %v169_v27 = vadd.f32 %v512_v2, %v100_v18  ;;  %v170_v28 = vadd.f32 %v512_v2, %v101_v23  ;;  %v171_v29 = vadd.f32 %v512_v2, %v102_v24  ;;  %v103_v30 = vmul.f32 %v507_v1, %v34_v19 }
  0x18   :  { %v104_v31 = vmul.f32 %v507_v1, %v35_v20  ;;  %v361_v32 = vsel %vm232_vm14, %v167_v16, %v297_v25  ;;  %vm233_vm15 = vcmp.ge.f32.partialorder %v168_v26, 0.0  ;;  %v298_v33 = vmul.f32 %v527_v7, %v168_v26 }
  0x19   :  { %vm234_vm0 = vcmp.ge.f32.partialorder %v169_v27, 0.0  ;;  %425 = vst [vmem:[%s1102_s3 + $0x70] sm:$0xff] %v361_v32  ;;  %v299_v36 = vmul.f32 %v527_v7, %v169_v27  ;;  %vm235_vm1 = vcmp.ge.f32.partialorder %v170_v28, 0.0  ;;  %v300_v37 = vmul.f32 %v527_v7, %v170_v28 }
  0x1a   :  { %vm236_vm2 = vcmp.ge.f32.partialorder %v171_v29, 0.0  ;;  %v362_v38 = vsel %vm233_vm15, %v168_v26, %v298_v33  ;;  %v301_v39 = vmul.f32 %v527_v7, %v171_v29  ;;  %v172_v40 = vadd.f32 %v512_v2, %v103_v30  ;;  %v47_v26 = vld [vmem:[%s1099_s0 + $0x100] sm:$0xff] }
  0x1b   :  { %v173_v41 = vadd.f32 %v512_v2, %v104_v31  ;;  %426 = vst [vmem:[%s1102_s3 + $0x78] sm:$0xff] %v362_v38  ;;  %v363_v43 = vsel %vm234_vm0, %v169_v27, %v299_v36  ;;  %v364_v44 = vsel %vm235_vm1, %v170_v28, %v300_v37  ;;  %v105_v45 = vmul.f32 %v507_v1, %v36_v34  ;;  %v48_v27 = vld [vmem:[%s1099_s0 + $0x108] sm:$0xff]  ;;  %v49_v28 = vld [vmem:[%s1099_s0 + $0x110] sm:$0xff] }
  0x1c   :  { %v106_v46 = vmul.f32 %v507_v1, %v37_v35  ;;  %427 = vst [vmem:[%s1102_s3 + $0x80] sm:$0xff] %v363_v43  ;;  %428 = vst [vmem:[%s1102_s3 + $0x88] sm:$0xff] %v364_v44  ;;  %v365_v50 = vsel %vm236_vm2, %v171_v29, %v301_v39  ;;  %vm237_vm3 = vcmp.ge.f32.partialorder %v172_v40, 0.0  ;;  %v302_v51 = vmul.f32 %v527_v7, %v172_v40  ;;  %v50_v39 = vld [vmem:[%s1099_s0 + $0x118] sm:$0xff] }
  0x1d   :  { %vm238_vm4 = vcmp.ge.f32.partialorder %v173_v41, 0.0  ;;  %429 = vst [vmem:[%s1102_s3 + $0x90] sm:$0xff] %v365_v50  ;;  %v303_v52 = vmul.f32 %v527_v7, %v173_v41  ;;  %v174_v53 = vadd.f32 %v512_v2, %v105_v45  ;;  %v107_v55 = vmul.f32 %v507_v1, %v38_v42 }
  0x1e   :  { %v175_v54 = vadd.f32 %v512_v2, %v106_v46  ;;  %v366_v56 = vsel %vm237_vm3, %v172_v40, %v302_v51  ;;  %v108_v57 = vmul.f32 %v507_v1, %v39_v47  ;;  %v109_v58 = vmul.f32 %v507_v1, %v40_v48  ;;  %v51_v40 = vld [vmem:[%s1099_s0 + $0x120] sm:$0xff] }
  0x1f   :  { %v110_v59 = vmul.f32 %v507_v1, %v41_v49  ;;  %430 = vst [vmem:[%s1102_s3 + $0x98] sm:$0xff] %v366_v56  ;;  %v367_v62 = vsel %vm238_vm4, %v173_v41, %v303_v52  ;;  %vm239_vm5 = vcmp.ge.f32.partialorder %v174_v53, 0.0  ;;  %v304_v63 = vmul.f32 %v527_v7, %v174_v53 }
  0x20   :  { %vm240_vm6 = vcmp.ge.f32.partialorder %v175_v54, 0.0  ;;  %431 = vst [vmem:[%s1102_s3 + $0xa0] sm:$0xff] %v367_v62  ;;  %v305_v0 = vmul.f32 %v527_v7, %v175_v54  ;;  %v176_v3 = vadd.f32 %v512_v2, %v107_v55  ;;  %v177_v4 = vadd.f32 %v512_v2, %v108_v57 }
  0x21   :  { %v178_v5 = vadd.f32 %v512_v2, %v109_v58  ;;  %v368_v6 = vsel %vm239_vm5, %v174_v53, %v304_v63  ;;  %v179_v8 = vadd.f32 %v512_v2, %v110_v59  ;;  %v111_v9 = vmul.f32 %v507_v1, %v42_v60  ;;  %v52_v53 = vld [vmem:[%s1099_s0 + $0x128] sm:$0xff] }
  0x22   :  { %v112_v10 = vmul.f32 %v507_v1, %v43_v61  ;;  %432 = vst [vmem:[%s1102_s3 + $0xa8] sm:$0xff] %v368_v6  ;;  %v369_v11 = vsel %vm240_vm6, %v175_v54, %v305_v0  ;;  %vm241_vm7 = vcmp.ge.f32.partialorder %v176_v3, 0.0  ;;  %v306_v12 = vmul.f32 %v527_v7, %v176_v3  ;;  %v53_v54 = vld [vmem:[%s1099_s0 + $0x130] sm:$0xff]  ;;  %v54_v61 = vld [vmem:[%s1099_s0 + $0x138] sm:$0xff] }
  0x23   :  { %vm242_vm8 = vcmp.ge.f32.partialorder %v177_v4, 0.0  ;;  %433 = vst [vmem:[%s1102_s3 + $0xb0] sm:$0xff] %v369_v11  ;;  %v307_v15 = vmul.f32 %v527_v7, %v177_v4  ;;  %vm243_vm9 = vcmp.ge.f32.partialorder %v178_v5, 0.0  ;;  %v308_v16 = vmul.f32 %v527_v7, %v178_v5  ;;  %v57_v6 = vld [vmem:[%s1099_s0 + $0x150] sm:$0xff] }
  0x24   :  { %vm244_vm10 = vcmp.ge.f32.partialorder %v179_v8, 0.0  ;;  %v370_v17 = vsel %vm241_vm7, %v176_v3, %v306_v12  ;;  %v309_v18 = vmul.f32 %v527_v7, %v179_v8  ;;  %v180_v19 = vadd.f32 %v512_v2, %v111_v9 }
  0x25   :  { %v181_v20 = vadd.f32 %v512_v2, %v112_v10  ;;  %434 = vst [vmem:[%s1102_s3 + $0xb8] sm:$0xff] %v370_v17  ;;  %v371_v22 = vsel %vm242_vm8, %v177_v4, %v307_v15  ;;  %v372_v23 = vsel %vm243_vm9, %v178_v5, %v308_v16  ;;  %v113_v24 = vmul.f32 %v507_v1, %v44_v13  ;;  %v55_v4 = vld [vmem:[%s1099_s0 + $0x140] sm:$0xff]  ;;  %v56_v5 = vld [vmem:[%s1099_s0 + $0x148] sm:$0xff] }
  0x26   :  { %v114_v25 = vmul.f32 %v507_v1, %v45_v14  ;;  %435 = vst [vmem:[%s1102_s3 + $0xc0] sm:$0xff] %v371_v22  ;;  %436 = vst [vmem:[%s1102_s3 + $0xc8] sm:$0xff] %v372_v23  ;;  %v373_v29 = vsel %vm244_vm10, %v179_v8, %v309_v18  ;;  %vm245_vm11 = vcmp.ge.f32.partialorder %v180_v19, 0.0  ;;  %v310_v30 = vmul.f32 %v527_v7, %v180_v19  ;;  %v58_v18 = vld [vmem:[%s1099_s0 + $0x158] sm:$0xff] }
  0x27   :  { %vm246_vm12 = vcmp.ge.f32.partialorder %v181_v20, 0.0  ;;  %437 = vst [vmem:[%s1102_s3 + $0xd0] sm:$0xff] %v373_v29  ;;  %v311_v31 = vmul.f32 %v527_v7, %v181_v20  ;;  %v182_v32 = vadd.f32 %v512_v2, %v113_v24  ;;  %v115_v34 = vmul.f32 %v507_v1, %v46_v21 }
  0x28   :  { %v183_v33 = vadd.f32 %v512_v2, %v114_v25  ;;  %v374_v35 = vsel %vm245_vm11, %v180_v19, %v310_v30  ;;  %v116_v36 = vmul.f32 %v507_v1, %v47_v26  ;;  %v117_v37 = vmul.f32 %v507_v1, %v48_v27  ;;  %v59_v19 = vld [vmem:[%s1099_s0 + $0x160] sm:$0xff] }
  0x29   :  { %v118_v38 = vmul.f32 %v507_v1, %v49_v28  ;;  %438 = vst [vmem:[%s1102_s3 + $0xd8] sm:$0xff] %v374_v35  ;;  %v375_v41 = vsel %vm246_vm12, %v181_v20, %v311_v31  ;;  %vm247_vm13 = vcmp.ge.f32.partialorder %v182_v32, 0.0  ;;  %v312_v42 = vmul.f32 %v527_v7, %v182_v32 }
  0x2a   :  { %vm248_vm14 = vcmp.ge.f32.partialorder %v183_v33, 0.0  ;;  %439 = vst [vmem:[%s1102_s3 + $0xe0] sm:$0xff] %v375_v41  ;;  %v313_v43 = vmul.f32 %v527_v7, %v183_v33  ;;  %v184_v44 = vadd.f32 %v512_v2, %v115_v34  ;;  %v185_v45 = vadd.f32 %v512_v2, %v116_v36 }
  0x2b   :  { %v186_v46 = vadd.f32 %v512_v2, %v117_v37  ;;  %v376_v47 = vsel %vm247_vm13, %v182_v32, %v312_v42  ;;  %v187_v48 = vadd.f32 %v512_v2, %v118_v38  ;;  %v119_v49 = vmul.f32 %v507_v1, %v50_v39  ;;  %v60_v32 = vld [vmem:[%s1099_s0 + $0x168] sm:$0xff] }
  0x2c   :  { %v120_v50 = vmul.f32 %v507_v1, %v51_v40  ;;  %440 = vst [vmem:[%s1102_s3 + $0xe8] sm:$0xff] %v376_v47  ;;  %v377_v51 = vsel %vm248_vm14, %v183_v33, %v313_v43  ;;  %vm249_vm15 = vcmp.ge.f32.partialorder %v184_v44, 0.0  ;;  %v314_v52 = vmul.f32 %v527_v7, %v184_v44  ;;  %v61_v33 = vld [vmem:[%s1099_s0 + $0x170] sm:$0xff]  ;;  %v62_v40 = vld [vmem:[%s1099_s0 + $0x178] sm:$0xff] }
  0x2d   :  { %vm250_vm0 = vcmp.ge.f32.partialorder %v185_v45, 0.0  ;;  %441 = vst [vmem:[%s1102_s3 + $0xf0] sm:$0xff] %v377_v51  ;;  %v315_v55 = vmul.f32 %v527_v7, %v185_v45  ;;  %vm251_vm1 = vcmp.ge.f32.partialorder %v186_v46, 0.0  ;;  %v316_v56 = vmul.f32 %v527_v7, %v186_v46  ;;  %v65_v47 = vld [vmem:[%s1099_s0 + $0x190] sm:$0xff] }
  0x2e   :  { %vm252_vm2 = vcmp.ge.f32.partialorder %v187_v48, 0.0  ;;  %v378_v57 = vsel %vm249_vm15, %v184_v44, %v314_v52  ;;  %v317_v58 = vmul.f32 %v527_v7, %v187_v48  ;;  %v188_v59 = vadd.f32 %v512_v2, %v119_v49 }
  0x2f   :  { %v189_v60 = vadd.f32 %v512_v2, %v120_v50  ;;  %442 = vst [vmem:[%s1102_s3 + $0xf8] sm:$0xff] %v378_v57  ;;  %v379_v62 = vsel %vm250_vm0, %v185_v45, %v315_v55  ;;  %v380_v63 = vsel %vm251_vm1, %v186_v46, %v316_v56  ;;  %v121_v0 = vmul.f32 %v507_v1, %v52_v53  ;;  %v63_v45 = vld [vmem:[%s1099_s0 + $0x180] sm:$0xff]  ;;  %v64_v46 = vld [vmem:[%s1099_s0 + $0x188] sm:$0xff] }
  0x30   :  { %v122_v3 = vmul.f32 %v507_v1, %v53_v54  ;;  %443 = vst [vmem:[%s1102_s3 + $0x100] sm:$0xff] %v379_v62  ;;  %444 = vst [vmem:[%s1102_s3 + $0x108] sm:$0xff] %v380_v63  ;;  %v381_v8 = vsel %vm252_vm2, %v187_v48, %v317_v58  ;;  %vm253_vm3 = vcmp.ge.f32.partialorder %v188_v59, 0.0  ;;  %v318_v9 = vmul.f32 %v527_v7, %v188_v59  ;;  %v66_v58 = vld [vmem:[%s1099_s0 + $0x198] sm:$0xff] }
  0x31   :  { %vm254_vm4 = vcmp.ge.f32.partialorder %v189_v60, 0.0  ;;  %445 = vst [vmem:[%s1102_s3 + $0x110] sm:$0xff] %v381_v8  ;;  %v319_v10 = vmul.f32 %v527_v7, %v189_v60  ;;  %v190_v11 = vadd.f32 %v512_v2, %v121_v0  ;;  %v123_v13 = vmul.f32 %v507_v1, %v54_v61 }
  0x32   :  { %v191_v12 = vadd.f32 %v512_v2, %v122_v3  ;;  %v382_v14 = vsel %vm253_vm3, %v188_v59, %v318_v9  ;;  %v124_v15 = vmul.f32 %v507_v1, %v55_v4  ;;  %v125_v16 = vmul.f32 %v507_v1, %v56_v5  ;;  %v67_v59 = vld [vmem:[%s1099_s0 + $0x1a0] sm:$0xff] }
  0x33   :  { %v126_v17 = vmul.f32 %v507_v1, %v57_v6  ;;  %446 = vst [vmem:[%s1102_s3 + $0x118] sm:$0xff] %v382_v14  ;;  %v383_v20 = vsel %vm254_vm4, %v189_v60, %v319_v10  ;;  %vm255_vm5 = vcmp.ge.f32.partialorder %v190_v11, 0.0  ;;  %v320_v21 = vmul.f32 %v527_v7, %v190_v11 }
  0x34   :  { %vm256_vm6 = vcmp.ge.f32.partialorder %v191_v12, 0.0  ;;  %447 = vst [vmem:[%s1102_s3 + $0x120] sm:$0xff] %v383_v20  ;;  %v321_v22 = vmul.f32 %v527_v7, %v191_v12  ;;  %v192_v23 = vadd.f32 %v512_v2, %v123_v13  ;;  %v193_v24 = vadd.f32 %v512_v2, %v124_v15 }
  0x35   :  { %v194_v25 = vadd.f32 %v512_v2, %v125_v16  ;;  %v384_v26 = vsel %vm255_vm5, %v190_v11, %v320_v21  ;;  %v195_v27 = vadd.f32 %v512_v2, %v126_v17  ;;  %v127_v28 = vmul.f32 %v507_v1, %v58_v18  ;;  %v68_v11 = vld [vmem:[%s1099_s0 + $0x1a8] sm:$0xff] }
  0x36   :  { %v128_v29 = vmul.f32 %v507_v1, %v59_v19  ;;  %448 = vst [vmem:[%s1102_s3 + $0x128] sm:$0xff] %v384_v26  ;;  %v385_v30 = vsel %vm256_vm6, %v191_v12, %v321_v22  ;;  %vm257_vm7 = vcmp.ge.f32.partialorder %v192_v23, 0.0  ;;  %v322_v31 = vmul.f32 %v527_v7, %v192_v23  ;;  %v69_v12 = vld [vmem:[%s1099_s0 + $0x1b0] sm:$0xff]  ;;  %v70_v19 = vld [vmem:[%s1099_s0 + $0x1b8] sm:$0xff] }
  0x37   :  { %vm258_vm8 = vcmp.ge.f32.partialorder %v193_v24, 0.0  ;;  %449 = vst [vmem:[%s1102_s3 + $0x130] sm:$0xff] %v385_v30  ;;  %v323_v34 = vmul.f32 %v527_v7, %v193_v24  ;;  %vm259_vm9 = vcmp.ge.f32.partialorder %v194_v25, 0.0  ;;  %v324_v35 = vmul.f32 %v527_v7, %v194_v25  ;;  %v73_v26 = vld [vmem:[%s1099_s0 + $0x1d0] sm:$0xff] }
  0x38   :  { %vm260_vm10 = vcmp.ge.f32.partialorder %v195_v27, 0.0  ;;  %v386_v36 = vsel %vm257_vm7, %v192_v23, %v322_v31  ;;  %v325_v37 = vmul.f32 %v527_v7, %v195_v27  ;;  %v196_v38 = vadd.f32 %v512_v2, %v127_v28 }
  0x39   :  { %v197_v39 = vadd.f32 %v512_v2, %v128_v29  ;;  %450 = vst [vmem:[%s1102_s3 + $0x138] sm:$0xff] %v386_v36  ;;  %v387_v41 = vsel %vm258_vm8, %v193_v24, %v323_v34  ;;  %v388_v42 = vsel %vm259_vm9, %v194_v25, %v324_v35  ;;  %v129_v43 = vmul.f32 %v507_v1, %v60_v32  ;;  %v71_v24 = vld [vmem:[%s1099_s0 + $0x1c0] sm:$0xff]  ;;  %v72_v25 = vld [vmem:[%s1099_s0 + $0x1c8] sm:$0xff] }
  0x3a   :  { %v130_v44 = vmul.f32 %v507_v1, %v61_v33  ;;  %451 = vst [vmem:[%s1102_s3 + $0x140] sm:$0xff] %v387_v41  ;;  %452 = vst [vmem:[%s1102_s3 + $0x148] sm:$0xff] %v388_v42  ;;  %v389_v48 = vsel %vm260_vm10, %v195_v27, %v325_v37  ;;  %vm261_vm11 = vcmp.ge.f32.partialorder %v196_v38, 0.0  ;;  %v326_v49 = vmul.f32 %v527_v7, %v196_v38  ;;  %v74_v37 = vld [vmem:[%s1099_s0 + $0x1d8] sm:$0xff] }
  0x3b   :  { %vm262_vm12 = vcmp.ge.f32.partialorder %v197_v39, 0.0  ;;  %453 = vst [vmem:[%s1102_s3 + $0x150] sm:$0xff] %v389_v48  ;;  %v327_v50 = vmul.f32 %v527_v7, %v197_v39  ;;  %v198_v51 = vadd.f32 %v512_v2, %v129_v43  ;;  %v131_v53 = vmul.f32 %v507_v1, %v62_v40 }
  0x3c   :  { %v199_v52 = vadd.f32 %v512_v2, %v130_v44  ;;  %v390_v54 = vsel %vm261_vm11, %v196_v38, %v326_v49  ;;  %v132_v55 = vmul.f32 %v507_v1, %v63_v45  ;;  %v133_v56 = vmul.f32 %v507_v1, %v64_v46  ;;  %v75_v38 = vld [vmem:[%s1099_s0 + $0x1e0] sm:$0xff] }
  0x3d   :  { %v134_v57 = vmul.f32 %v507_v1, %v65_v47  ;;  %454 = vst [vmem:[%s1102_s3 + $0x158] sm:$0xff] %v390_v54  ;;  %v391_v60 = vsel %vm262_vm12, %v197_v39, %v327_v50  ;;  %vm263_vm13 = vcmp.ge.f32.partialorder %v198_v51, 0.0  ;;  %v328_v61 = vmul.f32 %v527_v7, %v198_v51 }
  0x3e   :  { %vm264_vm14 = vcmp.ge.f32.partialorder %v199_v52, 0.0  ;;  %455 = vst [vmem:[%s1102_s3 + $0x160] sm:$0xff] %v391_v60  ;;  %v329_v62 = vmul.f32 %v527_v7, %v199_v52  ;;  %v200_v63 = vadd.f32 %v512_v2, %v131_v53  ;;  %v201_v0 = vadd.f32 %v512_v2, %v132_v55 }
  0x3f   :  { %v202_v3 = vadd.f32 %v512_v2, %v133_v56  ;;  %v392_v4 = vsel %vm263_vm13, %v198_v51, %v328_v61  ;;  %v203_v5 = vadd.f32 %v512_v2, %v134_v57  ;;  %v135_v6 = vmul.f32 %v507_v1, %v66_v58  ;;  %v76_v51 = vld [vmem:[%s1099_s0 + $0x1e8] sm:$0xff] }
  0x40   :  { %v136_v8 = vmul.f32 %v507_v1, %v67_v59  ;;  %456 = vst [vmem:[%s1102_s3 + $0x168] sm:$0xff] %v392_v4  ;;  %v393_v9 = vsel %vm264_vm14, %v199_v52, %v329_v62  ;;  %vm265_vm15 = vcmp.ge.f32.partialorder %v200_v63, 0.0  ;;  %v330_v10 = vmul.f32 %v527_v7, %v200_v63  ;;  %v77_v52 = vld [vmem:[%s1099_s0 + $0x1f0] sm:$0xff]  ;;  %v78_v59 = vld [vmem:[%s1099_s0 + $0x1f8] sm:$0xff] }
  0x41   :  { %vm266_vm0 = vcmp.ge.f32.partialorder %v201_v0, 0.0  ;;  %457 = vst [vmem:[%s1102_s3 + $0x170] sm:$0xff] %v393_v9  ;;  %v331_v13 = vmul.f32 %v527_v7, %v201_v0  ;;  %vm267_vm1 = vcmp.ge.f32.partialorder %v202_v3, 0.0  ;;  %v332_v14 = vmul.f32 %v527_v7, %v202_v3 }
  0x42   :  { %vm268_vm2 = vcmp.ge.f32.partialorder %v203_v5, 0.0  ;;  %v394_v15 = vsel %vm265_vm15, %v200_v63, %v330_v10  ;;  %v333_v16 = vmul.f32 %v527_v7, %v203_v5  ;;  %v204_v17 = vadd.f32 %v512_v2, %v135_v6 }
  0x43   :  { %v205_v18 = vadd.f32 %v512_v2, %v136_v8  ;;  %458 = vst [vmem:[%s1102_s3 + $0x178] sm:$0xff] %v394_v15  ;;  %v395_v20 = vsel %vm266_vm0, %v201_v0, %v331_v13  ;;  %v396_v21 = vsel %vm267_vm1, %v202_v3, %v332_v14  ;;  %v137_v22 = vmul.f32 %v507_v1, %v68_v11 }
  0x44   :  { %v138_v23 = vmul.f32 %v507_v1, %v69_v12  ;;  %459 = vst [vmem:[%s1102_s3 + $0x180] sm:$0xff] %v395_v20  ;;  %460 = vst [vmem:[%s1102_s3 + $0x188] sm:$0xff] %v396_v21  ;;  %v397_v27 = vsel %vm268_vm2, %v203_v5, %v333_v16  ;;  %vm269_vm3 = vcmp.ge.f32.partialorder %v204_v17, 0.0  ;;  %v334_v28 = vmul.f32 %v527_v7, %v204_v17 }
  0x45   :  { %vm270_vm4 = vcmp.ge.f32.partialorder %v205_v18, 0.0  ;;  %461 = vst [vmem:[%s1102_s3 + $0x190] sm:$0xff] %v397_v27  ;;  %v335_v29 = vmul.f32 %v527_v7, %v205_v18  ;;  %v206_v30 = vadd.f32 %v512_v2, %v137_v22  ;;  %v139_v32 = vmul.f32 %v507_v1, %v70_v19 }
  0x46   :  { %v207_v31 = vadd.f32 %v512_v2, %v138_v23  ;;  %v398_v33 = vsel %vm269_vm3, %v204_v17, %v334_v28  ;;  %v140_v34 = vmul.f32 %v507_v1, %v71_v24  ;;  %v141_v35 = vmul.f32 %v507_v1, %v72_v25 }
  0x47   :  { %v142_v36 = vmul.f32 %v507_v1, %v73_v26  ;;  %462 = vst [vmem:[%s1102_s3 + $0x198] sm:$0xff] %v398_v33  ;;  %v399_v39 = vsel %vm270_vm4, %v205_v18, %v335_v29  ;;  %vm271_vm5 = vcmp.ge.f32.partialorder %v206_v30, 0.0  ;;  %v336_v40 = vmul.f32 %v527_v7, %v206_v30 }
  0x48   :  { %vm272_vm6 = vcmp.ge.f32.partialorder %v207_v31, 0.0  ;;  %463 = vst [vmem:[%s1102_s3 + $0x1a0] sm:$0xff] %v399_v39  ;;  %v337_v41 = vmul.f32 %v527_v7, %v207_v31  ;;  %v208_v42 = vadd.f32 %v512_v2, %v139_v32  ;;  %v209_v43 = vadd.f32 %v512_v2, %v140_v34 }
  0x49   :  { %v210_v44 = vadd.f32 %v512_v2, %v141_v35  ;;  %v400_v45 = vsel %vm271_vm5, %v206_v30, %v336_v40  ;;  %v211_v46 = vadd.f32 %v512_v2, %v142_v36  ;;  %v143_v47 = vmul.f32 %v507_v1, %v74_v37 }
  0x4a   :  { %v144_v48 = vmul.f32 %v507_v1, %v75_v38  ;;  %464 = vst [vmem:[%s1102_s3 + $0x1a8] sm:$0xff] %v400_v45  ;;  %v401_v49 = vsel %vm272_vm6, %v207_v31, %v337_v41  ;;  %vm273_vm7 = vcmp.ge.f32.partialorder %v208_v42, 0.0  ;;  %v338_v50 = vmul.f32 %v527_v7, %v208_v42 }
  0x4b   :  { %vm274_vm8 = vcmp.ge.f32.partialorder %v209_v43, 0.0  ;;  %465 = vst [vmem:[%s1102_s3 + $0x1b0] sm:$0xff] %v401_v49  ;;  %v339_v53 = vmul.f32 %v527_v7, %v209_v43  ;;  %vm275_vm9 = vcmp.ge.f32.partialorder %v210_v44, 0.0  ;;  %v340_v54 = vmul.f32 %v527_v7, %v210_v44 }
  0x4c   :  { %vm276_vm10 = vcmp.ge.f32.partialorder %v211_v46, 0.0  ;;  %v402_v55 = vsel %vm273_vm7, %v208_v42, %v338_v50  ;;  %v341_v56 = vmul.f32 %v527_v7, %v211_v46  ;;  %v212_v57 = vadd.f32 %v512_v2, %v143_v47 }
  0x4d   :  { %v213_v58 = vadd.f32 %v512_v2, %v144_v48  ;;  %466 = vst [vmem:[%s1102_s3 + $0x1b8] sm:$0xff] %v402_v55  ;;  %v403_v60 = vsel %vm274_vm8, %v209_v43, %v339_v53  ;;  %v404_v61 = vsel %vm275_vm9, %v210_v44, %v340_v54  ;;  %v145_v62 = vmul.f32 %v507_v1, %v76_v51 }
  0x4e   :  { %v146_v63 = vmul.f32 %v507_v1, %v77_v52  ;;  %467 = vst [vmem:[%s1102_s3 + $0x1c0] sm:$0xff] %v403_v60  ;;  %468 = vst [vmem:[%s1102_s3 + $0x1c8] sm:$0xff] %v404_v61  ;;  %v405_v0 = vsel %vm276_vm10, %v211_v46, %v341_v56  ;;  %vm277_vm11 = vcmp.ge.f32.partialorder %v212_v57, 0.0  ;;  %v342_v3 = vmul.f32 %v527_v7, %v212_v57 }
  0x4f   :  { %vm278_vm12 = vcmp.ge.f32.partialorder %v213_v58, 0.0  ;;  %469 = vst [vmem:[%s1102_s3 + $0x1d0] sm:$0xff] %v405_v0  ;;  %v343_v4 = vmul.f32 %v527_v7, %v213_v58  ;;  %v214_v5 = vadd.f32 %v512_v2, %v145_v62  ;;  %v147_v8 = vmul.f32 %v507_v1, %v78_v59 }
  0x50   :  { %v215_v6 = vadd.f32 %v512_v2, %v146_v63  ;;  %v406_v9 = vsel %vm277_vm11, %v212_v57, %v342_v3 }
  0x51   :  { %470 = vst [vmem:[%s1102_s3 + $0x1d8] sm:$0xff] %v406_v9  ;;  %v407_v10 = vsel %vm278_vm12, %v213_v58, %v343_v4  ;;  %vm279_vm13 = vcmp.ge.f32.partialorder %v214_v5, 0.0  ;;  %v344_v11 = vmul.f32 %v527_v7, %v214_v5  ;;  %v216_v13 = vadd.f32 %v512_v2, %v147_v8 }
  0x52   :  { %vm280_vm14 = vcmp.ge.f32.partialorder %v215_v6, 0.0  ;;  %471 = vst [vmem:[%s1102_s3 + $0x1e0] sm:$0xff] %v407_v10  ;;  %v345_v12 = vmul.f32 %v527_v7, %v215_v6 }
  0x53   :  { %v408_v14 = vsel %vm279_vm13, %v214_v5, %v344_v11  ;;  %vm281_vm15 = vcmp.ge.f32.partialorder %v216_v13, 0.0  ;;  %v346_v15 = vmul.f32 %v527_v7, %v216_v13 }
  0x54   :  { %472 = vst [vmem:[%s1102_s3 + $0x1e8] sm:$0xff] %v408_v14  ;;  %v409_v1 = vsel %vm280_vm14, %v215_v6, %v345_v12 }
  0x55   :  { %473 = vst [vmem:[%s1102_s3 + $0x1f0] sm:$0xff] %v409_v1  ;;  %v410_v16 = vsel %vm281_vm15, %v216_v13, %v346_v15 }
  0x56   :  { %474 = vst [vmem:[%s1102_s3 + $0x1f8] sm:$0xff] %v410_v16 }

// kernel: res_block_forward.6
= control target key start
LH: loop header
LB: loop body
LE: loop exit
PB: predicated region body
PF: predicated region fallthrough
CT: control target
= control target key end

     0   :  { %s1547_s18 = smov 0   ;;  %s1549_s19 = smov 0   ;;  %s1705_s0 = inlined_call_operand.vmem [shape: f32[2,18,18,4], index: 0, kind: input, shape index: {}, may-alias: {0,1,2}]   ;;  %s1706_s1 = inlined_call_operand.vmem [shape: f32[2,18,18,4], index: 1, kind: input, shape index: {}, may-alias: {0,1,2}]   ;;  %s1707_s2 = inlined_call_operand.vmem [shape: f32[2,18,18,4], index: 2, kind: input, shape index: {}, may-alias: {0,1,2}]   ;;  %s1708_s3 = inlined_call_operand.vmem [shape: f32[9,4,128], index: 3, kind: input, shape index: {}]   ;;  %s1709_s4 = inlined_call_operand.vmem [shape: f32[1,128], index: 4, kind: input, shape index: {}]   ;;  %s1710_s5 = inlined_call_operand.vmem [shape: f32[2,16,16,128], index: 5, kind: output, shape index: {}]  }
   0x1   :  { %s1551_s20 = smov 0   ;;  %s1553_s21 = smov 0  }
   0x2   :  { %s1555_s22 = smov 0  }
   0x3 LB: > { %s24_s23 = sadd.s32 1, %s1507_s20  ;;  %s27_s24 = sadd.s32 1, %s1511_s21  ;;  %s1515_s22 = sphi %s1555_s22, %s15_s22   ;;  %s1511_s21 = sphi %s1553_s21, %s1715_s21   ;;  %s1507_s20 = sphi %s1551_s20, %s1714_s20   ;;  %s1503_s19 = sphi %s1549_s19, %s1713_s19   ;;  %s1499_s18 = sphi %s1547_s18, %s1712_s18  }
   0x4   : > { %p25_p0 = scmp.ge.s32.totalorder %s24_s23, 16  ;;  %p1316_p1 = scmp.ge.s32.totalorder %s1515_s22, 1 }
   0x5   : > { %p247_p2 = scmp.lt.s32.totalorder %s1515_s22, 33 }
   0x6   : > { %s1717_s23 = smov (%p25_p0, %s24_s23), 0  ;;  %s1719_s24 = smov (!%p25_p0, %s27_s24), %s1511_s21 }
   0x7   : > { %p248_p3 = pnand %p1316_p1, %p247_p2  ;;  %p29_p4 = scmp.ge.s32.totalorder %s1719_s24, 2 }
   0x8   : > { %p303_p5 = scmp.lt.s32.totalorder (!%p248_p3), %s1503_s19, 1  ;;  %p305_p6 = scmp.lt.s32.totalorder (!%p248_p3), %s1499_s18, 17 }
   0x9   : > { %s1721_s24 = smov (%p29_p4, %s1719_s24), 0  ;;  %251 = sbr.rel (%p248_p3) target bundleno = 243 (0xf3), region = 40 }
   0xa   : > { %s312_s10 = sadd.s32 (!%p248_p3), 1, %s1499_s18  ;;  %s323_s12 = sadd.s32 (!%p248_p3), 2, %s1499_s18 }
   0xb   : > { %p315_p7 = scmp.lt.s32.totalorder (!%p248_p3), %s312_s10, 17  ;;  %p1607_p8 = scmp.lt.s32.totalorder (!%p248_p3), %s323_s12, 17 }
   0xc   : > { %p336_p9 = scmp.lt.s32.totalorder (!%p248_p3), %s1499_s18, 15 }
   0xe   : > { %v1323_v0 = vld [vmem:[%s1708_s3 + $0x4] sm:$0xf]  ;;  %vm369_vm0 = vcmask 1043456   ;;  %v352_v1 = vld [vmem:[%s1708_s3] sm:$0xf]  ;;  %s1723_s19 = smov (!%p303_p5, %s1503_s19), 1 }
   0xf   : > { %1388 = vmatprep.subr.msk.mxu0 %vm369_vm0, %v1323_v0  ;;  %1393 = vmatprep.subr.msk.mxu1 %vm369_vm0, %v352_v1  ;;  %v1330_v2 = vld [vmem:[%s1708_s3 + $0x8] sm:$0xf]  ;;  %v1334_v3 = vld [vmem:[%s1708_s3 + $0xc] sm:$0xf]  ;;  %s306_s8 = scalar_select %p305_p6, %s1499_s18, 17  ;;  %vm364_vm1 = vcmask 31744  }
  0x10   : > { %1389 = vmatpush3.msk.msra.mxu0 %vm369_vm0, %v1323_v0  ;;  %1394 = vmatpush3.msk.msra.mxu1 %vm369_vm0, %v352_v1  ;;  %s1602_s9 = smul.u32 54, %s1723_s19  ;;  %vm358_vm2 = vcmask 1046528   ;;  %vm532_vm3 = vcmask 1045504   ;;  %s1725_s10 = smov (!%p315_p7, %s312_s10), 17  ;;  %v1342_v10 = vld [vmem:[%s1708_s3 + $0x14] sm:$0xf] }
  0x11   : > { %1398 = vmatprep.subr.msk.mxu0 %vm369_vm0, %v1330_v2  ;;  %1403 = vmatprep.subr.msk.mxu1 %vm369_vm0, %v1334_v3  ;;  %s1433_s11 = smul.u32 3, %s306_s8  ;;  %s1727_s12 = smov (!%p1607_p8, %s323_s12), 17  ;;  %v1338_v17 = vld [vmem:[%s1708_s3 + $0x10] sm:$0xf]  ;;  %v1346_v19 = vld [vmem:[%s1708_s3 + $0x18] sm:$0xf] }
  0x12   : > { %s1435_s28 = smul.u32 3, %s1725_s10  ;;  %v1350_v41 = vld [vmem:[%s1708_s3 + $0x1c] sm:$0xf]  ;;  %v1354_v43 = vld [vmem:[%s1708_s3 + $0x20] sm:$0xf]  ;;  %s1729_s18 = smov (!%p336_p9, %s1499_s18), 15 }
  0x13   : > { %s309_s13 = sadd.s32 %s1602_s9, %s1433_s11  ;;  %s1436_s29 = smul.u32 3, %s1727_s12 }
  0x14   : > { %s1317_s15 = sshll.u32 %s309_s13, 3  ;;  %s319_s30 = sadd.s32 %s1435_s28, %s1602_s9 }
  0x15   : > { %s311_s25 = scalar_lea.vmem %s1705_s0, %s1317_s15  ;;  %s1318_s8 = sshll.u32 %s319_s30, 3 }
  0x16   : > { %v343_v4 = vld [vmem:[%s311_s25] sm:$0xff]  ;;  %v344_v5 = vld [vmem:[%s311_s25 + $0x8] sm:$0xff]  ;;  %v345_v6 = vld [vmem:[%s311_s25 + $0x10] sm:$0x3]  ;;  %s330_s10 = sadd.s32 %s1436_s29, %s1602_s9  ;;  %s321_s13 = scalar_lea.vmem %s1706_s1, %s1318_s8 }
  0x17   : > { %v359_v7 = vrot.slane %v343_v4, 1  ;;  %v360_v8 = vrot.slane %v344_v5, 1  ;;  %1395 = vmatprep.mubr.msk.f32.mxu1 %vm364_vm1, %v343_v4  ;;  %v362_v9 = vrot.slane %v345_v6, 1  ;;  %v536_v11 = vrot.slane %v345_v6, 2  ;;  %s1319_s16 = sshll.u32 %s330_s10, 3  ;;  %v346_v20 = vld [vmem:[%s321_s13] sm:$0xff] }
  0x18   : > { %1396 = vmatmul.mubr.msk.f32.vlgmr.msra.gmra.mxu1 %vm364_vm1, %v344_v5  ;;  %v533_v12 = vrot.slane %v343_v4, 2  ;;  %v534_v13 = vrot.slane %v344_v5, 2  ;;  %v348_v21 = vld [vmem:[%s321_s13 + $0x10] sm:$0x3]  ;;  %v347_v22 = vld [vmem:[%s321_s13 + $0x8] sm:$0xff]  ;;  %s332_s25 = scalar_lea.vmem %s1707_s2, %s1319_s16  ;;  %v713_v23 = vrot.slane %v346_v20, 1 }
  0x19   : > { %v361_v14 = vsel %vm358_vm2, %v359_v7, %v360_v8  ;;  %v363_v15 = vsel %vm358_vm2, %v360_v8, %v362_v9  ;;  %1404 = vmatpush3.msk.msra.mxu1 %vm369_vm0, %v1334_v3  ;;  %1405 = vmatprep.mubr.msk.f32.mxu1 %vm364_vm1, %v346_v20  ;;  %v716_v24 = vrot.slane %v348_v21, 1  ;;  %v804_v25 = vrot.slane %v346_v20, 2  ;;  %v349_v27 = vld [vmem:[%s332_s25] sm:$0xff]  ;;  %v350_v28 = vld [vmem:[%s332_s25 + $0x8] sm:$0xff]  ;;  %v351_v31 = vld [vmem:[%s332_s25 + $0x10] sm:$0x3] }
  0x1a   : > { %1390 = vmatprep.mubr.msk.f32.mxu0 %vm364_vm1, %v361_v14  ;;  %v535_v16 = vsel %vm532_vm3, %v533_v12, %v534_v13  ;;  %1413 = vmatprep.subr.msk.mxu1 %vm369_vm0, %v1342_v10  ;;  %v537_v18 = vsel %vm532_vm3, %v534_v13, %v536_v11  ;;  %v807_v26 = vrot.slane %v348_v21, 2  ;;  %v714_v29 = vrot.slane %v347_v22, 1  ;;  %s1320_s30 = sshll.u32 %s1729_s18, 1  ;;  %s1321_s6 = sshll.u32 %s1723_s19, 5  ;;  %v1358_v14 = vld [vmem:[%s1709_s4] ss:$0 sm:$0xff] }
  0x1b   : > { %1391 = vmatmul.mubr.msk.f32.vlgmr.msra.gmra.mxu0 %vm364_vm1, %v363_v15  ;;  %v805_v30 = vrot.slane %v347_v22, 2  ;;  %v984_v32 = vrot.slane %v349_v27, 1  ;;  %v987_v33 = vrot.slane %v351_v31, 1  ;;  %v1075_v34 = vrot.slane %v349_v27, 2  ;;  %s340_s7 = sadd.s32 %s1321_s6, %s1320_s30 }
  0x1c   : > { %1399 = vmatpush3.msk.msra.mxu0 %vm369_vm0, %v1330_v2  ;;  %1400 = vmatprep.mubr.msk.f32.mxu0 %vm364_vm1, %v535_v16  ;;  %v985_v35 = vrot.slane %v350_v28, 1  ;;  %v1076_v36 = vrot.slane %v350_v28, 2  ;;  %v715_v37 = vsel %vm358_vm2, %v713_v23, %v714_v29  ;;  %v717_v39 = vsel %vm358_vm2, %v714_v29, %v716_v24  ;;  %s1322_s8 = sshll.u32 %s340_s7, 3 }
  0x1d   : > { %1408 = vmatprep.subr.msk.mxu0 %vm369_vm0, %v1338_v17  ;;  %1406 = vmatmul.mubr.msk.f32.vlgmr.msra.gmra.mxu1 %vm364_vm1, %v347_v22  ;;  %v806_v38 = vsel %vm532_vm3, %v804_v25, %v805_v30  ;;  %v808_v40 = vsel %vm532_vm3, %v805_v30, %v807_v26  ;;  %v1078_v44 = vrot.slane %v351_v31, 2  ;;  %s342_s12 = scalar_lea.vmem %s1710_s5, %s1322_s8 }
  0x1e   : > { %1414 = vmatpush3.msk.msra.mxu1 %vm369_vm0, %v1342_v10  ;;  %1415 = vmatprep.mubr.msk.f32.mxu1 %vm364_vm1, %v806_v38  ;;  %v986_v42 = vsel %vm358_vm2, %v984_v32, %v985_v35  ;;  %v988_v45 = vsel %vm358_vm2, %v985_v35, %v987_v33  ;;  %v1077_v46 = vsel %vm532_vm3, %v1075_v34, %v1076_v36 }
  0x1f   : > { %1401 = vmatmul.mubr.msk.f32.vlgmr.msra.gmra.mxu0 %vm364_vm1, %v537_v18  ;;  %1423 = vmatprep.subr.msk.mxu1 %vm369_vm0, %v1350_v41  ;;  %v1079_v47 = vsel %vm532_vm3, %v1076_v36, %v1078_v44 }
  0x20   : > { %1409 = vmatpush3.msk.msra.mxu0 %vm369_vm0, %v1338_v17  ;;  %1410 = vmatprep.mubr.msk.f32.mxu0 %vm364_vm1, %v715_v37 }
  0x21   : > { %1418 = vmatprep.subr.msk.mxu0 %vm369_vm0, %v1346_v19  ;;  %1416 = vmatmul.mubr.msk.f32.vlgmr.msra.gmra.mxu1 %vm364_vm1, %v808_v40 }
  0x22   : > { %1424 = vmatpush3.msk.msra.mxu1 %vm369_vm0, %v1350_v41  ;;  %1425 = vmatprep.mubr.msk.f32.mxu1 %vm364_vm1, %v986_v42 }
  0x23   : > { %1411 = vmatmul.mubr.msk.f32.vlgmr.msra.gmra.mxu0 %vm364_vm1, %v717_v39 }
  0x24   : > { %1419 = vmatpush3.msk.msra.mxu0 %vm369_vm0, %v1346_v19  ;;  %1420 = vmatprep.mubr.msk.f32.mxu0 %vm364_vm1, %v349_v27 }
  0x25   : > { %1428 = vmatprep.subr.msk.mxu0 %vm369_vm0, %v1354_v43  ;;  %1426 = vmatmul.mubr.msk.f32.vlgmr.msra.gmra.mxu1 %vm364_vm1, %v988_v45 }
  0x27   : > { %1421 = vmatmul.mubr.msk.f32.vlgmr.msra.gmra.mxu0 %vm364_vm1, %v350_v28 }
  0x28   : > { %1429 = vmatpush3.msk.msra.mxu0 %vm369_vm0, %v1354_v43  ;;  %1430 = vmatprep.mubr.msk.f32.mxu0 %vm364_vm1, %v1077_v46 }
  0x2b   : > { %1431 = vmatmul.mubr.msk.f32.vlgmr.msra.gmra.mxu0 %vm364_vm1, %v1079_v47 }
  0xd8   : > { %v1397_v48 = vpop.f32.mrf.mxu1 }
  0xda   : > { %v521_v50 = vpop.f32.mrf.mxu1 }
  0xdb   : > { %v1392_v49 = vpop.f32.mrf.mxu0 }
  0xdc   : > { %v527_v52 = vadd.f32 %v1397_v48, %v1392_v49 }
  0xdd   : > { %v439_v51 = vpop.f32.mrf.mxu0  ;;  %v1407_v54 = vpop.f32.mrf.mxu1 }
  0xde   : > { %v522_v55 = vadd.f32 %v521_v50, %v439_v51 }
  0xdf   : > { %v1402_v53 = vpop.f32.mrf.mxu0  ;;  %v699_v58 = vpop.f32.mrf.mxu1 }
  0xe0   : > { %v621_v56 = vadd.f32 %v1402_v53, %v527_v52 }
  0xe1   : > { %v611_v57 = vpop.f32.mrf.mxu0  ;;  %v1417_v62 = vpop.f32.mrf.mxu1 }
  0xe2   : > { %v709_v59 = vadd.f32 %v1407_v54, %v621_v56  ;;  %v620_v60 = vadd.f32 %v611_v57, %v522_v55 }
  0xe3   : > { %v1412_v61 = vpop.f32.mrf.mxu0  ;;  %v882_v2 = vpop.f32.mrf.mxu1 }
  0xe4   : > { %v708_v63 = vadd.f32 %v699_v58, %v620_v60  ;;  %v801_v0 = vadd.f32 %v1412_v61, %v709_v59 }
  0xe5   : > { %v791_v1 = vpop.f32.mrf.mxu0  ;;  %v1427_v6 = vpop.f32.mrf.mxu1 }
  0xe6   : > { %v892_v3 = vadd.f32 %v1417_v62, %v801_v0  ;;  %v800_v4 = vadd.f32 %v791_v1, %v708_v63 }
  0xe7   : > { %v1422_v5 = vpop.f32.mrf.mxu0  ;;  %v1062_v12 = vpop.f32.mrf.mxu1 }
  0xe8   : > { %v891_v7 = vadd.f32 %v882_v2, %v800_v4  ;;  %v980_v8 = vadd.f32 %v1422_v5, %v892_v3 }
  0xe9   : > { %v970_v9 = vpop.f32.mrf.mxu0 }
  0xea   : > { %v1072_v10 = vadd.f32 %v1427_v6, %v980_v8  ;;  %v979_v11 = vadd.f32 %v970_v9, %v891_v7 }
  0xeb   : > { %v1432_v13 = vpop.f32.mrf.mxu0 }
  0xec   : > { %v1071_v15 = vadd.f32 %v1062_v12, %v979_v11  ;;  %v1163_v16 = vadd.f32 %v1432_v13, %v1072_v10 }
  0xed   : > { %v1153_v17 = vpop.f32.mrf.mxu0 }
  0xee   : > { %v1172_v18 = vadd.f32 %v1358_v14, %v1163_v16  ;;  %v1162_v19 = vadd.f32 %v1153_v17, %v1071_v15 }
  0xf0   : > { %1174 = vst [vmem:[%s342_s12 + $0x8] sm:$0xff] %v1172_v18  ;;  %v1171_v20 = vadd.f32 %v1358_v14, %v1162_v19 }
  0xf2   : > { %1173 = vst [vmem:[%s342_s12] sm:$0xff] %v1171_v20 }
  0xf3 PF: > { %s15_s22 = sadd.s32 1, %s1515_s22   ;;  %s1712_s18 = smov %s1507_s20 }
  0xf4   : > { %p12_p10 = scmp.ge.s32.totalorder %s15_s22, 34   ;;  %s1713_s19 = smov %s1511_s21 }
  0xf5   : > { %s1714_s20 = smov %s1717_s23  ;;  %s1715_s21 = smov %s1721_s24 }
  0xf6   :  { %14 = sbr.rel (!%p12_p10) target bundleno = 3 (0x3), region = 84 }

// kernel: res_block_forward.9
= control target key start
LH: loop header
LB: loop body
LE: loop exit
PB: predicated region body
PF: predicated region fallthrough
CT: control target
= control target key end

     0   :  { %s3409_s13 = smov 0   ;;  %s3411_s14 = smov 0   ;;  %s4190_s0 = inlined_call_operand.vmem [shape: f32[2,18,18,128], index: 0, kind: input, shape index: {}, may-alias: {0,1,2}]   ;;  %s4191_s1 = inlined_call_operand.vmem [shape: f32[2,18,18,128], index: 1, kind: input, shape index: {}, may-alias: {0,1,2}]   ;;  %s4192_s2 = inlined_call_operand.vmem [shape: f32[2,18,18,128], index: 2, kind: input, shape index: {}, may-alias: {0,1,2}]   ;;  %s4193_s3 = inlined_call_operand.vmem [shape: f32[9,128,128], index: 3, kind: input, shape index: {}]   ;;  %s4194_s4 = inlined_call_operand.vmem [shape: f32[1,128], index: 4, kind: input, shape index: {}]   ;;  %s4195_s5 = inlined_call_operand.vmem [shape: f32[2,18,18,4], index: 5, kind: input, shape index: {}, may-alias: {5,6,7}]   ;;  %s4196_s6 = inlined_call_operand.vmem [shape: f32[2,18,18,4], index: 6, kind: input, shape index: {}, may-alias: {5,6,7}]   ;;  %s4197_s7 = inlined_call_operand.vmem [shape: f32[2,18,18,4], index: 7, kind: input, shape index: {}, may-alias: {5,6,7}]   ;;  %s4198_s8 = inlined_call_operand.vmem [shape: f32[9,4,128], index: 8, kind: input, shape index: {}]   ;;  %s4199_s9 = inlined_call_operand.vmem [shape: f32[1,128], index: 9, kind: input, shape index: {}]   ;;  %s4200_s10 = inlined_call_operand.vmem [shape: f32[2,16,16,128], index: 10, kind: output, shape index: {}]  }
   0x1   :  { %4202 = sst [smem:[#allocation3_spill]] %s4190_s0  ;;  %s3413_s15 = smov 0  }
   0x2   :  { %s3415_s16 = smov 0   ;;  %s3417_s17 = smov 0  }
   0x3 LB: > { %s29_s18 = sadd.s32 1, %s3344_s15  ;;  %s32_s19 = sadd.s32 1, %s3348_s16  ;;  %s3352_s17 = sphi %s3417_s17, %s20_s17   ;;  %s3348_s16 = sphi %s3415_s16, %s4212_s16   ;;  %s3344_s15 = sphi %s3413_s15, %s4211_s15   ;;  %s3340_s14 = sphi %s3411_s14, %s4210_s14   ;;  %s3336_s13 = sphi %s3409_s13, %s4209_s13  }
   0x4   : > { %p30_p0 = scmp.ge.s32.totalorder %s29_s18, 16  ;;  %p2544_p1 = scmp.ge.s32.totalorder %s3352_s17, 1 }
   0x5   : > { %p428_p2 = scmp.lt.s32.totalorder %s3352_s17, 33 }
   0x6   : > { %s4214_s18 = smov (%p30_p0, %s29_s18), 0  ;;  %s4216_s19 = smov (!%p30_p0, %s32_s19), %s3348_s16 }
   0x7   : > { %p429_p3 = pnand %p2544_p1, %p428_p2  ;;  %p34_p4 = scmp.ge.s32.totalorder %s4216_s19, 2 }
   0x8   : > { %p523_p5 = scmp.lt.s32.totalorder (!%p429_p3), %s3340_s14, 1  ;;  %p525_p6 = scmp.lt.s32.totalorder (!%p429_p3), %s3336_s13, 17 }
   0x9   : > { %s4218_s19 = smov (%p34_p4, %s4216_s19), 0  ;;  %432 = sbr.rel (%p429_p3) target bundleno = 402 (0x192), region = 60 }
   0xa   : > { %4203 = sst [smem:[#allocation2_spill]] %s4218_s19  ;;  %p587_p9 = scmp.lt.s32.totalorder (!%p429_p3), %s3336_s13, 15 }
   0xb   : > { %s4204_s0 = sld [smem:[#allocation3_spill]] (!%p429_p3) }
   0xe   : > { %v2569_v0 = vld [vmem:[%s4193_s3 + $0xf8] sm:$0xff]  ;;  %v2568_v2 = vld [vmem:[%s4193_s3 + $0xf0] sm:$0xff]  ;;  %v2567_v4 = vld [vmem:[%s4193_s3 + $0xe8] sm:$0xff]  ;;  %s4220_s14 = smov (!%p523_p5, %s3340_s14), 1  ;;  %vm639_vm0 = vcmask 1046528   ;;  %vm814_vm1 = vcmask 1045504  }
   0xf   : > { %v618_v1 = vld [vmem:[%s4193_s3 + $0x78] sm:$0xff]  ;;  %2910 = vmatprep.subr.mxu0 %v2569_v0  ;;  %v617_v3 = vld [vmem:[%s4193_s3 + $0x70] sm:$0xff]  ;;  %v616_v5 = vld [vmem:[%s4193_s3 + $0x68] sm:$0xff]  ;;  %s526_s23 = scalar_select %p525_p6, %s3336_s13, 17  ;;  %vm1523_vm2 = vcmask 1043456   ;;  %vm1516_vm3 = vcmask 31744  }
  0x10   : > { %2945 = vmatprep.subr.mxu1 %v618_v1  ;;  %2911 = vmatpush3.msra.mxu0 %v2569_v0  ;;  %v2566_v6 = vld [vmem:[%s4193_s3 + $0xe0] sm:$0xff]  ;;  %v2565_v8 = vld [vmem:[%s4193_s3 + $0xd8] sm:$0xff]  ;;  %v2564_v10 = vld [vmem:[%s4193_s3 + $0xd0] sm:$0xff]  ;;  %s3490_s12 = smul.u32 54, %s4220_s14 }
  0x11   : > { %2946 = vmatpush3.msra.mxu1 %v618_v1  ;;  %2912 = vmatprep.subr.mxu0 %v2568_v2  ;;  %v615_v7 = vld [vmem:[%s4193_s3 + $0x60] sm:$0xff]  ;;  %v614_v9 = vld [vmem:[%s4193_s3 + $0x58] sm:$0xff]  ;;  %v613_v11 = vld [vmem:[%s4193_s3 + $0x50] sm:$0xff]  ;;  %s3270_s20 = smul.u32 3, %s526_s23  ;;  %s543_s23 = sadd.s32 2, %s3336_s13 }
  0x12   : > { %2947 = vmatprep.subr.mxu1 %v617_v3  ;;  %2913 = vmatpush3.msra.mxu0 %v2568_v2  ;;  %v2563_v12 = vld [vmem:[%s4193_s3 + $0xc8] sm:$0xff]  ;;  %v2562_v14 = vld [vmem:[%s4193_s3 + $0xc0] sm:$0xff]  ;;  %v2561_v16 = vld [vmem:[%s4193_s3 + $0xb8] sm:$0xff]  ;;  %p3548_p7 = scmp.lt.s32.totalorder %s543_s23, 17 }
  0x13   : > { %2948 = vmatpush3.msra.mxu1 %v617_v3  ;;  %2914 = vmatprep.subr.mxu0 %v2567_v4  ;;  %v612_v13 = vld [vmem:[%s4193_s3 + $0x48] sm:$0xff]  ;;  %v611_v15 = vld [vmem:[%s4193_s3 + $0x40] sm:$0xff]  ;;  %s3505_s29 = sadd.s32 %s3490_s12, %s3270_s20  ;;  %v610_v17 = vld [vmem:[%s4193_s3 + $0x38] sm:$0xff] }
  0x14   : > { %2949 = vmatprep.subr.mxu1 %v616_v5  ;;  %2915 = vmatpush3.msra.mxu0 %v2567_v4  ;;  %v2560_v18 = vld [vmem:[%s4193_s3 + $0xb0] sm:$0xff]  ;;  %s4201_s27 = sshll.u32 %s3505_s29, 3  ;;  %v2559_v20 = vld [vmem:[%s4193_s3 + $0xa8] sm:$0xff]  ;;  %v2558_v22 = vld [vmem:[%s4193_s3 + $0xa0] sm:$0xff]  ;;  %s4222_s23 = smov (!%p3548_p7, %s543_s23), 17 }
  0x15   : > { %2950 = vmatpush3.msra.mxu1 %v616_v5  ;;  %2916 = vmatprep.subr.mxu0 %v2566_v6  ;;  %v609_v19 = vld [vmem:[%s4193_s3 + $0x30] sm:$0xff]  ;;  %v608_v21 = vld [vmem:[%s4193_s3 + $0x28] sm:$0xff]  ;;  %s531_s24 = scalar_lea.vmem %s4204_s0, %s4201_s27  ;;  %v607_v23 = vld [vmem:[%s4193_s3 + $0x20] sm:$0xff]  ;;  %s3273_s25 = smul.u32 3, %s4222_s23 }
  0x16   : > { %2951 = vmatprep.subr.mxu1 %v615_v7  ;;  %2917 = vmatpush3.msra.mxu0 %v2566_v6  ;;  %v2557_v24 = vld [vmem:[%s4193_s3 + $0x98] sm:$0xff]  ;;  %v3544_v26 = vld [vmem:[%s531_s24] sm:$0xff]  ;;  %v3546_v27 = vld [vmem:[%s531_s24 + $0x8] sm:$0xff]  ;;  %s4207_s22 = sshll.u32 %s3505_s29, 3 }
  0x17   : > { %2952 = vmatpush3.msra.mxu1 %v615_v7  ;;  %2918 = vmatprep.subr.mxu0 %v2565_v8  ;;  %v606_v25 = vld [vmem:[%s4193_s3 + $0x18] sm:$0xff]  ;;  %v2556_v28 = vld [vmem:[%s4193_s3 + $0x90] sm:$0xff]  ;;  %v640_v31 = vrot.slane %v3544_v26, 1  ;;  %v641_v32 = vrot.slane %v3546_v27, 1  ;;  %v2555_v33 = vld [vmem:[%s4193_s3 + $0x88] sm:$0xff]  ;;  %s3602_s21 = sadd.s32 %s3273_s25, %s3490_s12  ;;  %s562_s27 = scalar_lea.vmem %s4195_s5, %s4207_s22 }
  0x18   : > { %2953 = vmatprep.subr.mxu1 %v614_v9  ;;  %2919 = vmatpush3.msra.mxu0 %v2565_v8  ;;  %v605_v29 = vld [vmem:[%s4193_s3 + $0x10] sm:$0xff]  ;;  %v604_v34 = vld [vmem:[%s4193_s3 + $0x8] sm:$0xff]  ;;  %v2554_v36 = vld [vmem:[%s4193_s3 + $0x80] sm:$0xff]  ;;  %s2547_s0 = sshll.u32 %s3602_s21, 3  ;;  %s2552_s25 = sshll.u32 %s4220_s14, 5 }
  0x19   : > { %2954 = vmatpush3.msra.mxu1 %v614_v9  ;;  %2920 = vmatprep.subr.mxu0 %v2564_v10  ;;  %v3558_v30 = vld [vmem:[%s531_s24 + $0x10] sm:$0x3]  ;;  %v603_v37 = vld [vmem:[%s4193_s3] sm:$0xff]  ;;  %v642_v38 = vsel %vm639_vm0, %v640_v31, %v641_v32  ;;  %v2585_v40 = vld [vmem:[%s4193_s3 + $0x178] sm:$0xff]  ;;  %s532_s24 = sadd.s32 1, %s3336_s13  ;;  %s552_s11 = scalar_lea.vmem %s4192_s2, %s2547_s0 }
  0x1a   : > { %2955 = vmatprep.subr.mxu1 %v613_v11  ;;  %2921 = vmatpush3.msra.mxu0 %v2564_v10  ;;  %v643_v35 = vrot.slane %v3558_v30, 1  ;;  %v2601_v41 = vld [vmem:[%s4193_s3 + $0x1f8] sm:$0xff]  ;;  %v2584_v42 = vld [vmem:[%s4193_s3 + $0x170] sm:$0xff]  ;;  %p3597_p8 = scmp.lt.s32.totalorder %s532_s24, 17  ;;  %v2583_v44 = vld [vmem:[%s4193_s3 + $0x168] sm:$0xff]  ;;  %s4226_s13 = smov (!%p587_p9, %s3336_s13), 15 }
  0x1b   : > { %2956 = vmatpush3.msra.mxu1 %v613_v11  ;;  %2922 = vmatprep.subr.mxu0 %v2563_v12  ;;  %v2600_v43 = vld [vmem:[%s4193_s3 + $0x1f0] sm:$0xff]  ;;  %v2599_v45 = vld [vmem:[%s4193_s3 + $0x1e8] sm:$0xff]  ;;  %v2582_v46 = vld [vmem:[%s4193_s3 + $0x160] sm:$0xff]  ;;  %s2551_s29 = sshll.u32 %s4226_s13, 1 }
  0x1c   : > { %2957 = vmatprep.subr.mxu1 %v612_v13  ;;  %2923 = vmatpush3.msra.mxu0 %v2563_v12  ;;  %v644_v39 = vsel %vm639_vm0, %v641_v32, %v643_v35  ;;  %v2598_v47 = vld [vmem:[%s4193_s3 + $0x1e0] sm:$0xff]  ;;  %s4224_s24 = smov (!%p3597_p8, %s532_s24), 17  ;;  %v2581_v48 = vld [vmem:[%s4193_s3 + $0x158] sm:$0xff]  ;;  %v2580_v50 = vld [vmem:[%s4193_s3 + $0x150] sm:$0xff]  ;;  %s591_s26 = sadd.s32 %s2552_s25, %s2551_s29 }
  0x1d   : > { %2958 = vmatpush3.msra.mxu1 %v612_v13  ;;  %2924 = vmatprep.subr.mxu0 %v2562_v14  ;;  %v2597_v49 = vld [vmem:[%s4193_s3 + $0x1d8] sm:$0xff]  ;;  %v2596_v51 = vld [vmem:[%s4193_s3 + $0x1d0] sm:$0xff]  ;;  %s3272_s20 = smul.u32 3, %s4224_s24  ;;  %v2579_v52 = vld [vmem:[%s4193_s3 + $0x148] sm:$0xff]  ;;  %s2553_s28 = sshll.u32 %s591_s26, 3 }
  0x1e   : > { %2959 = vmatprep.subr.mxu1 %v611_v15  ;;  %2925 = vmatpush3.msra.mxu0 %v2562_v14  ;;  %v2595_v53 = vld [vmem:[%s4193_s3 + $0x1c8] sm:$0xff]  ;;  %v3645_v54 = vld [vmem:[%s552_s11] sm:$0xff]  ;;  %v602_v55 = vld [vmem:[%s552_s11 + $0x10] sm:$0x3]  ;;  %s593_s14 = scalar_lea.vmem %s4200_s10, %s2553_s28 }
  0x1f   : > { %2960 = vmatpush3.msra.mxu1 %v611_v15  ;;  %2926 = vmatprep.subr.mxu0 %v2561_v16  ;;  %v1312_v56 = vrot.slane %v3645_v54, 1  ;;  %v1413_v57 = vrot.slane %v3645_v54, 2  ;;  %v3649_v58 = vld [vmem:[%s552_s11 + $0x8] sm:$0xff]  ;;  %v2578_v59 = vld [vmem:[%s4193_s3 + $0x140] sm:$0xff]  ;;  %v1315_v61 = vrot.slane %v602_v55, 1  ;;  %v1416_v62 = vrot.slane %v602_v55, 2  ;;  %s3660_s11 = sadd.s32 %s3272_s20, %s3490_s12  ;;  %s3715_s20 = scalar_lea.vmem %s4197_s7, %s2547_s0 }
  0x20   : > { %2961 = vmatprep.subr.mxu1 %v610_v17  ;;  %2927 = vmatpush3.msra.mxu0 %v2561_v16  ;;  %v2594_v60 = vld [vmem:[%s4193_s3 + $0x1c0] sm:$0xff]  ;;  %v1313_v63 = vrot.slane %v3649_v58, 1  ;;  %v1414_v0 = vrot.slane %v3649_v58, 2  ;;  %v2577_v1 = vld [vmem:[%s4193_s3 + $0x138] sm:$0xff]  ;;  %v2576_v6 = vld [vmem:[%s4193_s3 + $0x130] sm:$0xff]  ;;  %s2546_s22 = sshll.u32 %s3660_s11, 3 }
  0x21   : > { %2962 = vmatpush3.msra.mxu1 %v610_v17  ;;  %2928 = vmatprep.subr.mxu0 %v2560_v18  ;;  %v2593_v2 = vld [vmem:[%s4193_s3 + $0x1b8] sm:$0xff]  ;;  %v2592_v8 = vld [vmem:[%s4193_s3 + $0x1b0] sm:$0xff]  ;;  %v3692_v9 = vld [vmem:[%s562_s27] sm:$0xff]  ;;  %s572_s23 = scalar_lea.vmem %s4196_s6, %s2546_s22  ;;  %s3808_s30 = scalar_lea.vmem %s4191_s1, %s2546_s22 }
  0x22   : > { %2963 = vmatprep.subr.mxu1 %v609_v19  ;;  %2929 = vmatpush3.msra.mxu0 %v2560_v18  ;;  %v3674_v3 = vsel %vm639_vm0, %v1312_v56, %v1313_v63  ;;  %v3677_v4 = vsel %vm639_vm0, %v1313_v63, %v1315_v61  ;;  %v3680_v5 = vsel %vm814_vm1, %v1413_v57, %v1414_v0  ;;  %v1508_v10 = vld [vmem:[%s562_s27 + $0x10] sm:$0x3]  ;;  %v1607_v11 = vrot.slane %v3692_v9, 1  ;;  %v3696_v15 = vld [vmem:[%s562_s27 + $0x8] sm:$0xff]  ;;  %v3744_v35 = vld [vmem:[%s3715_s20] sm:$0xff] }
  0x23   : > { %2964 = vmatpush3.msra.mxu1 %v609_v19  ;;  %2930 = vmatprep.subr.mxu0 %v2559_v20  ;;  %v3686_v7 = vsel %vm814_vm1, %v1414_v0, %v1416_v62  ;;  %v1610_v12 = vrot.slane %v1508_v10, 1  ;;  %v1698_v13 = vrot.slane %v3692_v9, 2  ;;  %v1701_v14 = vrot.slane %v1508_v10, 2  ;;  %v2575_v16 = vld [vmem:[%s4193_s3 + $0x128] sm:$0xff]  ;;  %v2574_v19 = vld [vmem:[%s4193_s3 + $0x120] sm:$0xff] }
  0x24   : > { %2965 = vmatprep.subr.mxu1 %v608_v21  ;;  %2931 = vmatpush3.msra.mxu0 %v2559_v20  ;;  %v2591_v17 = vld [vmem:[%s4193_s3 + $0x1a8] sm:$0xff]  ;;  %v1608_v18 = vrot.slane %v3696_v15, 1  ;;  %v1699_v20 = vrot.slane %v3696_v15, 2  ;;  %v818_v61 = vrot.slane %v3558_v30, 2  ;;  %v3823_v10 = vld [vmem:[%s3808_s30] sm:$0xff] }
  0x25   : > { %2966 = vmatpush3.msra.mxu1 %v608_v21  ;;  %2932 = vmatprep.subr.mxu0 %v2558_v22  ;;  %v2590_v21 = vld [vmem:[%s4193_s3 + $0x1a0] sm:$0xff]  ;;  %v2571_v57 = vld [vmem:[%s4193_s3 + $0x108] sm:$0xff] }
  0x26   : > { %2967 = vmatprep.subr.mxu1 %v607_v23  ;;  %2933 = vmatpush3.msra.mxu0 %v2558_v22  ;;  %v815_v22 = vrot.slane %v3544_v26, 2  ;;  %v3735_v31 = vsel %vm814_vm1, %v1698_v13, %v1699_v20  ;;  %v3738_v32 = vsel %vm814_vm1, %v1699_v20, %v1701_v14  ;;  %v2615_v13 = vld [vmem:[%s4193_s3 + $0x268] sm:$0xff]  ;;  %v2632_v14 = vld [vmem:[%s4193_s3 + $0x2f0] sm:$0xff] }
  0x27   : > { %2968 = vmatpush3.msra.mxu1 %v607_v23  ;;  %2934 = vmatprep.subr.mxu0 %v2557_v24  ;;  %v816_v23 = vrot.slane %v3546_v27, 2  ;;  %v2612_v20 = vld [vmem:[%s4193_s3 + $0x250] sm:$0xff] }
  0x28   : > { %2969 = vmatprep.subr.mxu1 %v606_v25  ;;  %2935 = vmatpush3.msra.mxu0 %v2557_v24  ;;  %v3727_v24 = vsel %vm639_vm0, %v1607_v11, %v1608_v18  ;;  %v3826_v11 = vld [vmem:[%s3808_s30 + $0x8] sm:$0xff] }
  0x29   : > { %2970 = vmatpush3.msra.mxu1 %v606_v25  ;;  %2936 = vmatprep.subr.mxu0 %v2556_v28  ;;  %v3730_v25 = vsel %vm639_vm0, %v1608_v18, %v1610_v12  ;;  %v2633_v12 = vld [vmem:[%s4193_s3 + $0x2f8] sm:$0xff] }
  0x2a   : > { %2971 = vmatprep.subr.mxu1 %v605_v29  ;;  %2937 = vmatpush3.msra.mxu0 %v2556_v28  ;;  %v3732_v28 = vld [vmem:[%s572_s23] sm:$0xff]  ;;  %v2613_v18 = vld [vmem:[%s4193_s3 + $0x258] sm:$0xff] }
  0x2b   : > { %2972 = vmatpush3.msra.mxu1 %v605_v29  ;;  %2938 = vmatprep.subr.mxu0 %v2555_v33  ;;  %v1511_v29 = vld [vmem:[%s572_s23 + $0x10] sm:$0x3] }
  0x2c   : > { %2973 = vmatprep.subr.mxu1 %v604_v34  ;;  %2939 = vmatpush3.msra.mxu0 %v2555_v33  ;;  %v1881_v33 = vrot.slane %v1511_v29, 1 }
  0x2d   : > { %2974 = vmatpush3.msra.mxu1 %v604_v34  ;;  %2940 = vmatprep.subr.mxu0 %v2554_v36  ;;  %v3741_v34 = vld [vmem:[%s572_s23 + $0x8] sm:$0xff] }
  0x2e   : > { %2975 = vmatprep.subr.mxu1 %v603_v37  ;;  %2941 = vmatpush3.msra.mxu0 %v2554_v36  ;;  %v2573_v36 = vld [vmem:[%s4193_s3 + $0x118] sm:$0xff] }
  0x2f   : > { %2942 = vmatprep.mubr.f32.mxu0 %v642_v38  ;;  %2976 = vmatpush3.msra.mxu1 %v603_v37  ;;  %v2589_v37 = vld [vmem:[%s4193_s3 + $0x198] sm:$0xff]  ;;  %v1969_v38 = vrot.slane %v3732_v28, 2 }
  0x30   : > { %2977 = vmatprep.mubr.f32.mxu1 %v3544_v26  ;;  %2943 = vmatmul.mubr.f32.vlgmr.msra.gmra.mxu0 %v644_v39  ;;  %v1878_v26 = vrot.slane %v3732_v28, 1  ;;  %v1972_v39 = vrot.slane %v1511_v29, 2  ;;  %v2610_v29 = vld [vmem:[%s4193_s3 + $0x240] sm:$0xff] }
  0x31   : > { %2978 = vmatmul.mubr.f32.vlgmr.msra.gmra.mxu1 %v3546_v27  ;;  %2980 = vmatprep.subr.mxu0 %v2585_v40  ;;  %v2616_v27 = vld [vmem:[%s4193_s3 + $0x270] sm:$0xff] }
  0x32   : > { %3015 = vmatprep.subr.mxu1 %v2601_v41  ;;  %2981 = vmatpush3.msra.mxu0 %v2585_v40  ;;  %v1879_v40 = vrot.slane %v3741_v34, 1 }
  0x33   : > { %3016 = vmatpush3.msra.mxu1 %v2601_v41  ;;  %2982 = vmatprep.subr.mxu0 %v2584_v42  ;;  %v1970_v41 = vrot.slane %v3741_v34, 2 }
  0x34   : > { %3017 = vmatprep.subr.mxu1 %v2600_v43  ;;  %2983 = vmatpush3.msra.mxu0 %v2584_v42  ;;  %v1514_v42 = vld [vmem:[%s3715_s20 + $0x10] sm:$0x3] }
  0x35   : > { %3018 = vmatpush3.msra.mxu1 %v2600_v43  ;;  %2984 = vmatprep.subr.mxu0 %v2583_v44  ;;  %v2149_v43 = vrot.slane %v3744_v35, 1 }
  0x36   : > { %3019 = vmatprep.subr.mxu1 %v2599_v45  ;;  %2985 = vmatpush3.msra.mxu0 %v2583_v44  ;;  %v2240_v44 = vrot.slane %v3744_v35, 2 }
  0x37   : > { %3020 = vmatpush3.msra.mxu1 %v2599_v45  ;;  %2986 = vmatprep.subr.mxu0 %v2582_v46  ;;  %v2572_v45 = vld [vmem:[%s4193_s3 + $0x110] sm:$0xff] }
  0x38   : > { %3021 = vmatprep.subr.mxu1 %v2598_v47  ;;  %2987 = vmatpush3.msra.mxu0 %v2582_v46  ;;  %v2588_v46 = vld [vmem:[%s4193_s3 + $0x190] sm:$0xff] }
  0x39   : > { %3022 = vmatpush3.msra.mxu1 %v2598_v47  ;;  %2988 = vmatprep.subr.mxu0 %v2581_v48  ;;  %v3765_v47 = vsel %vm639_vm0, %v1878_v26, %v1879_v40  ;;  %v2627_v26 = vld [vmem:[%s4193_s3 + $0x2c8] sm:$0xff] }
  0x3a   : > { %3023 = vmatprep.subr.mxu1 %v2597_v49  ;;  %2989 = vmatpush3.msra.mxu0 %v2581_v48  ;;  %v3768_v48 = vsel %vm639_vm0, %v1879_v40, %v1881_v33  ;;  %v2609_v33 = vld [vmem:[%s4193_s3 + $0x238] sm:$0xff]  ;;  %v2624_v40 = vld [vmem:[%s4193_s3 + $0x2b0] sm:$0xff] }
  0x3b   : > { %3024 = vmatpush3.msra.mxu1 %v2597_v49  ;;  %2990 = vmatprep.subr.mxu0 %v2580_v50  ;;  %v3771_v49 = vsel %vm814_vm1, %v1969_v38, %v1970_v41  ;;  %v2625_v38 = vld [vmem:[%s4193_s3 + $0x2b8] sm:$0xff] }
  0x3c   : > { %3025 = vmatprep.subr.mxu1 %v2596_v51  ;;  %2991 = vmatpush3.msra.mxu0 %v2580_v50  ;;  %v2152_v50 = vrot.slane %v1514_v42, 1 }
  0x3d   : > { %3026 = vmatpush3.msra.mxu1 %v2596_v51  ;;  %2992 = vmatprep.subr.mxu0 %v2579_v52  ;;  %v3774_v51 = vld [vmem:[%s3715_s20 + $0x8] sm:$0xff] }
  0x3e   : > { %3027 = vmatprep.subr.mxu1 %v2595_v53  ;;  %2993 = vmatpush3.msra.mxu0 %v2579_v52  ;;  %v3777_v52 = vsel %vm814_vm1, %v1970_v41, %v1972_v39  ;;  %v2150_v55 = vrot.slane %v3774_v51, 1  ;;  %v2241_v56 = vrot.slane %v3774_v51, 2  ;;  %v2607_v39 = vld [vmem:[%s4193_s3 + $0x228] sm:$0xff]  ;;  %v2606_v41 = vld [vmem:[%s4193_s3 + $0x220] sm:$0xff] }
  0x3f   : > { %3028 = vmatpush3.msra.mxu1 %v2595_v53  ;;  %2994 = vmatprep.subr.mxu0 %v2578_v59  ;;  %v2243_v53 = vrot.slane %v1514_v42, 2  ;;  %v2623_v42 = vld [vmem:[%s4193_s3 + $0x2a8] sm:$0xff] }
  0x40   : > { %3029 = vmatprep.subr.mxu1 %v2594_v60  ;;  %2995 = vmatpush3.msra.mxu0 %v2578_v59  ;;  %v2587_v59 = vld [vmem:[%s4193_s3 + $0x188] sm:$0xff]  ;;  %v3792_v62 = vsel %vm639_vm0, %v2149_v43, %v2150_v55  ;;  %v3795_v63 = vsel %vm639_vm0, %v2150_v55, %v2152_v50  ;;  %v3798_v0 = vsel %vm814_vm1, %v2240_v44, %v2241_v56  ;;  %v2605_v43 = vld [vmem:[%s4193_s3 + $0x218] sm:$0xff]  ;;  %v2622_v44 = vld [vmem:[%s4193_s3 + $0x2a0] sm:$0xff]  ;;  %v1014_v55 = vrot.slane %v3826_v11, 1 }
  0x41   : > { %3030 = vmatpush3.msra.mxu1 %v2594_v60  ;;  %2996 = vmatprep.subr.mxu0 %v2577_v1  ;;  %v817_v60 = vsel %vm814_vm1, %v815_v22, %v816_v23  ;;  %v3811_v30 = vsel %vm814_vm1, %v2241_v56, %v2243_v53  ;;  %v2611_v22 = vld [vmem:[%s4193_s3 + $0x248] sm:$0xff]  ;;  %v2621_v50 = vld [vmem:[%s4193_s3 + $0x298] sm:$0xff]  ;;  %v1013_v53 = vrot.slane %v3823_v10, 1 }
  0x42   : > { %3031 = vmatprep.subr.mxu1 %v2593_v2  ;;  %2997 = vmatpush3.msra.mxu0 %v2577_v1  ;;  %v2570_v1 = vld [vmem:[%s4193_s3 + $0x100] sm:$0xff] }
  0x43   : > { %3032 = vmatpush3.msra.mxu1 %v2593_v2  ;;  %2998 = vmatprep.subr.mxu0 %v2576_v6  ;;  %v2586_v2 = vld [vmem:[%s4193_s3 + $0x180] sm:$0xff] }
  0x44   : > { %3033 = vmatprep.subr.mxu1 %v2592_v8  ;;  %2999 = vmatpush3.msra.mxu0 %v2576_v6  ;;  %v819_v6 = vsel %vm814_vm1, %v816_v23, %v818_v61  ;;  %v2628_v23 = vld [vmem:[%s4193_s3 + $0x2d0] sm:$0xff]  ;;  %v1115_v61 = vrot.slane %v3826_v11, 2 }
  0x45   : > { %3034 = vmatpush3.msra.mxu1 %v2592_v8  ;;  %3000 = vmatprep.subr.mxu0 %v2575_v16  ;;  %v2617_v8 = vld [vmem:[%s4193_s3 + $0x278] sm:$0xff] }
  0x46   : > { %3035 = vmatprep.subr.mxu1 %v2591_v17  ;;  %3001 = vmatpush3.msra.mxu0 %v2575_v16  ;;  %v2614_v16 = vld [vmem:[%s4193_s3 + $0x260] sm:$0xff] }
  0x47   : > { %3036 = vmatpush3.msra.mxu1 %v2591_v17  ;;  %3002 = vmatprep.subr.mxu0 %v2574_v19  ;;  %v2631_v17 = vld [vmem:[%s4193_s3 + $0x2e8] sm:$0xff] }
  0x48   : > { %3037 = vmatprep.subr.mxu1 %v2590_v21  ;;  %3003 = vmatpush3.msra.mxu0 %v2574_v19  ;;  %v2630_v19 = vld [vmem:[%s4193_s3 + $0x2e0] sm:$0xff] }
  0x49   : > { %3038 = vmatpush3.msra.mxu1 %v2590_v21  ;;  %3004 = vmatprep.subr.mxu0 %v2573_v36  ;;  %v2629_v21 = vld [vmem:[%s4193_s3 + $0x2d8] sm:$0xff] }
  0x4a   : > { %3039 = vmatprep.subr.mxu1 %v2589_v37  ;;  %3005 = vmatpush3.msra.mxu0 %v2573_v36  ;;  %v2626_v36 = vld [vmem:[%s4193_s3 + $0x2c0] sm:$0xff] }
  0x4b   : > { %3040 = vmatpush3.msra.mxu1 %v2589_v37  ;;  %3006 = vmatprep.subr.mxu0 %v2572_v45  ;;  %v2608_v37 = vld [vmem:[%s4193_s3 + $0x230] sm:$0xff] }
  0x4c   : > { %3041 = vmatprep.subr.mxu1 %v2588_v46  ;;  %3007 = vmatpush3.msra.mxu0 %v2572_v45  ;;  %v599_v45 = vld [vmem:[%s3808_s30 + $0x10] sm:$0x3] }
  0x4d   : > { %3042 = vmatpush3.msra.mxu1 %v2588_v46  ;;  %3008 = vmatprep.subr.mxu0 %v2571_v57  ;;  %v2604_v46 = vld [vmem:[%s4193_s3 + $0x210] sm:$0xff]  ;;  %v1016_v56 = vrot.slane %v599_v45, 1 }
  0x4e   : > { %3043 = vmatprep.subr.mxu1 %v2587_v59  ;;  %3009 = vmatpush3.msra.mxu0 %v2571_v57  ;;  %v2603_v57 = vld [vmem:[%s4193_s3 + $0x208] sm:$0xff] }
  0x4f   : > { %3012 = vmatprep.mubr.f32.mxu0 %v817_v60  ;;  %3010 = vmatprep.subr.mxu0 %v2570_v1  ;;  %v1114_v60 = vrot.slane %v3823_v10, 2 }
  0x50   : > { %3044 = vmatpush3.msra.mxu1 %v2587_v59  ;;  %3011 = vmatpush3.msra.mxu0 %v2570_v1  ;;  %v2620_v59 = vld [vmem:[%s4193_s3 + $0x290] sm:$0xff]  ;;  %v2602_v1 = vld [vmem:[%s4193_s3 + $0x200] sm:$0xff] }
  0x51   : > { %3045 = vmatprep.subr.mxu1 %v2586_v2  ;;  %3013 = vmatmul.mubr.f32.vlgmr.msra.gmra.mxu0 %v819_v6  ;;  %v1117_v6 = vrot.slane %v599_v45, 2  ;;  %v2655_v45 = vld [vmem:[%s4193_s3 + $0x3a8] sm:$0xff] }
  0x52   : > { %3050 = vmatprep.subr.mxu0 %v2617_v8  ;;  %3046 = vmatpush3.msra.mxu1 %v2586_v2  ;;  %v2619_v2 = vld [vmem:[%s4193_s3 + $0x288] sm:$0xff] }
  0x53   : > { %3047 = vmatprep.mubr.f32.mxu1 %v3823_v10  ;;  %3051 = vmatpush3.msra.mxu0 %v2617_v8  ;;  %v1015_v8 = vsel %vm639_vm0, %v1013_v53, %v1014_v55  ;;  %v1017_v10 = vsel %vm639_vm0, %v1014_v55, %v1016_v56  ;;  %v2636_v53 = vld [vmem:[%s4193_s3 + $0x310] sm:$0xff]  ;;  %v2653_v55 = vld [vmem:[%s4193_s3 + $0x398] sm:$0xff]  ;;  %v2635_v56 = vld [vmem:[%s4193_s3 + $0x308] sm:$0xff] }
  0x54   : > { %3048 = vmatmul.mubr.f32.vlgmr.msra.gmra.mxu1 %v3826_v11  ;;  %3052 = vmatprep.subr.mxu0 %v2616_v27  ;;  %v2618_v11 = vld [vmem:[%s4193_s3 + $0x280] sm:$0xff] }
  0x55   : > { %3085 = vmatprep.subr.mxu1 %v2633_v12  ;;  %3053 = vmatpush3.msra.mxu0 %v2616_v27  ;;  %v2649_v27 = vld [vmem:[%s4193_s3 + $0x378] sm:$0xff] }
  0x56   : > { %3086 = vmatpush3.msra.mxu1 %v2633_v12  ;;  %3054 = vmatprep.subr.mxu0 %v2615_v13  ;;  %v1116_v12 = vsel %vm814_vm1, %v1114_v60, %v1115_v61  ;;  %v2651_v60 = vld [vmem:[%s4193_s3 + $0x388] sm:$0xff] }
  0x57   : > { %3087 = vmatprep.subr.mxu1 %v2632_v14  ;;  %3055 = vmatpush3.msra.mxu0 %v2615_v13  ;;  %v1118_v13 = vsel %vm814_vm1, %v1115_v61, %v1117_v6  ;;  %v2650_v61 = vld [vmem:[%s4193_s3 + $0x380] sm:$0xff] }
  0x58   : > { %3088 = vmatpush3.msra.mxu1 %v2632_v14  ;;  %3056 = vmatprep.subr.mxu0 %v2614_v16  ;;  %v2648_v14 = vld [vmem:[%s4193_s3 + $0x370] sm:$0xff]  ;;  %v1515_v6 = vld [vmem:[%s4198_s8] sm:$0xf] }
  0x59   : > { %3089 = vmatprep.subr.mxu1 %v2631_v17  ;;  %3057 = vmatpush3.msra.mxu0 %v2614_v16  ;;  %v2665_v16 = vld [vmem:[%s4193_s3 + $0x3f8] sm:$0xff] }
  0x5a   : > { %3090 = vmatpush3.msra.mxu1 %v2631_v17  ;;  %3058 = vmatprep.subr.mxu0 %v2613_v18  ;;  %v2647_v17 = vld [vmem:[%s4193_s3 + $0x368] sm:$0xff] }
  0x5b   : > { %3091 = vmatprep.subr.mxu1 %v2630_v19  ;;  %3059 = vmatpush3.msra.mxu0 %v2613_v18  ;;  %v2664_v18 = vld [vmem:[%s4193_s3 + $0x3f0] sm:$0xff] }
  0x5c   : > { %3092 = vmatpush3.msra.mxu1 %v2630_v19  ;;  %3060 = vmatprep.subr.mxu0 %v2612_v20  ;;  %v2646_v19 = vld [vmem:[%s4193_s3 + $0x360] sm:$0xff] }
  0x5d   : > { %3093 = vmatprep.subr.mxu1 %v2629_v21  ;;  %3061 = vmatpush3.msra.mxu0 %v2612_v20  ;;  %v2663_v20 = vld [vmem:[%s4193_s3 + $0x3e8] sm:$0xff] }
  0x5e   : > { %3094 = vmatpush3.msra.mxu1 %v2629_v21  ;;  %3062 = vmatprep.subr.mxu0 %v2611_v22  ;;  %v2645_v21 = vld [vmem:[%s4193_s3 + $0x358] sm:$0xff] }
  0x5f   : > { %3095 = vmatprep.subr.mxu1 %v2628_v23  ;;  %3063 = vmatpush3.msra.mxu0 %v2611_v22  ;;  %v2662_v22 = vld [vmem:[%s4193_s3 + $0x3e0] sm:$0xff] }
  0x60   : > { %3096 = vmatpush3.msra.mxu1 %v2628_v23  ;;  %3064 = vmatprep.subr.mxu0 %v2610_v29  ;;  %v2644_v23 = vld [vmem:[%s4193_s3 + $0x350] sm:$0xff] }
  0x61   : > { %3097 = vmatprep.subr.mxu1 %v2627_v26  ;;  %3065 = vmatpush3.msra.mxu0 %v2610_v29  ;;  %v2661_v29 = vld [vmem:[%s4193_s3 + $0x3d8] sm:$0xff] }
  0x62   : > { %3098 = vmatpush3.msra.mxu1 %v2627_v26  ;;  %3066 = vmatprep.subr.mxu0 %v2609_v33  ;;  %v2643_v26 = vld [vmem:[%s4193_s3 + $0x348] sm:$0xff] }
  0x63   : > { %3099 = vmatprep.subr.mxu1 %v2626_v36  ;;  %3067 = vmatpush3.msra.mxu0 %v2609_v33  ;;  %v2660_v33 = vld [vmem:[%s4193_s3 + $0x3d0] sm:$0xff] }
  0x64   : > { %3100 = vmatpush3.msra.mxu1 %v2626_v36  ;;  %3068 = vmatprep.subr.mxu0 %v2608_v37  ;;  %v2642_v36 = vld [vmem:[%s4193_s3 + $0x340] sm:$0xff] }
  0x65   : > { %3101 = vmatprep.subr.mxu1 %v2625_v38  ;;  %3069 = vmatpush3.msra.mxu0 %v2608_v37  ;;  %v2659_v37 = vld [vmem:[%s4193_s3 + $0x3c8] sm:$0xff] }
  0x66   : > { %3102 = vmatpush3.msra.mxu1 %v2625_v38  ;;  %3070 = vmatprep.subr.mxu0 %v2607_v39  ;;  %v2641_v38 = vld [vmem:[%s4193_s3 + $0x338] sm:$0xff] }
  0x67   : > { %3103 = vmatprep.subr.mxu1 %v2624_v40  ;;  %3071 = vmatpush3.msra.mxu0 %v2607_v39  ;;  %v2658_v39 = vld [vmem:[%s4193_s3 + $0x3c0] sm:$0xff] }
  0x68   : > { %3104 = vmatpush3.msra.mxu1 %v2624_v40  ;;  %3072 = vmatprep.subr.mxu0 %v2606_v41  ;;  %v2640_v40 = vld [vmem:[%s4193_s3 + $0x330] sm:$0xff] }
  0x69   : > { %3105 = vmatprep.subr.mxu1 %v2623_v42  ;;  %3073 = vmatpush3.msra.mxu0 %v2606_v41  ;;  %v2657_v41 = vld [vmem:[%s4193_s3 + $0x3b8] sm:$0xff] }
  0x6a   : > { %3106 = vmatpush3.msra.mxu1 %v2623_v42  ;;  %3074 = vmatprep.subr.mxu0 %v2605_v43  ;;  %v2639_v42 = vld [vmem:[%s4193_s3 + $0x328] sm:$0xff] }
  0x6b   : > { %3107 = vmatprep.subr.mxu1 %v2622_v44  ;;  %3075 = vmatpush3.msra.mxu0 %v2605_v43  ;;  %v2656_v43 = vld [vmem:[%s4193_s3 + $0x3b0] sm:$0xff] }
  0x6c   : > { %3108 = vmatpush3.msra.mxu1 %v2622_v44  ;;  %3076 = vmatprep.subr.mxu0 %v2604_v46  ;;  %v2638_v44 = vld [vmem:[%s4193_s3 + $0x320] sm:$0xff] }
  0x6d   : > { %3109 = vmatprep.subr.mxu1 %v2621_v50  ;;  %3077 = vmatpush3.msra.mxu0 %v2604_v46  ;;  %v2637_v46 = vld [vmem:[%s4193_s3 + $0x318] sm:$0xff] }
  0x6e   : > { %3110 = vmatpush3.msra.mxu1 %v2621_v50  ;;  %3078 = vmatprep.subr.mxu0 %v2603_v57  ;;  %v2654_v50 = vld [vmem:[%s4193_s3 + $0x3a0] sm:$0xff] }
  0x6f   : > { %3111 = vmatprep.subr.mxu1 %v2620_v59  ;;  %3079 = vmatpush3.msra.mxu0 %v2603_v57  ;;  %v2652_v57 = vld [vmem:[%s4193_s3 + $0x390] sm:$0xff] }
  0x70   : > { %3112 = vmatpush3.msra.mxu1 %v2620_v59  ;;  %3080 = vmatprep.subr.mxu0 %v2602_v1  ;;  %v2634_v59 = vld [vmem:[%s4193_s3 + $0x300] sm:$0xff] }
  0x71   : > { %3113 = vmatprep.subr.mxu1 %v2619_v2  ;;  %3081 = vmatpush3.msra.mxu0 %v2602_v1  ;;  %v2681_v1 = vld [vmem:[%s4193_s3 + $0x478] sm:$0xff] }
  0x72   : > { %3082 = vmatprep.mubr.f32.mxu0 %v1015_v8  ;;  %3114 = vmatpush3.msra.mxu1 %v2619_v2  ;;  %v2680_v2 = vld [vmem:[%s4193_s3 + $0x470] sm:$0xff] }
  0x73   : > { %3083 = vmatmul.mubr.f32.vlgmr.msra.gmra.mxu0 %v1017_v10  ;;  %3115 = vmatprep.subr.mxu1 %v2618_v11  ;;  %v2676_v8 = vld [vmem:[%s4193_s3 + $0x450] sm:$0xff]  ;;  %v2674_v10 = vld [vmem:[%s4193_s3 + $0x440] sm:$0xff] }
  0x74   : > { %3120 = vmatprep.subr.mxu0 %v2649_v27  ;;  %3116 = vmatpush3.msra.mxu1 %v2618_v11  ;;  %v2672_v11 = vld [vmem:[%s4193_s3 + $0x430] sm:$0xff] }
  0x75   : > { %3117 = vmatprep.mubr.f32.mxu1 %v1116_v12  ;;  %3121 = vmatpush3.msra.mxu0 %v2649_v27  ;;  %v2702_v27 = vld [vmem:[%s4198_s8 + $0x14] sm:$0xf]  ;;  %v2706_v12 = vld [vmem:[%s4198_s8 + $0x18] sm:$0xf] }
  0x76   : > { %3118 = vmatmul.mubr.f32.vlgmr.msra.gmra.mxu1 %v1118_v13  ;;  %3122 = vmatprep.subr.mxu0 %v2648_v14  ;;  %v2710_v13 = vld [vmem:[%s4198_s8 + $0x1c] sm:$0xf] }
  0x77   : > { %3155 = vmatprep.subr.mxu1 %v2665_v16  ;;  %3123 = vmatpush3.msra.mxu0 %v2648_v14 }
  0x78   : > { %3156 = vmatpush3.msra.mxu1 %v2665_v16  ;;  %3124 = vmatprep.subr.mxu0 %v2647_v17 }
  0x79   : > { %3157 = vmatprep.subr.mxu1 %v2664_v18  ;;  %3125 = vmatpush3.msra.mxu0 %v2647_v17 }
  0x7a   : > { %3158 = vmatpush3.msra.mxu1 %v2664_v18  ;;  %3126 = vmatprep.subr.mxu0 %v2646_v19 }
  0x7b   : > { %3159 = vmatprep.subr.mxu1 %v2663_v20  ;;  %3127 = vmatpush3.msra.mxu0 %v2646_v19 }
  0x7c   : > { %3160 = vmatpush3.msra.mxu1 %v2663_v20  ;;  %3128 = vmatprep.subr.mxu0 %v2645_v21 }
  0x7d   : > { %3161 = vmatprep.subr.mxu1 %v2662_v22  ;;  %3129 = vmatpush3.msra.mxu0 %v2645_v21 }
  0x7e   : > { %3162 = vmatpush3.msra.mxu1 %v2662_v22  ;;  %3130 = vmatprep.subr.mxu0 %v2644_v23 }
  0x7f   : > { %3163 = vmatprep.subr.mxu1 %v2661_v29  ;;  %3131 = vmatpush3.msra.mxu0 %v2644_v23 }
  0x80   : > { %3164 = vmatpush3.msra.mxu1 %v2661_v29  ;;  %3132 = vmatprep.subr.mxu0 %v2643_v26 }
  0x81   : > { %3165 = vmatprep.subr.mxu1 %v2660_v33  ;;  %3133 = vmatpush3.msra.mxu0 %v2643_v26 }
  0x82   : > { %3166 = vmatpush3.msra.mxu1 %v2660_v33  ;;  %3134 = vmatprep.subr.mxu0 %v2642_v36 }
  0x83   : > { %3167 = vmatprep.subr.mxu1 %v2659_v37  ;;  %3135 = vmatpush3.msra.mxu0 %v2642_v36 }
  0x84   : > { %3168 = vmatpush3.msra.mxu1 %v2659_v37  ;;  %3136 = vmatprep.subr.mxu0 %v2641_v38 }
  0x85   : > { %3169 = vmatprep.subr.mxu1 %v2658_v39  ;;  %3137 = vmatpush3.msra.mxu0 %v2641_v38 }
  0x86   : > { %3170 = vmatpush3.msra.mxu1 %v2658_v39  ;;  %3138 = vmatprep.subr.mxu0 %v2640_v40 }
  0x87   : > { %3171 = vmatprep.subr.mxu1 %v2657_v41  ;;  %3139 = vmatpush3.msra.mxu0 %v2640_v40 }
  0x88   : > { %3172 = vmatpush3.msra.mxu1 %v2657_v41  ;;  %3140 = vmatprep.subr.mxu0 %v2639_v42 }
  0x89   : > { %3173 = vmatprep.subr.mxu1 %v2656_v43  ;;  %3141 = vmatpush3.msra.mxu0 %v2639_v42 }
  0x8a   : > { %3174 = vmatpush3.msra.mxu1 %v2656_v43  ;;  %3142 = vmatprep.subr.mxu0 %v2638_v44 }
  0x8b   : > { %3175 = vmatprep.subr.mxu1 %v2655_v45  ;;  %3143 = vmatpush3.msra.mxu0 %v2638_v44 }
  0x8c   : > { %3176 = vmatpush3.msra.mxu1 %v2655_v45  ;;  %3144 = vmatprep.subr.mxu0 %v2637_v46 }
  0x8d   : > { %3177 = vmatprep.subr.mxu1 %v2654_v50  ;;  %3145 = vmatpush3.msra.mxu0 %v2637_v46 }
  0x8e   : > { %3178 = vmatpush3.msra.mxu1 %v2654_v50  ;;  %3146 = vmatprep.subr.mxu0 %v2636_v53 }
  0x8f   : > { %3179 = vmatprep.subr.mxu1 %v2653_v55  ;;  %3147 = vmatpush3.msra.mxu0 %v2636_v53 }
  0x90   : > { %3180 = vmatpush3.msra.mxu1 %v2653_v55  ;;  %3148 = vmatprep.subr.mxu0 %v2635_v56 }
  0x91   : > { %3181 = vmatprep.subr.mxu1 %v2652_v57  ;;  %3149 = vmatpush3.msra.mxu0 %v2635_v56 }
  0x92   : > { %3182 = vmatpush3.msra.mxu1 %v2652_v57  ;;  %3150 = vmatprep.subr.mxu0 %v2634_v59 }
  0x93   : > { %3183 = vmatprep.subr.mxu1 %v2651_v60  ;;  %3151 = vmatpush3.msra.mxu0 %v2634_v59 }
  0x94   : > { %3152 = vmatprep.mubr.f32.mxu0 %v3645_v54  ;;  %3184 = vmatpush3.msra.mxu1 %v2651_v60  ;;  %v2679_v54 = vld [vmem:[%s4193_s3 + $0x468] sm:$0xff] }
  0x95   : > { %3153 = vmatmul.mubr.f32.vlgmr.msra.gmra.mxu0 %v3649_v58  ;;  %3185 = vmatprep.subr.mxu1 %v2650_v61  ;;  %v2678_v58 = vld [vmem:[%s4193_s3 + $0x460] sm:$0xff] }
  0x96   : > { %3190 = vmatprep.subr.mxu0 %v2681_v1  ;;  %3186 = vmatpush3.msra.mxu1 %v2650_v61 }
  0x97   : > { %3187 = vmatprep.mubr.f32.mxu1 %v3674_v3  ;;  %3191 = vmatpush3.msra.mxu0 %v2681_v1  ;;  %v2686_v3 = vld [vmem:[%s4198_s8 + $0x4] sm:$0xf] }
  0x98   : > { %3188 = vmatmul.mubr.f32.vlgmr.msra.gmra.mxu1 %v3677_v4  ;;  %3192 = vmatprep.subr.mxu0 %v2680_v2  ;;  %v2677_v4 = vld [vmem:[%s4193_s3 + $0x458] sm:$0xff] }
  0x99   : > { %3225 = vmatprep.subr.msk.mxu1 %vm1523_vm2, %v1515_v6  ;;  %3193 = vmatpush3.msra.mxu0 %v2680_v2  ;;  %v2682_v2 = vld [vmem:[%s4194_s4] ss:$0 sm:$0xff] }
  0x9a   : > { %3226 = vmatpush3.msk.msra.mxu1 %vm1523_vm2, %v1515_v6  ;;  %3194 = vmatprep.subr.mxu0 %v2679_v54 }
  0x9b   : > { %3227 = vmatprep.mubr.msk.f32.mxu1 %vm1516_vm3, %v3692_v9  ;;  %3195 = vmatpush3.msra.mxu0 %v2679_v54  ;;  %v2690_v9 = vld [vmem:[%s4198_s8 + $0x8] sm:$0xf] }
  0x9c   : > { %3228 = vmatmul.mubr.msk.f32.vlgmr.msra.gmra.mxu1 %vm1516_vm3, %v3696_v15  ;;  %3196 = vmatprep.subr.mxu0 %v2678_v58  ;;  %v2675_v15 = vld [vmem:[%s4193_s3 + $0x448] sm:$0xff] }
  0x9d   : > { %3230 = vmatprep.subr.msk.mxu1 %vm1523_vm2, %v2686_v3  ;;  %3197 = vmatpush3.msra.mxu0 %v2678_v58 }
  0x9e   : > { %3231 = vmatpush3.msk.msra.mxu1 %vm1523_vm2, %v2686_v3  ;;  %3198 = vmatprep.subr.mxu0 %v2677_v4 }
  0x9f   : > { %3232 = vmatprep.mubr.msk.f32.mxu1 %vm1516_vm3, %v3727_v24  ;;  %3199 = vmatpush3.msra.mxu0 %v2677_v4  ;;  %v2694_v24 = vld [vmem:[%s4198_s8 + $0xc] sm:$0xf] }
  0xa0   : > { %3233 = vmatmul.mubr.msk.f32.vlgmr.msra.gmra.mxu1 %vm1516_vm3, %v3730_v25  ;;  %3200 = vmatprep.subr.mxu0 %v2676_v8  ;;  %v2673_v25 = vld [vmem:[%s4193_s3 + $0x438] sm:$0xff] }
  0xa1   : > { %3235 = vmatprep.subr.msk.mxu1 %vm1523_vm2, %v2690_v9  ;;  %3201 = vmatpush3.msra.mxu0 %v2676_v8 }
  0xa2   : > { %3236 = vmatpush3.msk.msra.mxu1 %vm1523_vm2, %v2690_v9  ;;  %3202 = vmatprep.subr.mxu0 %v2675_v15 }
  0xa3   : > { %3237 = vmatprep.mubr.msk.f32.mxu1 %vm1516_vm3, %v3735_v31  ;;  %3203 = vmatpush3.msra.mxu0 %v2675_v15  ;;  %v2698_v31 = vld [vmem:[%s4198_s8 + $0x10] sm:$0xf] }
  0xa4   : > { %3238 = vmatmul.mubr.msk.f32.vlgmr.msra.gmra.mxu1 %vm1516_vm3, %v3738_v32  ;;  %3204 = vmatprep.subr.mxu0 %v2674_v10  ;;  %v2671_v32 = vld [vmem:[%s4193_s3 + $0x428] sm:$0xff] }
  0xa5   : > { %3240 = vmatprep.subr.msk.mxu1 %vm1523_vm2, %v2694_v24  ;;  %3205 = vmatpush3.msra.mxu0 %v2674_v10 }
  0xa6   : > { %3241 = vmatpush3.msk.msra.mxu1 %vm1523_vm2, %v2694_v24  ;;  %3206 = vmatprep.subr.mxu0 %v2673_v25 }
  0xa7   : > { %3222 = vmatprep.mubr.f32.mxu0 %v3680_v5  ;;  %3207 = vmatpush3.msra.mxu0 %v2673_v25  ;;  %v2670_v5 = vld [vmem:[%s4193_s3 + $0x420] sm:$0xff] }
  0xa8   : > { %3242 = vmatprep.mubr.msk.f32.mxu1 %vm1516_vm3, %v3732_v28  ;;  %3208 = vmatprep.subr.mxu0 %v2672_v11  ;;  %v2669_v28 = vld [vmem:[%s4193_s3 + $0x418] sm:$0xff] }
  0xa9   : > { %3243 = vmatmul.mubr.msk.f32.vlgmr.msra.gmra.mxu1 %vm1516_vm3, %v3741_v34  ;;  %3209 = vmatpush3.msra.mxu0 %v2672_v11  ;;  %v2668_v34 = vld [vmem:[%s4193_s3 + $0x410] sm:$0xff] }
  0xaa   : > { %3245 = vmatprep.subr.msk.mxu1 %vm1523_vm2, %v2698_v31  ;;  %3210 = vmatprep.subr.mxu0 %v2671_v32 }
  0xab   : > { %3246 = vmatpush3.msk.msra.mxu1 %vm1523_vm2, %v2698_v31  ;;  %3211 = vmatpush3.msra.mxu0 %v2671_v32 }
  0xac   : > { %3247 = vmatprep.mubr.msk.f32.mxu1 %vm1516_vm3, %v3765_v47  ;;  %3212 = vmatprep.subr.mxu0 %v2670_v5  ;;  %v2667_v47 = vld [vmem:[%s4193_s3 + $0x408] sm:$0xff] }
  0xad   : > { %3248 = vmatmul.mubr.msk.f32.vlgmr.msra.gmra.mxu1 %vm1516_vm3, %v3768_v48  ;;  %3213 = vmatpush3.msra.mxu0 %v2670_v5  ;;  %v2666_v48 = vld [vmem:[%s4193_s3 + $0x400] sm:$0xff] }
  0xae   : > { %3250 = vmatprep.subr.msk.mxu1 %vm1523_vm2, %v2702_v27  ;;  %3214 = vmatprep.subr.mxu0 %v2669_v28 }
  0xaf   : > { %3251 = vmatpush3.msk.msra.mxu1 %vm1523_vm2, %v2702_v27  ;;  %3215 = vmatpush3.msra.mxu0 %v2669_v28 }
  0xb0   : > { %3252 = vmatprep.mubr.msk.f32.mxu1 %vm1516_vm3, %v3771_v49  ;;  %3216 = vmatprep.subr.mxu0 %v2668_v34  ;;  %v2714_v49 = vld [vmem:[%s4198_s8 + $0x20] sm:$0xf] }
  0xb1   : > { %3253 = vmatmul.mubr.msk.f32.vlgmr.msra.gmra.mxu1 %vm1516_vm3, %v3777_v52  ;;  %3217 = vmatpush3.msra.mxu0 %v2668_v34 }
  0xb2   : > { %3255 = vmatprep.subr.msk.mxu1 %vm1523_vm2, %v2706_v12  ;;  %3218 = vmatprep.subr.mxu0 %v2667_v47 }
  0xb3   : > { %3256 = vmatpush3.msk.msra.mxu1 %vm1523_vm2, %v2706_v12  ;;  %3219 = vmatpush3.msra.mxu0 %v2667_v47 }
  0xb4   : > { %3257 = vmatprep.mubr.msk.f32.mxu1 %vm1516_vm3, %v3744_v35  ;;  %3220 = vmatprep.subr.mxu0 %v2666_v48 }
  0xb5   : > { %3258 = vmatmul.mubr.msk.f32.vlgmr.msra.gmra.mxu1 %vm1516_vm3, %v3774_v51  ;;  %3221 = vmatpush3.msra.mxu0 %v2666_v48 }
  0xb6   : > { %3260 = vmatprep.subr.msk.mxu1 %vm1523_vm2, %v2710_v13  ;;  %3223 = vmatmul.mubr.f32.vlgmr.msra.gmra.mxu0 %v3686_v7 }
  0xb7   : > { %3261 = vmatpush3.msk.msra.mxu1 %vm1523_vm2, %v2710_v13  ;;  %3262 = vmatprep.mubr.msk.f32.mxu1 %vm1516_vm3, %v3792_v62 }
  0xb8   : > { %3265 = vmatprep.subr.msk.mxu0 %vm1523_vm2, %v2714_v49  ;;  %3267 = vmatprep.mubr.msk.f32.mxu0 %vm1516_vm3, %v3798_v0 }
  0xb9   : > { %3263 = vmatmul.mubr.msk.f32.vlgmr.msra.gmra.mxu1 %vm1516_vm3, %v3795_v63  ;;  %3266 = vmatpush3.msk.msra.mxu0 %vm1523_vm2, %v2714_v49 }
  0xba   : > { %3268 = vmatmul.mubr.msk.f32.vlgmr.msra.gmra.mxu0 %vm1516_vm3, %v3811_v30 }
  0xf0   : > { %v2944_v18 = vpop.f32.mrf.mxu0 }
  0xf1   : > { %v2979_v35 = vpop.f32.mrf.mxu1 }
  0xf2   : > { %v713_v63 = vpop.f32.mrf.mxu0  ;;  %v794_v29 = vadd.f32 %v2979_v35, %v2944_v18 }
  0xf3   : > { %v788_v7 = vpop.f32.mrf.mxu1 }
  0xf4   : > { %v789_v33 = vadd.f32 %v788_v7, %v713_v63 }
 0x111   : > { %v3014_v22 = vpop.f32.mrf.mxu0 }
 0x112   : > { %v898_v30 = vadd.f32 %v3014_v22, %v794_v29 }
 0x113   : > { %v888_v26 = vpop.f32.mrf.mxu0 }
 0x114   : > { %v3049_v51 = vpop.f32.mrf.mxu1  ;;  %v897_v38 = vadd.f32 %v888_v26, %v789_v33 }
 0x115   : > { %v992_v40 = vadd.f32 %v3049_v51, %v898_v30 }
 0x116   : > { %v982_v52 = vpop.f32.mrf.mxu1 }
 0x117   : > { %v991_v43 = vadd.f32 %v982_v52, %v897_v38 }
 0x133   : > { %v3084_v37 = vpop.f32.mrf.mxu0 }
 0x134   : > { %v1096_v44 = vadd.f32 %v3084_v37, %v992_v40 }
 0x135   : > { %v1086_v41 = vpop.f32.mrf.mxu0 }
 0x136   : > { %v3119_v14 = vpop.f32.mrf.mxu1  ;;  %v1095_v46 = vadd.f32 %v1086_v41, %v991_v43 }
 0x137   : > { %v1197_v53 = vadd.f32 %v3119_v14, %v1096_v44 }
 0x138   : > { %v1187_v16 = vpop.f32.mrf.mxu1 }
 0x139   : > { %v1196_v56 = vadd.f32 %v1187_v16, %v1095_v46  ;;  %v2718_v16 = vld [vmem:[%s4199_s9] ss:$0 sm:$0xff] }
 0x155   : > { %v3154_v45 = vpop.f32.mrf.mxu0 }
 0x156   : > { %v1291_v57 = vadd.f32 %v3154_v45, %v1197_v53 }
 0x157   : > { %v1281_v55 = vpop.f32.mrf.mxu0 }
 0x158   : > { %v3189_v62 = vpop.f32.mrf.mxu1  ;;  %v1290_v60 = vadd.f32 %v1281_v55, %v1196_v56 }
 0x159   : > { %v1395_v61 = vadd.f32 %v3189_v62, %v1291_v57 }
 0x15a   : > { %v1385_v17 = vpop.f32.mrf.mxu1 }
 0x15b   : > { %v1394_v54 = vadd.f32 %v1385_v17, %v1290_v60 }
 0x15c   : > { %v3229_v19 = vpop.f32.mrf.mxu1 }
 0x15e   : > { %v1593_v20 = vpop.f32.mrf.mxu1 }
 0x160   : > { %v3234_v21 = vpop.f32.mrf.mxu1 }
 0x162   : > { %v1685_v23 = vpop.f32.mrf.mxu1 }
 0x164   : > { %v3239_v0 = vpop.f32.mrf.mxu1 }
 0x166   : > { %v1776_v36 = vpop.f32.mrf.mxu1 }
 0x169   : > { %v3244_v39 = vpop.f32.mrf.mxu1 }
 0x16b   : > { %v1864_v42 = vpop.f32.mrf.mxu1 }
 0x16d   : > { %v3249_v50 = vpop.f32.mrf.mxu1 }
 0x16f   : > { %v1956_v59 = vpop.f32.mrf.mxu1 }
 0x171   : > { %v3254_v6 = vpop.f32.mrf.mxu1 }
 0x173   : > { %v2047_v9 = vpop.f32.mrf.mxu1 }
 0x175   : > { %v3259_v11 = vpop.f32.mrf.mxu1 }
 0x176   : > { %v3224_v1 = vpop.f32.mrf.mxu0 }
 0x177   : > { %v1496_v58 = vadd.f32 %v3224_v1, %v1395_v61  ;;  %v2135_v28 = vpop.f32.mrf.mxu1 }
 0x178   : > { %v1486_v3 = vpop.f32.mrf.mxu0 }
 0x179   : > { %v1505_v4 = vadd.f32 %v2682_v2, %v1496_v58  ;;  %v1495_v8 = vadd.f32 %v1486_v3, %v1394_v54  ;;  %v3264_v13 = vpop.f32.mrf.mxu1 }
 0x17a   : > { %v3269_v7 = vpop.f32.mrf.mxu0 }
 0x17b   : > { %v1603_v15 = vadd.f32 %v3229_v19, %v1505_v4  ;;  %v1504_v10 = vadd.f32 %v2682_v2, %v1495_v8  ;;  %v2227_v14 = vpop.f32.mrf.mxu1 }
 0x17c   : > { %v2318_v18 = vpop.f32.mrf.mxu0 }
 0x17d   : > { %v1695_v24 = vadd.f32 %v3234_v21, %v1603_v15  ;;  %v1602_v25 = vadd.f32 %v1593_v20, %v1504_v10 }
 0x17f   : > { %v1786_v31 = vadd.f32 %v3239_v0, %v1695_v24  ;;  %v1694_v32 = vadd.f32 %v1685_v23, %v1602_v25 }
 0x181   : > { %v1874_v5 = vadd.f32 %v3244_v39, %v1786_v31  ;;  %v1785_v27 = vadd.f32 %v1776_v36, %v1694_v32 }
 0x183   : > { %v1873_v34 = vadd.f32 %v1864_v42, %v1785_v27  ;;  %v1966_v12 = vadd.f32 %v3249_v50, %v1874_v5 }
 0x185   : > { %v1965_v47 = vadd.f32 %v1956_v59, %v1873_v34  ;;  %v2057_v48 = vadd.f32 %v3254_v6, %v1966_v12 }
 0x187   : > { %v2056_v49 = vadd.f32 %v2047_v9, %v1965_v47  ;;  %v2145_v35 = vadd.f32 %v3259_v11, %v2057_v48 }
 0x189   : > { %v2144_v51 = vadd.f32 %v2135_v28, %v2056_v49  ;;  %v2237_v52 = vadd.f32 %v3264_v13, %v2145_v35 }
 0x18b   : > { %v2236_v62 = vadd.f32 %v2227_v14, %v2144_v51  ;;  %v2328_v17 = vadd.f32 %v3269_v7, %v2237_v52 }
 0x18d   : > { %v2337_v19 = vadd.f32 %v2718_v16, %v2328_v17  ;;  %v2327_v20 = vadd.f32 %v2318_v18, %v2236_v62 }
 0x18f   : > { %2339 = vst [vmem:[%s593_s14 + $0x8] sm:$0xff] %v2337_v19  ;;  %v2336_v63 = vadd.f32 %v2718_v16, %v2327_v20 }
 0x191   : > { %2338 = vst [vmem:[%s593_s14] sm:$0xff] %v2336_v63 }
 0x192 PF: > { %s20_s17 = sadd.s32 1, %s3352_s17   ;;  %s4208_s21 = sld [smem:[#allocation2_spill]] }
 0x193   : > { %p17_p10 = scmp.ge.s32.totalorder %s20_s17, 34   ;;  %s4209_s13 = smov %s3344_s15 }
 0x194   : > { %s4210_s14 = smov %s3348_s16  ;;  %s4211_s15 = smov %s4214_s18 }
 0x195   :  { %19 = sbr.rel (!%p17_p10) target bundleno = 3 (0x3), region = 121 }
 0x198   : > { %s4212_s16 = smov %s4208_s21 }

</bundles_post_ra>
